<compile_context>
chip_gen: v7x
topology: tpu7x:2x2x1
jax: 0.10.0
libtpu: 0.0.40
codegen_flags: <defaults>
</compile_context>

<pallas_src>
import functools

import jax
import jax.numpy as jnp
from jax.experimental import pallas as pl
from jax.experimental.pallas import tpu as pltpu

# Rows per grid step.  512-1024 is preferred at realistic Inception sizes
# (close to HBM roofline); 256 keeps the demo multi-block and fits easily in
# the 32 MiB scoped-VMEM default (and v7x's 64 MiB physical VMEM).
_BLOCK_M = 256


# ----------------------------- Pallas kernels ------------------------------ #

def _stage1_kernel(x_ref, x9_ref, wc_ref, bc_ref, wp_ref, bp_ref,
                   p1_ref, mid_ref, p4_ref, *, c1, cin):
    """Fused [p1_1 | p2_1 | p3_1] 1x1 convs + (3x3 max-pool -> p4_2 1x1 conv).

    x:   (TM, Cin)            input rows (bf16)
    x9:  (TM, 9*Cin)          9 shifted copies of x (-inf padded) for the pool
    wc:  (Cin, c1+c2_0+c3_0)  channel-concatenated 1x1 weights (bf16)
    bc:  (1, c1+c2_0+c3_0)    concatenated biases (f32)
    wp:  (Cin, c4), bp: (1, c4)  path-4 1x1 conv weight / bias
    """
    # One matmul for the three fused 1x1 convs, f32 accumulation.
    y = jnp.dot(x_ref[...], wc_ref[...], preferred_element_type=jnp.float32)
    y = jnp.maximum(y + bc_ref[...], 0.0)
    p1_ref[...] = y[:, :c1].astype(p1_ref.dtype)      # path-1 final output
    mid_ref[...] = y[:, c1:].astype(mid_ref.dtype)    # p2a | p3a intermediate

    # Path 4: 3x3/stride-1 max-pool from 9 pre-shifted channel slices (VPU),
    # then 1x1 conv + ReLU (MXU).
    x9 = x9_ref[...]
    m = x9[:, :cin]
    for k in range(1, 9):
        m = jnp.maximum(m, x9[:, k * cin:(k + 1) * cin])
    p4 = jnp.dot(m, wp_ref[...], preferred_element_type=jnp.float32)
    p4_ref[...] = jnp.maximum(p4 + bp_ref[...], 0.0).astype(p4_ref.dtype)


def _stage2_kernel(x9_ref, x25_ref, w3_ref, b3_ref, w5_ref, b5_ref, o_ref):
    """Fused 3x3 (path 2) and 5x5 (path 3) convs as two deep matmuls.

    x9:  (TM, 9*c2_0)   lane-concatenated im2col of p2a
    x25: (TM, 25*c3_0)  lane-concatenated im2col of p3a
    w3:  (9*c2_0, c2_1)   w5: (25*c3_0, c3_1)
    o:   (TM, c2_1 + c3_1)   lane-concatenated [p2 | p3]
    """
    p2 = jnp.dot(x9_ref[...], w3_ref[...], preferred_element_type=jnp.float32)
    p2 = jnp.maximum(p2 + b3_ref[...], 0.0)
    p3 = jnp.dot(x25_ref[...], w5_ref[...], preferred_element_type=jnp.float32)
    p3 = jnp.maximum(p3 + b5_ref[...], 0.0)
    o_ref[...] = jnp.concatenate([p2, p3], axis=-1).astype(o_ref.dtype)


# ------------------------------ JAX-side glue ------------------------------ #

def _row_spec(tm, c):
    return pl.BlockSpec((tm, c), lambda i: (i, 0))


def _full_spec(shape):
    return pl.BlockSpec(shape, lambda i: (0, 0))


def _im2col(x_nhwc, K, pad, fill):
    """Lane-concatenated im2col: (N,H,W,C) -> (N*H*W, K*K*C)."""
    N, H, W, C = x_nhwc.shape
    xp = jnp.pad(x_nhwc, ((0, 0), (pad, pad), (pad, pad), (0, 0)),
                 constant_values=fill)
    cols = [xp[:, dy:dy + H, dx:dx + W, :]
            for dy in range(K) for dx in range(K)]
    return jnp.concatenate(cols, axis=-1).reshape(N * H * W, K * K * C)


def _w1x1(w):   # (O, I, 1, 1) -> (I, O)
    return jnp.transpose(w[:, :, 0, 0], (1, 0))


def _wkxk(w):   # (O, I, K, K) -> (K*K*I, O), matching _im2col column order
    o, i, K, _ = w.shape
    return jnp.transpose(w, (2, 3, 1, 0)).reshape(K * K * i, o)


def init_inception_params(key, in_channels, c1, c2, c3, c4):
    """Deterministic synthetic parameters, stored in PyTorch OIHW layout."""
    def conv_param(k, cout, cin, ksz):
        kw, kb = jax.random.split(k)
        fan_in = cin * ksz * ksz
        w = jax.random.normal(kw, (cout, cin, ksz, ksz),
                              jnp.float32) / jnp.sqrt(float(fan_in))
        b = 0.01 * jax.random.normal(kb, (cout,), jnp.float32)
        return w, b

    keys = jax.random.split(key, 6)
    return {
        "p1_1": conv_param(keys[0], c1, in_channels, 1),
        "p2_1": conv_param(keys[1], c2[0], in_channels, 1),
        "p2_2": conv_param(keys[2], c2[1], c2[0], 3),
        "p3_1": conv_param(keys[3], c3[0], in_channels, 1),
        "p3_2": conv_param(keys[4], c3[1], c3[0], 5),
        "p4_2": conv_param(keys[5], c4, in_channels, 1),
    }


def inception_forward(params, x_nchw, *, block_m=_BLOCK_M):
    N, Cin, H, W = x_nchw.shape
    M = N * H * W
    tm = min(block_m, M)
    grid = (pl.cdiv(M, tm),)
    cp = pltpu.CompilerParams(dimension_semantics=("parallel",))
    bf16, f32 = jnp.bfloat16, jnp.float32

    x = jnp.transpose(x_nchw, (0, 2, 3, 1)).astype(bf16)   # NHWC, bf16
    xf = x.reshape(M, Cin)
    x9 = _im2col(x, 3, 1, -jnp.inf)                        # pool windows

    w1, b1 = params["p1_1"]
    w2a, b2a = params["p2_1"]
    w3a, b3a = params["p3_1"]
    w4, b4 = params["p4_2"]
    c1, c2_0, c3_0, c4 = w1.shape[0], w2a.shape[0], w3a.shape[0], w4.shape[0]
    n_mid = c2_0 + c3_0

    wc = jnp.concatenate([_w1x1(w1), _w1x1(w2a), _w1x1(w3a)],
                         axis=1).astype(bf16)
    bc = jnp.concatenate([b1, b2a, b3a]).reshape(1, -1).astype(f32)
    wp = _w1x1(w4).astype(bf16)
    bp = b4.reshape(1, -1).astype(f32)

    p1, mid, p4 = pl.pallas_call(
        functools.partial(_stage1_kernel, c1=c1, cin=Cin),
        grid=grid,
        in_specs=[_row_spec(tm, Cin),
                  _row_spec(tm, 9 * Cin),
                  _full_spec(wc.shape),
                  _full_spec(bc.shape),
                  _full_spec(wp.shape),
                  _full_spec(bp.shape)],
        out_specs=(_row_spec(tm, c1),
                   _row_spec(tm, n_mid),
                   _row_spec(tm, c4)),
        out_shape=(jax.ShapeDtypeStruct((M, c1), f32),
                   jax.ShapeDtypeStruct((M, n_mid), bf16),
                   jax.ShapeDtypeStruct((M, c4), f32)),
        compiler_params=cp,
    )(xf, x9, wc, bc, wp, bp)

    # Stage 2: deep-matmul im2col of the channel-reduced intermediates.
    mid_nhwc = mid.reshape(N, H, W, n_mid)
    im3 = _im2col(mid_nhwc[..., :c2_0], 3, 1, 0.0)   # (M, 9*c2_0)
    im5 = _im2col(mid_nhwc[..., c2_0:], 5, 2, 0.0)   # (M, 25*c3_0)

    w2, b2 = params["p2_2"]
    w3, b3 = params["p3_2"]
    c2_1, c3_1 = w2.shape[0], w3.shape[0]
    w2f = _wkxk(w2).astype(bf16)
    w3f = _wkxk(w3).astype(bf16)
    b2f = b2.reshape(1, -1).astype(f32)
    b3f = b3.reshape(1, -1).astype(f32)

    p23 = pl.pallas_call(
        _stage2_kernel,
        grid=grid,
        in_specs=[_row_spec(tm, 9 * c2_0),
                  _row_spec(tm, 25 * c3_0),
                  _full_spec(w2f.shape),
                  _full_spec(b2f.shape),
                  _full_spec(w3f.shape),
                  _full_spec(b3f.shape)],
        out_specs=_row_spec(tm, c2_1 + c3_1),
        out_shape=jax.ShapeDtypeStruct((M, c2_1 + c3_1), f32),
        compiler_params=cp,
    )(im3, im5, w2f, b2f, w3f, b3f)

    out = jnp.concatenate([p1, p23, p4], axis=-1)   # p1 | p2 | p3 | p4
    out = out.reshape(N, H, W, -1)
    return jnp.transpose(out, (0, 3, 1, 2))         # back to NCHW


inception_forward = jax.jit(inception_forward, static_argnames=("block_m",))


# --------------------------- Pure-JAX reference ---------------------------- #

def _ref_conv_relu(x_nhwc, w_oihw, b, pad):
    y = jax.lax.conv_general_dilated(
        x_nhwc, jnp.transpose(w_oihw, (2, 3, 1, 0)),
        window_strides=(1, 1), padding=[(pad, pad), (pad, pad)],
        dimension_numbers=("NHWC", "HWIO", "NHWC"))
    return jax.nn.relu(y + b.reshape(1, 1, 1, -1))


def inception_reference(params, x_nchw):
    x = jnp.transpose(x_nchw, (0, 2, 3, 1)).astype(jnp.float32)
    p1 = _ref_conv_relu(x, *params["p1_1"], 0)
    p2 = _ref_conv_relu(_ref_conv_relu(x, *params["p2_1"], 0),
                        *params["p2_2"], 1)
    p3 = _ref_conv_relu(_ref_conv_relu(x, *params["p3_1"], 0),
                        *params["p3_2"], 2)
    pool = jax.lax.reduce_window(x, -jnp.inf, jax.lax.max,
                                 (1, 3, 3, 1), (1, 1, 1, 1),
                                 [(0, 0), (1, 1), (1, 1), (0, 0)])
    p4 = _ref_conv_relu(pool, *params["p4_2"], 0)
    out = jnp.concatenate([p1, p2, p3, p4], axis=-1)
    return jnp.transpose(out, (0, 3, 1, 2))


if __name__ == "__main__":
    key = jax.random.PRNGKey(0)
    kx, kp = jax.random.split(key)

    in_channels, c1, c2, c3, c4 = 4, 4, (4, 8), (2, 4), 4
    x = jax.random.normal(kx, (2, in_channels, 16, 16), jnp.float32)
    params = init_inception_params(kp, in_channels, c1, c2, c3, c4)

    out = jax.block_until_ready(inception_forward(params, x))
    expected_shape = (2, c1 + c2[1] + c3[1] + c4, 16, 16)
    assert out.shape == expected_shape, out.shape

    ref = jax.block_until_ready(inception_reference(params, x))
    max_err = float(jnp.max(jnp.abs(out - ref)))
    # bf16 MXU inputs with f32 accumulation -> loosened tolerance.
    assert jnp.allclose(out, ref, rtol=2e-2, atol=2e-2), max_err

    print("KERNEL_OK")
</pallas_src>

<mosaic_0001>
module attributes {stable_mosaic.version = 11 : i64} {
  func.func @_stage1_kernel(%arg0: i32, %arg1: memref<256x4xbf16, #tpu.memory_space<vmem>>, %arg2: memref<256x36xbf16, #tpu.memory_space<vmem>>, %arg3: memref<4x10xbf16, #tpu.memory_space<vmem>>, %arg4: memref<1x10xf32, #tpu.memory_space<vmem>>, %arg5: memref<4x4xbf16, #tpu.memory_space<vmem>>, %arg6: memref<1x4xf32, #tpu.memory_space<vmem>>, %arg7: memref<256x4xf32, #tpu.memory_space<vmem>>, %arg8: memref<256x6xbf16, #tpu.memory_space<vmem>>, %arg9: memref<256x4xf32, #tpu.memory_space<vmem>>) attributes {dimension_semantics = [#tpu.dimension_semantics<parallel>], iteration_bounds = array<i64: 2>, scalar_prefetch = 0 : i64, scratch_operands = 0 : i64, tpu.core_type = #tpu.core_type<tc>, window_params = [{transform_indices = @transform_0, window_bounds = array<i64: 256, 4>}, {transform_indices = @transform_1, window_bounds = array<i64: 256, 36>}, {pipeline_mode = #tpu.pipeline_mode<synchronous>, transform_indices = @transform_2, window_bounds = array<i64: 4, 10>}, {pipeline_mode = #tpu.pipeline_mode<synchronous>, transform_indices = @transform_3, window_bounds = array<i64: 1, 10>}, {pipeline_mode = #tpu.pipeline_mode<synchronous>, transform_indices = @transform_4, window_bounds = array<i64: 4, 4>}, {pipeline_mode = #tpu.pipeline_mode<synchronous>, transform_indices = @transform_5, window_bounds = array<i64: 1, 4>}, {transform_indices = @transform_6, window_bounds = array<i64: 256, 4>}, {transform_indices = @transform_7, window_bounds = array<i64: 256, 6>}, {transform_indices = @transform_8, window_bounds = array<i64: 256, 4>}]} {
    %c0 = arith.constant 0 : index
    %c0_0 = arith.constant 0 : index
    %0 = vector.load %arg1[%c0, %c0_0] : memref<256x4xbf16, #tpu.memory_space<vmem>>, vector<256x4xbf16>
    %c0_1 = arith.constant 0 : index
    %c0_2 = arith.constant 0 : index
    %1 = vector.load %arg3[%c0_1, %c0_2] : memref<4x10xbf16, #tpu.memory_space<vmem>>, vector<4x10xbf16>
    %cst = arith.constant dense<0.000000e+00> : vector<256x10xf32>
    %2 = tpu.matmul %0, %1, %cst {dimension_numbers = #tpu.dot_dimension_numbers<[1], [0], [0], [1], [0, 0, 1, 1], [], []>} : vector<256x4xbf16>, vector<4x10xbf16>, vector<256x10xf32> -> vector<256x10xf32>
    %c0_3 = arith.constant 0 : index
    %c0_4 = arith.constant 0 : index
    %3 = vector.load %arg4[%c0_3, %c0_4] : memref<1x10xf32, #tpu.memory_space<vmem>>, vector<1x10xf32>
    %4 = vector.broadcast %3 : vector<1x10xf32> to vector<256x10xf32>
    %5 = arith.addf %2, %4 : vector<256x10xf32>
    %cst_5 = arith.constant 0.000000e+00 : f32
    %6 = vector.broadcast %cst_5 : f32 to vector<256x10xf32>
    %7 = arith.maximumf %5, %6 : vector<256x10xf32>
    %8 = vector.extract_strided_slice %7 {offsets = [0, 0], sizes = [256, 4], strides = [1, 1]} : vector<256x10xf32> to vector<256x4xf32>
    %c0_6 = arith.constant 0 : index
    %c0_7 = arith.constant 0 : index
    %9 = vector.load %arg7[%c0_6, %c0_7] : memref<256x4xf32, #tpu.memory_space<vmem>>, vector<256x4xf32>
    tpu.vector_store %arg7[%c0_6, %c0_7], %8 {strides = array<i32>} : memref<256x4xf32, #tpu.memory_space<vmem>>, vector<256x4xf32>,
    %10 = vector.extract_strided_slice %7 {offsets = [0, 4], sizes = [256, 6], strides = [1, 1]} : vector<256x10xf32> to vector<256x6xf32>
    %11 = arith.truncf %10 : vector<256x6xf32> to vector<256x6xbf16>
    %c0_8 = arith.constant 0 : index
    %c0_9 = arith.constant 0 : index
    %12 = vector.load %arg8[%c0_8, %c0_9] : memref<256x6xbf16, #tpu.memory_space<vmem>>, vector<256x6xbf16>
    tpu.vector_store %arg8[%c0_8, %c0_9], %11 {strides = array<i32>} : memref<256x6xbf16, #tpu.memory_space<vmem>>, vector<256x6xbf16>,
    %c0_10 = arith.constant 0 : index
    %c0_11 = arith.constant 0 : index
    %13 = vector.load %arg2[%c0_10, %c0_11] : memref<256x36xbf16, #tpu.memory_space<vmem>>, vector<256x36xbf16>
    %14 = vector.extract_strided_slice %13 {offsets = [0, 0], sizes = [256, 4], strides = [1, 1]} : vector<256x36xbf16> to vector<256x4xbf16>
    %15 = vector.extract_strided_slice %13 {offsets = [0, 4], sizes = [256, 4], strides = [1, 1]} : vector<256x36xbf16> to vector<256x4xbf16>
    %16 = arith.maximumf %14, %15 : vector<256x4xbf16>
    %17 = vector.extract_strided_slice %13 {offsets = [0, 8], sizes = [256, 4], strides = [1, 1]} : vector<256x36xbf16> to vector<256x4xbf16>
    %18 = arith.maximumf %16, %17 : vector<256x4xbf16>
    %19 = vector.extract_strided_slice %13 {offsets = [0, 12], sizes = [256, 4], strides = [1, 1]} : vector<256x36xbf16> to vector<256x4xbf16>
    %20 = arith.maximumf %18, %19 : vector<256x4xbf16>
    %21 = vector.extract_strided_slice %13 {offsets = [0, 16], sizes = [256, 4], strides = [1, 1]} : vector<256x36xbf16> to vector<256x4xbf16>
    %22 = arith.maximumf %20, %21 : vector<256x4xbf16>
    %23 = vector.extract_strided_slice %13 {offsets = [0, 20], sizes = [256, 4], strides = [1, 1]} : vector<256x36xbf16> to vector<256x4xbf16>
    %24 = arith.maximumf %22, %23 : vector<256x4xbf16>
    %25 = vector.extract_strided_slice %13 {offsets = [0, 24], sizes = [256, 4], strides = [1, 1]} : vector<256x36xbf16> to vector<256x4xbf16>
    %26 = arith.maximumf %24, %25 : vector<256x4xbf16>
    %27 = vector.extract_strided_slice %13 {offsets = [0, 28], sizes = [256, 4], strides = [1, 1]} : vector<256x36xbf16> to vector<256x4xbf16>
    %28 = arith.maximumf %26, %27 : vector<256x4xbf16>
    %29 = vector.extract_strided_slice %13 {offsets = [0, 32], sizes = [256, 4], strides = [1, 1]} : vector<256x36xbf16> to vector<256x4xbf16>
    %30 = arith.maximumf %28, %29 : vector<256x4xbf16>
    %c0_12 = arith.constant 0 : index
    %c0_13 = arith.constant 0 : index
    %31 = vector.load %arg5[%c0_12, %c0_13] : memref<4x4xbf16, #tpu.memory_space<vmem>>, vector<4x4xbf16>
    %cst_14 = arith.constant dense<0.000000e+00> : vector<256x4xf32>
    %32 = tpu.matmul %30, %31, %cst_14 {dimension_numbers = #tpu.dot_dimension_numbers<[1], [0], [0], [1], [0, 0, 1, 1], [], []>} : vector<256x4xbf16>, vector<4x4xbf16>, vector<256x4xf32> -> vector<256x4xf32>
    %c0_15 = arith.constant 0 : index
    %c0_16 = arith.constant 0 : index
    %33 = vector.load %arg6[%c0_15, %c0_16] : memref<1x4xf32, #tpu.memory_space<vmem>>, vector<1x4xf32>
    %34 = vector.broadcast %33 : vector<1x4xf32> to vector<256x4xf32>
    %35 = arith.addf %32, %34 : vector<256x4xf32>
    %cst_17 = arith.constant 0.000000e+00 : f32
    %36 = vector.broadcast %cst_17 : f32 to vector<256x4xf32>
    %37 = arith.maximumf %35, %36 : vector<256x4xf32>
    %c0_18 = arith.constant 0 : index
    %c0_19 = arith.constant 0 : index
    %38 = vector.load %arg9[%c0_18, %c0_19] : memref<256x4xf32, #tpu.memory_space<vmem>>, vector<256x4xf32>
    tpu.vector_store %arg9[%c0_18, %c0_19], %37 {strides = array<i32>} : memref<256x4xf32, #tpu.memory_space<vmem>>, vector<256x4xf32>,
    return
  }
  func.func @transform_0(%arg0: i32) -> (i32, i32) {
    %c0_i32 = arith.constant 0 : i32
    %c0_i32_0 = arith.constant 0 : i32
    return %arg0, %c0_i32 : i32, i32
  }
  func.func @transform_1(%arg0: i32) -> (i32, i32) {
    %c0_i32 = arith.constant 0 : i32
    %c0_i32_0 = arith.constant 0 : i32
    return %arg0, %c0_i32 : i32, i32
  }
  func.func @transform_2(%arg0: i32) -> (i32, i32) {
    %c0_i32 = arith.constant 0 : i32
    %c0_i32_0 = arith.constant 0 : i32
    %c0_i32_1 = arith.constant 0 : i32
    return %c0_i32, %c0_i32_0 : i32, i32
  }
  func.func @transform_3(%arg0: i32) -> (i32, i32) {
    %c0_i32 = arith.constant 0 : i32
    %c0_i32_0 = arith.constant 0 : i32
    %c0_i32_1 = arith.constant 0 : i32
    return %c0_i32, %c0_i32_0 : i32, i32
  }
  func.func @transform_4(%arg0: i32) -> (i32, i32) {
    %c0_i32 = arith.constant 0 : i32
    %c0_i32_0 = arith.constant 0 : i32
    %c0_i32_1 = arith.constant 0 : i32
    return %c0_i32, %c0_i32_0 : i32, i32
  }
  func.func @transform_5(%arg0: i32) -> (i32, i32) {
    %c0_i32 = arith.constant 0 : i32
    %c0_i32_0 = arith.constant 0 : i32
    %c0_i32_1 = arith.constant 0 : i32
    return %c0_i32, %c0_i32_0 : i32, i32
  }
  func.func @transform_6(%arg0: i32) -> (i32, i32) {
    %c0_i32 = arith.constant 0 : i32
    %c0_i32_0 = arith.constant 0 : i32
    return %arg0, %c0_i32 : i32, i32
  }
  func.func @transform_7(%arg0: i32) -> (i32, i32) {
    %c0_i32 = arith.constant 0 : i32
    %c0_i32_0 = arith.constant 0 : i32
    return %arg0, %c0_i32 : i32, i32
  }
  func.func @transform_8(%arg0: i32) -> (i32, i32) {
    %c0_i32 = arith.constant 0 : i32
    %c0_i32_0 = arith.constant 0 : i32
    return %arg0, %c0_i32 : i32, i32
  }
}

module attributes {stable_mosaic.version = 11 : i64} {
  func.func @_stage2_kernel(%arg0: i32, %arg1: memref<256x36xbf16, #tpu.memory_space<vmem>>, %arg2: memref<256x50xbf16, #tpu.memory_space<vmem>>, %arg3: memref<36x8xbf16, #tpu.memory_space<vmem>>, %arg4: memref<1x8xf32, #tpu.memory_space<vmem>>, %arg5: memref<50x4xbf16, #tpu.memory_space<vmem>>, %arg6: memref<1x4xf32, #tpu.memory_space<vmem>>, %arg7: memref<256x12xf32, #tpu.memory_space<vmem>>) attributes {dimension_semantics = [#tpu.dimension_semantics<parallel>], iteration_bounds = array<i64: 2>, scalar_prefetch = 0 : i64, scratch_operands = 0 : i64, tpu.core_type = #tpu.core_type<tc>, window_params = [{transform_indices = @transform_0, window_bounds = array<i64: 256, 36>}, {transform_indices = @transform_1, window_bounds = array<i64: 256, 50>}, {pipeline_mode = #tpu.pipeline_mode<synchronous>, transform_indices = @transform_2, window_bounds = array<i64: 36, 8>}, {pipeline_mode = #tpu.pipeline_mode<synchronous>, transform_indices = @transform_3, window_bounds = array<i64: 1, 8>}, {pipeline_mode = #tpu.pipeline_mode<synchronous>, transform_indices = @transform_4, window_bounds = array<i64: 50, 4>}, {pipeline_mode = #tpu.pipeline_mode<synchronous>, transform_indices = @transform_5, window_bounds = array<i64: 1, 4>}, {transform_indices = @transform_6, window_bounds = array<i64: 256, 12>}]} {
    %c0 = arith.constant 0 : index
    %c0_0 = arith.constant 0 : index
    %0 = vector.load %arg1[%c0, %c0_0] : memref<256x36xbf16, #tpu.memory_space<vmem>>, vector<256x36xbf16>
    %c0_1 = arith.constant 0 : index
    %c0_2 = arith.constant 0 : index
    %1 = vector.load %arg3[%c0_1, %c0_2] : memref<36x8xbf16, #tpu.memory_space<vmem>>, vector<36x8xbf16>
    %cst = arith.constant dense<0.000000e+00> : vector<256x8xf32>
    %2 = tpu.matmul %0, %1, %cst {dimension_numbers = #tpu.dot_dimension_numbers<[1], [0], [0], [1], [0, 0, 1, 1], [], []>} : vector<256x36xbf16>, vector<36x8xbf16>, vector<256x8xf32> -> vector<256x8xf32>
    %c0_3 = arith.constant 0 : index
    %c0_4 = arith.constant 0 : index
    %3 = vector.load %arg4[%c0_3, %c0_4] : memref<1x8xf32, #tpu.memory_space<vmem>>, vector<1x8xf32>
    %4 = vector.broadcast %3 : vector<1x8xf32> to vector<256x8xf32>
    %5 = arith.addf %2, %4 : vector<256x8xf32>
    %cst_5 = arith.constant 0.000000e+00 : f32
    %6 = vector.broadcast %cst_5 : f32 to vector<256x8xf32>
    %7 = arith.maximumf %5, %6 : vector<256x8xf32>
    %c0_6 = arith.constant 0 : index
    %c0_7 = arith.constant 0 : index
    %8 = vector.load %arg2[%c0_6, %c0_7] : memref<256x50xbf16, #tpu.memory_space<vmem>>, vector<256x50xbf16>
    %c0_8 = arith.constant 0 : index
    %c0_9 = arith.constant 0 : index
    %9 = vector.load %arg5[%c0_8, %c0_9] : memref<50x4xbf16, #tpu.memory_space<vmem>>, vector<50x4xbf16>
    %cst_10 = arith.constant dense<0.000000e+00> : vector<256x4xf32>
    %10 = tpu.matmul %8, %9, %cst_10 {dimension_numbers = #tpu.dot_dimension_numbers<[1], [0], [0], [1], [0, 0, 1, 1], [], []>} : vector<256x50xbf16>, vector<50x4xbf16>, vector<256x4xf32> -> vector<256x4xf32>
    %c0_11 = arith.constant 0 : index
    %c0_12 = arith.constant 0 : index
    %11 = vector.load %arg6[%c0_11, %c0_12] : memref<1x4xf32, #tpu.memory_space<vmem>>, vector<1x4xf32>
    %12 = vector.broadcast %11 : vector<1x4xf32> to vector<256x4xf32>
    %13 = arith.addf %10, %12 : vector<256x4xf32>
    %cst_13 = arith.constant 0.000000e+00 : f32
    %14 = vector.broadcast %cst_13 : f32 to vector<256x4xf32>
    %15 = arith.maximumf %13, %14 : vector<256x4xf32>
    %16 = tpu.concatenate %7, %15 in 1 : vector<256x8xf32>, vector<256x4xf32> -> vector<256x12xf32>
    %c0_14 = arith.constant 0 : index
    %c0_15 = arith.constant 0 : index
    %17 = vector.load %arg7[%c0_14, %c0_15] : memref<256x12xf32, #tpu.memory_space<vmem>>, vector<256x12xf32>
    tpu.vector_store %arg7[%c0_14, %c0_15], %16 {strides = array<i32>} : memref<256x12xf32, #tpu.memory_space<vmem>>, vector<256x12xf32>,
    return
  }
  func.func @transform_0(%arg0: i32) -> (i32, i32) {
    %c0_i32 = arith.constant 0 : i32
    %c0_i32_0 = arith.constant 0 : i32
    return %arg0, %c0_i32 : i32, i32
  }
  func.func @transform_1(%arg0: i32) -> (i32, i32) {
    %c0_i32 = arith.constant 0 : i32
    %c0_i32_0 = arith.constant 0 : i32
    return %arg0, %c0_i32 : i32, i32
  }
  func.func @transform_2(%arg0: i32) -> (i32, i32) {
    %c0_i32 = arith.constant 0 : i32
    %c0_i32_0 = arith.constant 0 : i32
    %c0_i32_1 = arith.constant 0 : i32
    return %c0_i32, %c0_i32_0 : i32, i32
  }
  func.func @transform_3(%arg0: i32) -> (i32, i32) {
    %c0_i32 = arith.constant 0 : i32
    %c0_i32_0 = arith.constant 0 : i32
    %c0_i32_1 = arith.constant 0 : i32
    return %c0_i32, %c0_i32_0 : i32, i32
  }
  func.func @transform_4(%arg0: i32) -> (i32, i32) {
    %c0_i32 = arith.constant 0 : i32
    %c0_i32_0 = arith.constant 0 : i32
    %c0_i32_1 = arith.constant 0 : i32
    return %c0_i32, %c0_i32_0 : i32, i32
  }
  func.func @transform_5(%arg0: i32) -> (i32, i32) {
    %c0_i32 = arith.constant 0 : i32
    %c0_i32_0 = arith.constant 0 : i32
    %c0_i32_1 = arith.constant 0 : i32
    return %c0_i32, %c0_i32_0 : i32, i32
  }
  func.func @transform_6(%arg0: i32) -> (i32, i32) {
    %c0_i32 = arith.constant 0 : i32
    %c0_i32_0 = arith.constant 0 : i32
    return %arg0, %c0_i32 : i32, i32
  }
}

</mosaic_0001>

<bundles_post_ra>
// kernel: inception_forward.2
= control target key start
LH: loop header
LB: loop body
LE: loop exit
PB: predicated region body
PF: predicated region fallthrough
CT: control target
= control target key end

     0   :  { %s2946_s27 = smov 0   ;;  %s4413_s0 = inlined_call_operand.vmem [shape: bf16[512,4], index: 0, kind: input, shape index: {}]   ;;  %s4414_s1 = inlined_call_operand.vmem [shape: bf16[512,36], index: 1, kind: input, shape index: {}]   ;;  %s4415_s2 = inlined_call_operand.vmem [shape: bf16[4,10], index: 2, kind: input, shape index: {}]   ;;  %s4416_s3 = inlined_call_operand.vmem [shape: f32[1,10], index: 3, kind: input, shape index: {}]   ;;  %s4417_s4 = inlined_call_operand.vmem [shape: bf16[4,4], index: 4, kind: input, shape index: {}]   ;;  %s4418_s5 = inlined_call_operand.vmem [shape: f32[1,4], index: 5, kind: input, shape index: {}]   ;;  %s4419_s6 = inlined_call_operand.vmem [shape: f32[512,4], index: 6, kind: output, shape index: {0}]   ;;  %s4420_s7 = inlined_call_operand.vmem [shape: bf16[512,6], index: 7, kind: output, shape index: {1}]   ;;  %s4421_s8 = inlined_call_operand.vmem [shape: f32[512,4], index: 8, kind: output, shape index: {2}]  }
   0x1 LB: > { %s2570_s28 = sadd.s32 4294967295, %s2891_s27   ;;  %p2574_p0 = scmp.ge.s32.totalorder %s2891_s27, 1  ;;  %s2891_s27 = sphi %s2946_s27, %s19_s27  }
   0x2   : > { %p279_p1 = scmp.lt.s32.totalorder %s2891_s27, 3 }
   0x4   : > { %p280_p2 = pnand %p2574_p0, %p279_p1 }
   0x6   : > { %283 = sbr.rel (%p280_p2) target bundleno = 932 (0x3a4), region = 44 }
   0xd   : > { %v391_v0 = vld [vmem:[%s4415_s2] sm:$0x3]  ;;  %vm528_vm0 = vcmask 1041408   ;;  %s2575_s9 = sshll.u32 %s2570_s28, 5  ;;  %vm479_vm1 = vcmask 31744   ;;  %s2893_s17 = smov 124  }
   0xe   : > { %2819 = vmatprep.subr.msk.bf16.mxu0 %vm528_vm0, %v391_v0  ;;  %v530_v1 = vsel %vm528_vm0, %v391_v0, 0  ;;  %p329_p3 = scmp.lt.s32.totalorder %s2575_s9, 63  ;;  %s2894_s18 = smov 120   ;;  %vm949_vm2 = vcmask 44032  }
   0xf   : > { %2752 = vmatpush3.bf16.msra.mxu0 %v530_v1  ;;  %s2895_s19 = smov 116   ;;  %s2896_s20 = smov 112  }
  0x10   : > { %s4517_s9 = smov (!%p329_p3, %s2575_s9), 63  ;;  %s2897_s21 = smov 108  }
  0x11   : > { %s2962_s10 = sshll.u32 %s4517_s9, 2  ;;  %s2898_s22 = smov 104  }
  0x12   : > { %s2968_s13 = scalar_lea.vmem %s4414_s1, %s2962_s10  ;;  %s2974_s16 = scalar_lea.vmem %s4413_s0, %s2962_s10 }
  0x13   : > { %v2977_v2 = vld [vmem:[%s2968_s13 + $0x4] sm:$0xf]  ;;  %v2980_v3 = vld [vmem:[%s2968_s13] sm:$0xf]  ;;  %v2838_v5 = vld [vmem:[%s2974_s16 + $0x8] sm:$0xff]   ;;  %s2899_s23 = smov 100  }
  0x14   : > { %1048 = vrot.lane.b32.xlu1 %v2977_v2, %s2893_s17  ;;  %1046 = vrot.lane.b32.xlu0 %v2980_v3, %s2893_s17  ;;  %v2837_v4 = vld [vmem:[%s2974_s16] sm:$0xff]   ;;  %v2990_v6 = vld [vmem:[%s2968_s13 + $0xc] sm:$0xf]  ;;  %s2900_s24 = smov 96   ;;  %s2580_s30 = sshll.u32 %s4517_s9, 3 }
  0x15   : > { %2753 = vmatprep.mubr.msk.bf16.mxu0 %vm479_vm1, %v2837_v4  ;;  %v2993_v7 = vld [vmem:[%s2968_s13 + $0x8] sm:$0xf]  ;;  %v2839_v8 = vld [vmem:[%s2974_s16 + $0x10] sm:$0xff]   ;;  %v2840_v11 = vld [vmem:[%s2974_s16 + $0x18] sm:$0xff]   ;;  %s3393_s14 = scalar_lea.vmem %s4419_s6, %s2580_s30 }
  0x16   : > { %2754 = vmatmul.mubr.msk.bf16.vlgmr.msra.gmra.mrb[0].mxu0 %vm479_vm1, %v2838_v5  ;;  %v3002_v9 = vld [vmem:[%s2968_s13 + $0x14] sm:$0xf]  ;;  %v3005_v10 = vld [vmem:[%s2968_s13 + $0x10] sm:$0xf]  ;;  %v3014_v12 = vld [vmem:[%s2968_s13 + $0x1c] sm:$0xf] }
  0x17   : > { %2757 = vmatprep.mubr.msk.bf16.mxu0 %vm479_vm1, %v2839_v8  ;;  %v3017_v13 = vld [vmem:[%s2968_s13 + $0x18] sm:$0xf]  ;;  %v2841_v14 = vld [vmem:[%s2974_s16 + $0x20] sm:$0xff]   ;;  %v2842_v17 = vld [vmem:[%s2974_s16 + $0x28] sm:$0xff]  }
  0x18   : > { %1052 = vrot.lane.b32.xlu1 %v2990_v6, %s2893_s17  ;;  %1050 = vrot.lane.b32.xlu0 %v2993_v7, %s2893_s17  ;;  %v3026_v15 = vld [vmem:[%s2968_s13 + $0x24] sm:$0xf]  ;;  %v3029_v16 = vld [vmem:[%s2968_s13 + $0x20] sm:$0xf] }
  0x19   : > { %v3038_v18 = vld [vmem:[%s2968_s13 + $0x2c] sm:$0xf]  ;;  %v3041_v19 = vld [vmem:[%s2968_s13 + $0x28] sm:$0xf]  ;;  %v2843_v20 = vld [vmem:[%s2974_s16 + $0x30] sm:$0xff]  }
  0x1a   : > { %v3050_v21 = vld [vmem:[%s2968_s13 + $0x34] sm:$0xf]  ;;  %v3053_v22 = vld [vmem:[%s2968_s13 + $0x30] sm:$0xf]  ;;  %v2844_v23 = vld [vmem:[%s2974_s16 + $0x38] sm:$0xff]  }
  0x1b   : > { %v3062_v24 = vld [vmem:[%s2968_s13 + $0x3c] sm:$0xf]  ;;  %v3065_v25 = vld [vmem:[%s2968_s13 + $0x38] sm:$0xf]  ;;  %v2845_v26 = vld [vmem:[%s2974_s16 + $0x40] sm:$0xff]  }
  0x1c   : > { %1056 = vrot.lane.b32.xlu1 %v3002_v9, %s2893_s17  ;;  %1054 = vrot.lane.b32.xlu0 %v3005_v10, %s2893_s17  ;;  %v3074_v27 = vld [vmem:[%s2968_s13 + $0x44] sm:$0xf]  ;;  %v3077_v28 = vld [vmem:[%s2968_s13 + $0x40] sm:$0xf] }
  0x1d   : > { %v2846_v29 = vld [vmem:[%s2974_s16 + $0x48] sm:$0xff]   ;;  %v2847_v32 = vld [vmem:[%s2974_s16 + $0x50] sm:$0xff]   ;;  %v2848_v35 = vld [vmem:[%s2974_s16 + $0x58] sm:$0xff]  }
  0x1e   : > { %2758 = vmatmul.mubr.msk.bf16.gmra.mrb[4].mxu0 %vm479_vm1, %v2840_v11  ;;  %v1001_v30 = vld [vmem:[%s2968_s13 + $0x4c] sm:$0xf]  ;;  %v3087_v31 = vld [vmem:[%s2968_s13 + $0x48] sm:$0xf]  ;;  %v1003_v33 = vld [vmem:[%s2968_s13 + $0x54] sm:$0xf] }
  0x1f   : > { %2761 = vmatprep.mubr.msk.bf16.mxu0 %vm479_vm1, %v2841_v14  ;;  %v1002_v34 = vld [vmem:[%s2968_s13 + $0x50] sm:$0xf]  ;;  %v1005_v36 = vld [vmem:[%s2968_s13 + $0x5c] sm:$0xf]  ;;  %v1004_v37 = vld [vmem:[%s2968_s13 + $0x58] sm:$0xf] }
  0x20   : > { %1060 = vrot.lane.b32.xlu1 %v3014_v12, %s2893_s17  ;;  %1058 = vrot.lane.b32.xlu0 %v3017_v13, %s2893_s17  ;;  %v2849_v38 = vld [vmem:[%s2974_s16 + $0x60] sm:$0xff]   ;;  %v2850_v41 = vld [vmem:[%s2974_s16 + $0x68] sm:$0xff]  }
  0x21   : > { %v1007_v39 = vld [vmem:[%s2968_s13 + $0x64] sm:$0xf]  ;;  %v1006_v40 = vld [vmem:[%s2968_s13 + $0x60] sm:$0xf]  ;;  %v1009_v42 = vld [vmem:[%s2968_s13 + $0x6c] sm:$0xf] }
  0x22   : > { %v1008_v43 = vld [vmem:[%s2968_s13 + $0x68] sm:$0xf]  ;;  %v2851_v44 = vld [vmem:[%s2974_s16 + $0x70] sm:$0xff]   ;;  %v2852_v47 = vld [vmem:[%s2974_s16 + $0x78] sm:$0xff]  }
  0x23   : > { %v1011_v45 = vld [vmem:[%s2968_s13 + $0x74] sm:$0xf]  ;;  %v1010_v46 = vld [vmem:[%s2968_s13 + $0x70] sm:$0xf]  ;;  %v1013_v48 = vld [vmem:[%s2968_s13 + $0x7c] sm:$0xf] }
  0x24   : > { %1064 = vrot.lane.b32.xlu1 %v3026_v15, %s2893_s17  ;;  %1062 = vrot.lane.b32.xlu0 %v3029_v16, %s2893_s17  ;;  %v1012_v49 = vld [vmem:[%s2968_s13 + $0x78] sm:$0xf] }
  0x26   : > { %2762 = vmatmul.mubr.msk.bf16.gmra.mrb[8].mxu0 %vm479_vm1, %v2842_v17 }
  0x27   : > { %2765 = vmatprep.mubr.msk.bf16.mxu0 %vm479_vm1, %v2843_v20 }
  0x28   : > { %1068 = vrot.lane.b32.xlu1 %v3038_v18, %s2893_s17  ;;  %1066 = vrot.lane.b32.xlu0 %v3041_v19, %s2893_s17 }
  0x2c   : > { %1072 = vrot.lane.b32.xlu1 %v3050_v21, %s2893_s17  ;;  %1070 = vrot.lane.b32.xlu0 %v3053_v22, %s2893_s17 }
  0x2e   : > { %2766 = vmatmul.mubr.msk.bf16.gmra.mrb[12].mxu0 %vm479_vm1, %v2844_v23 }
  0x2f   : > { %2769 = vmatprep.mubr.msk.bf16.mxu0 %vm479_vm1, %v2845_v26 }
  0x30   : > { %1076 = vrot.lane.b32.xlu1 %v3062_v24, %s2893_s17  ;;  %1074 = vrot.lane.b32.xlu0 %v3065_v25, %s2893_s17 }
  0x34   : > { %1080 = vrot.lane.b32.xlu1 %v3074_v27, %s2893_s17  ;;  %1078 = vrot.lane.b32.xlu0 %v3077_v28, %s2893_s17 }
  0x36   : > { %2770 = vmatmul.mubr.msk.bf16.gmra.mrb[16].mxu0 %vm479_vm1, %v2846_v29 }
  0x37   : > { %2773 = vmatprep.mubr.msk.bf16.mxu0 %vm479_vm1, %v2847_v32 }
  0x38   : > { %1084 = vrot.lane.b32.xlu1 %v1001_v30, %s2893_s17  ;;  %1082 = vrot.lane.b32.xlu0 %v3087_v31, %s2893_s17 }
  0x3c   : > { %1088 = vrot.lane.b32.xlu1 %v1003_v33, %s2893_s17  ;;  %1086 = vrot.lane.b32.xlu0 %v1002_v34, %s2893_s17 }
  0x3e   : > { %2774 = vmatmul.mubr.msk.bf16.gmra.mrb[20].mxu0 %vm479_vm1, %v2848_v35 }
  0x3f   : > { %2777 = vmatprep.mubr.msk.bf16.mxu0 %vm479_vm1, %v2849_v38 }
  0x40   : > { %1092 = vrot.lane.b32.xlu1 %v1005_v36, %s2893_s17  ;;  %1090 = vrot.lane.b32.xlu0 %v1004_v37, %s2893_s17 }
  0x44   : > { %1096 = vrot.lane.b32.xlu1 %v1007_v39, %s2893_s17  ;;  %1094 = vrot.lane.b32.xlu0 %v1006_v40, %s2893_s17 }
  0x46   : > { %2778 = vmatmul.mubr.msk.bf16.gmra.mrb[24].mxu0 %vm479_vm1, %v2850_v41 }
  0x47   : > { %2781 = vmatprep.mubr.msk.bf16.mxu0 %vm479_vm1, %v2851_v44 }
  0x48   : > { %1100 = vrot.lane.b32.xlu1 %v1009_v42, %s2893_s17  ;;  %1098 = vrot.lane.b32.xlu0 %v1008_v43, %s2893_s17 }
  0x4c   : > { %1104 = vrot.lane.b32.xlu1 %v1011_v45, %s2893_s17  ;;  %1102 = vrot.lane.b32.xlu0 %v1010_v46, %s2893_s17 }
  0x4e   : > { %2782 = vmatmul.mubr.msk.bf16.gmra.mrb[28].mxu0 %vm479_vm1, %v2852_v47 }
  0x50   : > { %1108 = vrot.lane.b32.xlu1 %v1013_v48, %s2893_s17  ;;  %1106 = vrot.lane.b32.xlu0 %v1012_v49, %s2893_s17 }
  0x54   : > { %1176 = vrot.lane.b32.xlu1 %v2977_v2, %s2894_s18  ;;  %1174 = vrot.lane.b32.xlu0 %v2980_v3, %s2894_s18 }
  0x58   : > { %1180 = vrot.lane.b32.xlu1 %v2990_v6, %s2894_s18  ;;  %1178 = vrot.lane.b32.xlu0 %v2993_v7, %s2894_s18 }
  0x5c   : > { %1184 = vrot.lane.b32.xlu1 %v3002_v9, %s2894_s18  ;;  %1182 = vrot.lane.b32.xlu0 %v3005_v10, %s2894_s18 }
  0x60   : > { %1188 = vrot.lane.b32.xlu1 %v3014_v12, %s2894_s18  ;;  %1186 = vrot.lane.b32.xlu0 %v3017_v13, %s2894_s18 }
  0x64   : > { %1192 = vrot.lane.b32.xlu1 %v3026_v15, %s2894_s18  ;;  %1190 = vrot.lane.b32.xlu0 %v3029_v16, %s2894_s18 }
  0x68   : > { %1196 = vrot.lane.b32.xlu1 %v3038_v18, %s2894_s18  ;;  %1194 = vrot.lane.b32.xlu0 %v3041_v19, %s2894_s18 }
  0x6c   : > { %1200 = vrot.lane.b32.xlu1 %v3050_v21, %s2894_s18  ;;  %1198 = vrot.lane.b32.xlu0 %v3053_v22, %s2894_s18 }
  0x70   : > { %1204 = vrot.lane.b32.xlu1 %v3062_v24, %s2894_s18  ;;  %1202 = vrot.lane.b32.xlu0 %v3065_v25, %s2894_s18 }
  0x74   : > { %1208 = vrot.lane.b32.xlu1 %v3074_v27, %s2894_s18  ;;  %1206 = vrot.lane.b32.xlu0 %v3077_v28, %s2894_s18 }
  0x78   : > { %1212 = vrot.lane.b32.xlu1 %v1001_v30, %s2894_s18  ;;  %1210 = vrot.lane.b32.xlu0 %v3087_v31, %s2894_s18 }
  0x7c   : > { %1216 = vrot.lane.b32.xlu1 %v1003_v33, %s2894_s18  ;;  %1214 = vrot.lane.b32.xlu0 %v1002_v34, %s2894_s18 }
  0x80   : > { %1220 = vrot.lane.b32.xlu1 %v1005_v36, %s2894_s18  ;;  %1218 = vrot.lane.b32.xlu0 %v1004_v37, %s2894_s18 }
  0x84   : > { %1224 = vrot.lane.b32.xlu1 %v1007_v39, %s2894_s18  ;;  %1222 = vrot.lane.b32.xlu0 %v1006_v40, %s2894_s18 }
  0x86   : > { %v3174_v50 = vpop.permute.xlu1 %1048  ;;  %v3176_v51 = vpop.permute.xlu0 %1046 }
  0x88   : > { %1228 = vrot.lane.b32.xlu1 %v1009_v42, %s2894_s18  ;;  %1226 = vrot.lane.b32.xlu0 %v1008_v43, %s2894_s18  ;;  %v2070_v42 = vld [vmem:[%s4417_s4] sm:$0x3] }
  0x89   : > { %2820 = vmatprep.subr.msk.bf16.mxu1 %vm528_vm0, %v2070_v42  ;;  %v2207_v43 = vsel %vm528_vm0, %v2070_v42, 0 }
  0x8a   : > { %v3180_v52 = vpop.permute.xlu1 %1052  ;;  %v3182_v53 = vpop.permute.xlu0 %1050  ;;  %2786 = vmatpush3.bf16.msra.mxu1 %v2207_v43 }
  0x8c   : > { %1232 = vrot.lane.b32.xlu1 %v1011_v45, %s2894_s18  ;;  %1230 = vrot.lane.b32.xlu0 %v1010_v46, %s2894_s18 }
  0x8e   : > { %v3186_v54 = vpop.permute.xlu1 %1056  ;;  %v3188_v55 = vpop.permute.xlu0 %1054 }
  0x90   : > { %1236 = vrot.lane.b32.xlu1 %v1013_v48, %s2894_s18  ;;  %1234 = vrot.lane.b32.xlu0 %v1012_v49, %s2894_s18 }
  0x92   : > { %v3192_v56 = vpop.permute.xlu1 %1060  ;;  %v3194_v57 = vpop.permute.xlu0 %1058 }
  0x94   : > { %1304 = vrot.lane.b32.xlu1 %v2977_v2, %s2895_s19  ;;  %1302 = vrot.lane.b32.xlu0 %v2980_v3, %s2895_s19 }
  0x96   : > { %v3200_v58 = vpop.permute.xlu1 %1064  ;;  %v3202_v59 = vpop.permute.xlu0 %1062 }
  0x98   : > { %1308 = vrot.lane.b32.xlu1 %v2990_v6, %s2895_s19  ;;  %1306 = vrot.lane.b32.xlu0 %v2993_v7, %s2895_s19 }
  0x9a   : > { %v3208_v60 = vpop.permute.xlu1 %1068  ;;  %v3210_v61 = vpop.permute.xlu0 %1066 }
  0x9c   : > { %1312 = vrot.lane.b32.xlu1 %v3002_v9, %s2895_s19  ;;  %1310 = vrot.lane.b32.xlu0 %v3005_v10, %s2895_s19 }
  0x9e   : > { %v3216_v62 = vpop.permute.xlu1 %1072  ;;  %v3218_v63 = vpop.permute.xlu0 %1070 }
  0x9f   : > { %4422 = vst [vmem:[#allocation2_spill] sm:$0xff] %v3216_v62  ;;  %4423 = vst [vmem:[#allocation3_spill] sm:$0xff] %v3218_v63 }
  0xa0   : > { %1316 = vrot.lane.b32.xlu1 %v3014_v12, %s2895_s19  ;;  %1314 = vrot.lane.b32.xlu0 %v3017_v13, %s2895_s19 }
  0xa2   : > { %v3224_v0 = vpop.permute.xlu1 %1076  ;;  %v3226_v1 = vpop.permute.xlu0 %1074 }
  0xa3   : > { %4424 = vst [vmem:[#allocation4_spill] sm:$0xff] %v3224_v0  ;;  %4425 = vst [vmem:[#allocation5_spill] sm:$0xff] %v3226_v1 }
  0xa4   : > { %1320 = vrot.lane.b32.xlu1 %v3026_v15, %s2895_s19  ;;  %1318 = vrot.lane.b32.xlu0 %v3029_v16, %s2895_s19 }
  0xa6   : > { %v3232_v4 = vpop.permute.xlu1 %1080  ;;  %v3234_v5 = vpop.permute.xlu0 %1078 }
  0xa7   : > { %4426 = vst [vmem:[#allocation6_spill] sm:$0xff] %v3232_v4  ;;  %4427 = vst [vmem:[#allocation7_spill] sm:$0xff] %v3234_v5 }
  0xa8   : > { %1324 = vrot.lane.b32.xlu1 %v3038_v18, %s2895_s19  ;;  %1322 = vrot.lane.b32.xlu0 %v3041_v19, %s2895_s19 }
  0xaa   : > { %v3240_v8 = vpop.permute.xlu1 %1084  ;;  %v3242_v11 = vpop.permute.xlu0 %1082 }
  0xab   : > { %4428 = vst [vmem:[#allocation8_spill] sm:$0xff] %v3240_v8  ;;  %4429 = vst [vmem:[#allocation9_spill] sm:$0xff] %v3242_v11 }
  0xac   : > { %1328 = vrot.lane.b32.xlu1 %v3050_v21, %s2895_s19  ;;  %1326 = vrot.lane.b32.xlu0 %v3053_v22, %s2895_s19 }
  0xae   : > { %v3248_v14 = vpop.permute.xlu1 %1088  ;;  %v3250_v17 = vpop.permute.xlu0 %1086 }
  0xaf   : > { %4430 = vst [vmem:[#allocation10_spill] sm:$0xff] %v3248_v14  ;;  %4431 = vst [vmem:[#allocation11_spill] sm:$0xff] %v3250_v17 }
  0xb0   : > { %1332 = vrot.lane.b32.xlu1 %v3062_v24, %s2895_s19  ;;  %1330 = vrot.lane.b32.xlu0 %v3065_v25, %s2895_s19 }
  0xb2   : > { %v3256_v20 = vpop.permute.xlu1 %1092  ;;  %v3258_v23 = vpop.permute.xlu0 %1090 }
  0xb3   : > { %4432 = vst [vmem:[#allocation12_spill] sm:$0xff] %v3256_v20  ;;  %4433 = vst [vmem:[#allocation13_spill] sm:$0xff] %v3258_v23 }
  0xb4   : > { %1336 = vrot.lane.b32.xlu1 %v3074_v27, %s2895_s19  ;;  %1334 = vrot.lane.b32.xlu0 %v3077_v28, %s2895_s19 }
  0xb6   : > { %v3264_v21 = vpop.permute.xlu1 %1096  ;;  %v3266_v22 = vpop.permute.xlu0 %1094 }
  0xb7   : > { %4434 = vst [vmem:[#allocation14_spill] sm:$0xff] %v3264_v21  ;;  %4435 = vst [vmem:[#allocation15_spill] sm:$0xff] %v3266_v22 }
  0xb8   : > { %1430 = vrot.lane.b32.xlu1 %v2980_v3, %s2896_s20  ;;  %1338 = vrot.lane.b32.xlu0 %v3087_v31, %s2895_s19 }
  0xba   : > { %v3272_v24 = vpop.permute.xlu1 %1100  ;;  %v3274_v25 = vpop.permute.xlu0 %1098 }
  0xbb   : > { %4436 = vst [vmem:[#allocation16_spill] sm:$0xff] %v3272_v24  ;;  %4437 = vst [vmem:[#allocation17_spill] sm:$0xff] %v3274_v25 }
  0xbc   : > { %1434 = vrot.lane.b32.xlu1 %v2993_v7, %s2896_s20  ;;  %1432 = vrot.lane.b32.xlu0 %v2977_v2, %s2896_s20 }
  0xbe   : > { %v3280_v26 = vpop.permute.xlu1 %1104  ;;  %v3282_v27 = vpop.permute.xlu0 %1102 }
  0xbf   : > { %4438 = vst [vmem:[#allocation18_spill] sm:$0xff] %v3280_v26  ;;  %4439 = vst [vmem:[#allocation19_spill] sm:$0xff] %v3282_v27 }
  0xc0   : > { %1558 = vrot.lane.b32.xlu1 %v2980_v3, %s2897_s21  ;;  %1436 = vrot.lane.b32.xlu0 %v2990_v6, %s2896_s20 }
  0xc2   : > { %v3288_v28 = vpop.permute.xlu1 %1108  ;;  %v3290_v29 = vpop.permute.xlu0 %1106 }
  0xc3   : > { %4440 = vst [vmem:[#allocation20_spill] sm:$0xff] %v3288_v28  ;;  %4441 = vst [vmem:[#allocation21_spill] sm:$0xff] %v3290_v29 }
  0xc4   : > { %1562 = vrot.lane.b32.xlu1 %v2993_v7, %s2897_s21  ;;  %1560 = vrot.lane.b32.xlu0 %v2977_v2, %s2897_s21 }
  0xc6   : > { %v3296_v30 = vpop.permute.xlu1 %1176  ;;  %v3298_v31 = vpop.permute.xlu0 %1174 }
  0xc8   : > { %1686 = vrot.lane.b32.xlu1 %v2980_v3, %s2898_s22  ;;  %1564 = vrot.lane.b32.xlu0 %v2990_v6, %s2897_s21 }
  0xca   : > { %v3304_v32 = vpop.permute.xlu1 %1180  ;;  %v3306_v33 = vpop.permute.xlu0 %1178 }
  0xcc   : > { %1690 = vrot.lane.b32.xlu1 %v2993_v7, %s2898_s22  ;;  %1688 = vrot.lane.b32.xlu0 %v2977_v2, %s2898_s22 }
  0xce   : > { %v3312_v34 = vpop.permute.xlu1 %1184  ;;  %v3314_v35 = vpop.permute.xlu0 %1182 }
  0xd0   : > { %1814 = vrot.lane.b32.xlu1 %v2980_v3, %s2899_s23  ;;  %1692 = vrot.lane.b32.xlu0 %v2990_v6, %s2898_s22 }
  0xd2   : > { %v3320_v36 = vpop.permute.xlu1 %1188  ;;  %v3322_v37 = vpop.permute.xlu0 %1186 }
  0xd4   : > { %1818 = vrot.lane.b32.xlu1 %v2993_v7, %s2899_s23  ;;  %1816 = vrot.lane.b32.xlu0 %v2977_v2, %s2899_s23 }
  0xd6   : > { %v3328_v38 = vpop.permute.xlu1 %1192  ;;  %v3330_v39 = vpop.permute.xlu0 %1190 }
  0xd8   : > { %1438 = vrot.lane.b32.xlu1 %v3005_v10, %s2896_s20  ;;  %1820 = vrot.lane.b32.xlu0 %v2990_v6, %s2899_s23 }
  0xda   : > { %v3336_v40 = vpop.permute.xlu1 %1196  ;;  %v3338_v41 = vpop.permute.xlu0 %1194 }
  0xdc   : > { %1942 = vrot.lane.b32.xlu1 %v2980_v3, %s2900_s24  ;;  %1440 = vrot.lane.b32.xlu0 %v3002_v9, %s2896_s20 }
  0xde   : > { %v3349_v44 = vpop.permute.xlu1 %1200  ;;  %v3351_v45 = vpop.permute.xlu0 %1198 }
  0xdf   : > { %4442 = vst [vmem:[#allocation22_spill] sm:$0xff] %v3349_v44  ;;  %4443 = vst [vmem:[#allocation23_spill] sm:$0xff] %v3351_v45 }
  0xe0   : > { %1442 = vrot.lane.b32.xlu1 %v3017_v13, %s2896_s20  ;;  %1944 = vrot.lane.b32.xlu0 %v2977_v2, %s2900_s24  ;;  %v3376_v2 = vld [vmem:[%s4416_s3] ss:$0 sm:$0xff] }
  0xe2   : > { %v3357_v3 = vpop.permute.xlu1 %1204  ;;  %v3359_v46 = vpop.permute.xlu0 %1202 }
  0xe3   : > { %4444 = vst [vmem:[#allocation24_spill] sm:$0xff] %v3357_v3  ;;  %4445 = vst [vmem:[#allocation25_spill] sm:$0xff] %v3359_v46 }
  0xe4   : > { %1946 = vrot.lane.b32.xlu1 %v2993_v7, %s2900_s24  ;;  %1444 = vrot.lane.b32.xlu0 %v3014_v12, %s2896_s20 }
  0xe6   : > { %v3365_v47 = vpop.permute.xlu1 %1208  ;;  %v3367_v48 = vpop.permute.xlu0 %1206 }
  0xe7   : > { %4446 = vst [vmem:[#allocation26_spill] sm:$0xff] %v3365_v47  ;;  %4447 = vst [vmem:[#allocation27_spill] sm:$0xff] %v3367_v48 }
  0xe8   : > { %1566 = vrot.lane.b32.xlu1 %v3005_v10, %s2897_s21  ;;  %1948 = vrot.lane.b32.xlu0 %v2990_v6, %s2900_s24 }
  0xe9   : > { %v2755_v42 = vpop.f32.mrb[0].mxu0 }
  0xea   : > { %v3378_v49 = vpop.permute.xlu1 %1212  ;;  %v3380_v7 = vpop.permute.xlu0 %1210  ;;  %v575_v43 = vadd.f32 %v2755_v42, %v3376_v2 }
  0xeb   : > { %4448 = vst [vmem:[#allocation28_spill] sm:$0xff] %v3378_v49  ;;  %4449 = vst [vmem:[#allocation29_spill] sm:$0xff] %v3380_v7  ;;  %v566_v29 = vpop.f32.mrb[1].mxu0 }
  0xec   : > { %1570 = vrot.lane.b32.xlu1 %v3017_v13, %s2897_s21  ;;  %1568 = vrot.lane.b32.xlu0 %v3002_v9, %s2897_s21  ;;  %v567_v6 = vadd.f32 %v3376_v2, %v566_v29  ;;  %v2756_v28 = vpop.f32.mrb[2].mxu0  ;;  %v695_v42 = vmax.f32 %v575_v43, 0.0 }
  0xed   : > { %v578_v27 = vadd.f32 %v2756_v28, %v3376_v2  ;;  %v569_v26 = vpop.f32.mrb[3].mxu0 }
  0xee   : > { %v3397_v25 = vpop.permute.xlu1 %1216  ;;  %v693_v24 = vmax.f32 %v567_v6, 0.0  ;;  %v570_v22 = vadd.f32 %v3376_v2, %v569_v26  ;;  %v3400_v21 = vpop.permute.xlu0 %1214  ;;  %727 = vst.msk [vmem:[%s3393_s14 + $0x10] sm:$0xff] %vm479_vm1, %v695_v42  ;;  %v2687_v29 = vpack.c.bf16 %v695_v42, %v695_v42 }
  0xef   : > { %4450 = vst [vmem:[#allocation30_spill] sm:$0xff] %v3397_v25  ;;  %4451 = vst [vmem:[#allocation31_spill] sm:$0xff] %v3400_v21  ;;  %v696_v23 = vmax.f32 %v578_v27, 0.0 }
  0xf0   : > { %1694 = vrot.lane.b32.xlu1 %v3005_v10, %s2898_s22  ;;  %1572 = vrot.lane.b32.xlu0 %v3014_v12, %s2897_s21  ;;  %725 = vst.msk [vmem:[%s3393_s14] sm:$0xff] %vm479_vm1, %v693_v24  ;;  %v694_v28 = vmax.f32 %v570_v22, 0.0  ;;  %v2685_v43 = vpack.c.bf16 %v693_v24, %v693_v24 }
  0xf1   : > { %728 = vst.msk [vmem:[%s3393_s14 + $0x18] sm:$0xff] %vm479_vm1, %v696_v23  ;;  %v2759_v26 = vpop.f32.mrb[4].mxu0  ;;  %v2688_v17 = vpack.c.bf16 %v696_v23, %v696_v23 }
  0xf2   : > { %v3412_v6 = vpop.permute.xlu1 %1220  ;;  %726 = vst.msk [vmem:[%s3393_s14 + $0x8] sm:$0xff] %vm479_vm1, %v694_v28  ;;  %v3416_v27 = vpop.permute.xlu0 %1218  ;;  %v591_v20 = vadd.f32 %v2759_v26, %v3376_v2  ;;  %v2686_v14 = vpack.c.bf16 %v694_v28, %v694_v28 }
  0xf3   : > { %4452 = vst [vmem:[#allocation32_spill] sm:$0xff] %v3412_v6  ;;  %4453 = vst [vmem:[#allocation33_spill] sm:$0xff] %v3416_v27  ;;  %v582_v21 = vpop.f32.mrb[5].mxu0 }
  0xf4   : > { %v583_v25 = vadd.f32 %v3376_v2, %v582_v21  ;;  %857 = vrot.lane.b32.xlu1 %v2687_v29, %s2893_s17  ;;  %v2760_v22 = vpop.f32.mrb[6].mxu0  ;;  %853 = vrot.lane.b32.xlu0 %v2685_v43, %s2893_s17  ;;  %v699_v24 = vmax.f32 %v591_v20, 0.0 }
  0xf5   : > { %v594_v42 = vadd.f32 %v2760_v22, %v3376_v2  ;;  %v585_v6 = vpop.f32.mrb[7].mxu0 }
  0xf6   : > { %v697_v27 = vmax.f32 %v583_v25, 0.0  ;;  %v586_v26 = vadd.f32 %v3376_v2, %v585_v6  ;;  %v3424_v7 = vpop.permute.xlu1 %1224  ;;  %731 = vst.msk [vmem:[%s3393_s14 + $0x30] sm:$0xff] %vm479_vm1, %v699_v24  ;;  %v3428_v29 = vpop.permute.xlu0 %1222  ;;  %v2691_v20 = vpack.c.bf16 %v699_v24, %v699_v24 }
  0xf7   : > { %4454 = vst [vmem:[#allocation34_spill] sm:$0xff] %v3424_v7  ;;  %v700_v21 = vmax.f32 %v594_v42, 0.0  ;;  %4455 = vst [vmem:[#allocation35_spill] sm:$0xff] %v3428_v29 }
  0xf8   : > { %729 = vst.msk [vmem:[%s3393_s14 + $0x20] sm:$0xff] %vm479_vm1, %v697_v27  ;;  %v698_v43 = vmax.f32 %v586_v26, 0.0  ;;  %859 = vrot.lane.b32.xlu1 %v2688_v17, %s2893_s17  ;;  %855 = vrot.lane.b32.xlu0 %v2686_v14, %s2893_s17 }
  0xf9   : > { %732 = vst.msk [vmem:[%s3393_s14 + $0x38] sm:$0xff] %vm479_vm1, %v700_v21  ;;  %v2692_v23 = vpack.c.bf16 %v700_v21, %v700_v21  ;;  %v2763_v28 = vpop.f32.mrb[8].mxu0 }
  0xfa   : > { %730 = vst.msk [vmem:[%s3393_s14 + $0x28] sm:$0xff] %vm479_vm1, %v698_v43  ;;  %v3438_v25 = vpop.permute.xlu1 %1228  ;;  %v3440_v6 = vpop.permute.xlu0 %1226  ;;  %v607_v22 = vadd.f32 %v2763_v28, %v3376_v2  ;;  %v2690_v29 = vpack.c.bf16 %v698_v43, %v698_v43 }
  0xfb   : > { %4456 = vst [vmem:[#allocation36_spill] sm:$0xff] %v3438_v25  ;;  %4457 = vst [vmem:[#allocation37_spill] sm:$0xff] %v3440_v6  ;;  %v598_v42 = vpop.f32.mrb[9].mxu0  ;;  %v2689_v25 = vpack.c.bf16 %v697_v27, %v697_v27 }
  0xfc   : > { %v599_v17 = vadd.f32 %v3376_v2, %v598_v42  ;;  %867 = vrot.lane.b32.xlu1 %v2692_v23, %s2893_s17  ;;  %v2764_v14 = vpop.f32.mrb[10].mxu0  ;;  %865 = vrot.lane.b32.xlu0 %v2691_v20, %s2893_s17  ;;  %v703_v24 = vmax.f32 %v607_v22, 0.0 }
  0xfd   : > { %v610_v26 = vadd.f32 %v2764_v14, %v3376_v2  ;;  %v601_v21 = vpop.f32.mrb[11].mxu0 }
  0xfe   : > { %v701_v6 = vmax.f32 %v599_v17, 0.0  ;;  %v602_v28 = vadd.f32 %v3376_v2, %v601_v21  ;;  %v3448_v7 = vpop.permute.xlu1 %1232  ;;  %735 = vst.msk [vmem:[%s3393_s14 + $0x50] sm:$0xff] %vm479_vm1, %v703_v24  ;;  %v3452_v23 = vpop.permute.xlu0 %1230  ;;  %v2695_v27 = vpack.c.bf16 %v703_v24, %v703_v24 }
  0xff   : > { %4458 = vst [vmem:[#allocation38_spill] sm:$0xff] %v3448_v7  ;;  %v704_v42 = vmax.f32 %v610_v26, 0.0  ;;  %4459 = vst [vmem:[#allocation39_spill] sm:$0xff] %v3452_v23 }
 0x100   : > { %733 = vst.msk [vmem:[%s3393_s14 + $0x40] sm:$0xff] %vm479_vm1, %v701_v6  ;;  %v702_v20 = vmax.f32 %v602_v28, 0.0  ;;  %863 = vrot.lane.b32.xlu1 %v2690_v29, %s2893_s17  ;;  %861 = vrot.lane.b32.xlu0 %v2689_v25, %s2893_s17 }
 0x101   : > { %736 = vst.msk [vmem:[%s3393_s14 + $0x58] sm:$0xff] %vm479_vm1, %v704_v42  ;;  %v2696_v43 = vpack.c.bf16 %v704_v42, %v704_v42  ;;  %v2767_v17 = vpop.f32.mrb[12].mxu0 }
 0x102   : > { %734 = vst.msk [vmem:[%s3393_s14 + $0x48] sm:$0xff] %vm479_vm1, %v702_v20  ;;  %v3462_v22 = vpop.permute.xlu1 %1236  ;;  %v3464_v14 = vpop.permute.xlu0 %1234  ;;  %v623_v26 = vadd.f32 %v2767_v17, %v3376_v2  ;;  %v2694_v23 = vpack.c.bf16 %v702_v20, %v702_v20 }
 0x103   : > { %4460 = vst [vmem:[#allocation40_spill] sm:$0xff] %v3462_v22  ;;  %4461 = vst [vmem:[#allocation41_spill] sm:$0xff] %v3464_v14  ;;  %v614_v21 = vpop.f32.mrb[13].mxu0  ;;  %v2693_v22 = vpack.c.bf16 %v701_v6, %v701_v6 }
 0x104   : > { %v615_v29 = vadd.f32 %v3376_v2, %v614_v21  ;;  %v2768_v28 = vpop.f32.mrb[14].mxu0  ;;  %875 = vrot.lane.b32.xlu1 %v2696_v43, %s2893_s17  ;;  %873 = vrot.lane.b32.xlu0 %v2695_v27, %s2893_s17  ;;  %v707_v25 = vmax.f32 %v623_v26, 0.0 }
 0x105   : > { %v626_v24 = vadd.f32 %v2768_v28, %v3376_v2  ;;  %v617_v42 = vpop.f32.mrb[15].mxu0 }
 0x106   : > { %v705_v14 = vmax.f32 %v615_v29, 0.0  ;;  %v618_v17 = vadd.f32 %v3376_v2, %v617_v42  ;;  %v3472_v7 = vpop.permute.xlu1 %1304  ;;  %739 = vst.msk [vmem:[%s3393_s14 + $0x70] sm:$0xff] %vm479_vm1, %v707_v25  ;;  %v3476_v49 = vpop.permute.xlu0 %1302  ;;  %v2699_v6 = vpack.c.bf16 %v707_v25, %v707_v25 }
 0x107   : > { %v708_v21 = vmax.f32 %v626_v24, 0.0 }
 0x108   : > { %737 = vst.msk [vmem:[%s3393_s14 + $0x60] sm:$0xff] %vm479_vm1, %v705_v14  ;;  %v706_v27 = vmax.f32 %v618_v17, 0.0  ;;  %871 = vrot.lane.b32.xlu1 %v2694_v23, %s2893_s17  ;;  %869 = vrot.lane.b32.xlu0 %v2693_v22, %s2893_s17 }
 0x109   : > { %740 = vst.msk [vmem:[%s3393_s14 + $0x78] sm:$0xff] %vm479_vm1, %v708_v21  ;;  %v2700_v20 = vpack.c.bf16 %v708_v21, %v708_v21  ;;  %v2771_v26 = vpop.f32.mrb[16].mxu0  ;;  %v2697_v21 = vpack.c.bf16 %v705_v14, %v705_v14 }
 0x10a   : > { %738 = vst.msk [vmem:[%s3393_s14 + $0x68] sm:$0xff] %vm479_vm1, %v706_v27  ;;  %v3486_v43 = vpop.permute.xlu1 %1308  ;;  %v3488_v29 = vpop.permute.xlu0 %1306  ;;  %v639_v28 = vadd.f32 %v2771_v26, %v3376_v2  ;;  %v2698_v11 = vpack.c.bf16 %v706_v27, %v706_v27 }
 0x10b   : > { %v630_v24 = vpop.f32.mrb[17].mxu0 }
 0x10c   : > { %v631_v23 = vadd.f32 %v3376_v2, %v630_v24  ;;  %v2772_v42 = vpop.f32.mrb[18].mxu0  ;;  %883 = vrot.lane.b32.xlu1 %v2700_v20, %s2893_s17  ;;  %881 = vrot.lane.b32.xlu0 %v2699_v6, %s2893_s17  ;;  %v711_v22 = vmax.f32 %v639_v28, 0.0 }
 0x10d   : > { %v642_v25 = vadd.f32 %v2772_v42, %v3376_v2  ;;  %v633_v17 = vpop.f32.mrb[19].mxu0 }
 0x10e   : > { %v709_v8 = vmax.f32 %v631_v23, 0.0  ;;  %v634_v26 = vadd.f32 %v3376_v2, %v633_v17  ;;  %v3496_v48 = vpop.permute.xlu1 %1312  ;;  %743 = vst.msk [vmem:[%s3393_s14 + $0x90] sm:$0xff] %vm479_vm1, %v711_v22  ;;  %v3500_v47 = vpop.permute.xlu0 %1310  ;;  %v2703_v14 = vpack.c.bf16 %v711_v22, %v711_v22 }
 0x10f   : > { %v712_v24 = vmax.f32 %v642_v25, 0.0 }
 0x110   : > { %741 = vst.msk [vmem:[%s3393_s14 + $0x80] sm:$0xff] %vm479_vm1, %v709_v8  ;;  %v710_v6 = vmax.f32 %v634_v26, 0.0  ;;  %879 = vrot.lane.b32.xlu1 %v2698_v11, %s2893_s17  ;;  %877 = vrot.lane.b32.xlu0 %v2697_v21, %s2893_s17 }
 0x111   : > { %744 = vst.msk [vmem:[%s3393_s14 + $0x98] sm:$0xff] %vm479_vm1, %v712_v24  ;;  %v2704_v27 = vpack.c.bf16 %v712_v24, %v712_v24  ;;  %v2775_v28 = vpop.f32.mrb[20].mxu0  ;;  %v2701_v24 = vpack.c.bf16 %v709_v8, %v709_v8 }
 0x112   : > { %742 = vst.msk [vmem:[%s3393_s14 + $0x88] sm:$0xff] %vm479_vm1, %v710_v6  ;;  %v3510_v20 = vpop.permute.xlu1 %1316  ;;  %v3512_v23 = vpop.permute.xlu0 %1314  ;;  %v655_v42 = vadd.f32 %v2775_v28, %v3376_v2  ;;  %v2702_v5 = vpack.c.bf16 %v710_v6, %v710_v6 }
 0x113   : > { %v646_v25 = vpop.f32.mrb[21].mxu0 }
 0x114   : > { %v647_v11 = vadd.f32 %v3376_v2, %v646_v25  ;;  %v2776_v17 = vpop.f32.mrb[22].mxu0  ;;  %891 = vrot.lane.b32.xlu1 %v2704_v27, %s2893_s17  ;;  %889 = vrot.lane.b32.xlu0 %v2703_v14, %s2893_s17  ;;  %v715_v22 = vmax.f32 %v655_v42, 0.0 }
 0x115   : > { %v658_v21 = vadd.f32 %v2776_v17, %v3376_v2  ;;  %v649_v26 = vpop.f32.mrb[23].mxu0 }
 0x116   : > { %v713_v4 = vmax.f32 %v647_v11, 0.0  ;;  %v650_v28 = vadd.f32 %v3376_v2, %v649_v26  ;;  %v3520_v46 = vpop.permute.xlu1 %1320  ;;  %747 = vst.msk [vmem:[%s3393_s14 + $0xb0] sm:$0xff] %vm479_vm1, %v715_v22  ;;  %v3524_v3 = vpop.permute.xlu0 %1318  ;;  %v2707_v8 = vpack.c.bf16 %v715_v22, %v715_v22 }
 0x117   : > { %v716_v25 = vmax.f32 %v658_v21, 0.0 }
 0x118   : > { %745 = vst.msk [vmem:[%s3393_s14 + $0xa0] sm:$0xff] %vm479_vm1, %v713_v4  ;;  %v714_v14 = vmax.f32 %v650_v28, 0.0  ;;  %887 = vrot.lane.b32.xlu1 %v2702_v5, %s2893_s17  ;;  %885 = vrot.lane.b32.xlu0 %v2701_v24, %s2893_s17 }
 0x119   : > { %748 = vst.msk [vmem:[%s3393_s14 + $0xb8] sm:$0xff] %vm479_vm1, %v716_v25  ;;  %v2708_v6 = vpack.c.bf16 %v716_v25, %v716_v25  ;;  %v2779_v42 = vpop.f32.mrb[24].mxu0  ;;  %v2705_v25 = vpack.c.bf16 %v713_v4, %v713_v4 }
 0x11a   : > { %746 = vst.msk [vmem:[%s3393_s14 + $0xa8] sm:$0xff] %vm479_vm1, %v714_v14  ;;  %v3534_v27 = vpop.permute.xlu1 %1324  ;;  %v3536_v11 = vpop.permute.xlu0 %1322  ;;  %v671_v17 = vadd.f32 %v2779_v42, %v3376_v2  ;;  %v2706_v1 = vpack.c.bf16 %v714_v14, %v714_v14 }
 0x11b   : > { %v662_v21 = vpop.f32.mrb[25].mxu0 }
 0x11c   : > { %v663_v5 = vadd.f32 %v3376_v2, %v662_v21  ;;  %v2780_v26 = vpop.f32.mrb[26].mxu0  ;;  %899 = vrot.lane.b32.xlu1 %v2708_v6, %s2893_s17  ;;  %897 = vrot.lane.b32.xlu0 %v2707_v8, %s2893_s17  ;;  %v719_v22 = vmax.f32 %v671_v17, 0.0 }
 0x11d   : > { %v674_v24 = vadd.f32 %v2780_v26, %v3376_v2  ;;  %v665_v28 = vpop.f32.mrb[27].mxu0 }
 0x11e   : > { %v717_v0 = vmax.f32 %v663_v5, 0.0  ;;  %v666_v42 = vadd.f32 %v3376_v2, %v665_v28  ;;  %v3544_v45 = vpop.permute.xlu1 %1328  ;;  %751 = vst.msk [vmem:[%s3393_s14 + $0xd0] sm:$0xff] %vm479_vm1, %v719_v22  ;;  %v3548_v44 = vpop.permute.xlu0 %1326  ;;  %v2711_v4 = vpack.c.bf16 %v719_v22, %v719_v22 }
 0x11f   : > { %4462 = vst [vmem:[#allocation42_spill] sm:$0xff] %v3544_v45  ;;  %v720_v21 = vmax.f32 %v674_v24, 0.0  ;;  %4463 = vst [vmem:[#allocation43_spill] sm:$0xff] %v3548_v44 }
 0x120   : > { %749 = vst.msk [vmem:[%s3393_s14 + $0xc0] sm:$0xff] %vm479_vm1, %v717_v0  ;;  %v718_v8 = vmax.f32 %v666_v42, 0.0  ;;  %895 = vrot.lane.b32.xlu1 %v2706_v1, %s2893_s17  ;;  %893 = vrot.lane.b32.xlu0 %v2705_v25, %s2893_s17 }
 0x121   : > { %752 = vst.msk [vmem:[%s3393_s14 + $0xd8] sm:$0xff] %vm479_vm1, %v720_v21  ;;  %v2712_v14 = vpack.c.bf16 %v720_v21, %v720_v21  ;;  %v2783_v17 = vpop.f32.mrb[28].mxu0  ;;  %v2709_v21 = vpack.c.bf16 %v717_v0, %v717_v0 }
 0x122   : > { %750 = vst.msk [vmem:[%s3393_s14 + $0xc8] sm:$0xff] %vm479_vm1, %v718_v8  ;;  %v3558_v6 = vpop.permute.xlu1 %1332  ;;  %v3560_v5 = vpop.permute.xlu0 %1330  ;;  %v687_v26 = vadd.f32 %v2783_v17, %v3376_v2 }
 0x123   : > { %4464 = vst [vmem:[#allocation44_spill] sm:$0xff] %v3558_v6  ;;  %4465 = vst [vmem:[#allocation45_spill] sm:$0xff] %v3560_v5  ;;  %v678_v24 = vpop.f32.mrb[29].mxu0  ;;  %v2710_v6 = vpack.c.bf16 %v718_v8, %v718_v8 }
 0x124   : > { %v679_v28 = vadd.f32 %v3376_v2, %v678_v24  ;;  %v2784_v1 = vpop.f32.mrb[30].mxu0  ;;  %907 = vrot.lane.b32.xlu1 %v2712_v14, %s2893_s17  ;;  %905 = vrot.lane.b32.xlu0 %v2711_v4, %s2893_s17  ;;  %v723_v22 = vmax.f32 %v687_v26, 0.0 }
 0x125   : > { %v690_v25 = vadd.f32 %v2784_v1, %v3376_v2  ;;  %v681_v42 = vpop.f32.mrb[31].mxu0 }
 0x126   : > { %v721_v5 = vmax.f32 %v679_v28, 0.0  ;;  %v682_v17 = vadd.f32 %v3376_v2, %v681_v42  ;;  %v3568_v44 = vpop.permute.xlu1 %1336  ;;  %755 = vst.msk [vmem:[%s3393_s14 + $0xf0] sm:$0xff] %vm479_vm1, %v723_v22  ;;  %v3572_v45 = vpop.permute.xlu0 %1334  ;;  %v2715_v14 = vpack.c.bf16 %v723_v22, %v723_v22 }
 0x127   : > { %4466 = vst [vmem:[#allocation46_spill] sm:$0xff] %v3568_v44  ;;  %v724_v24 = vmax.f32 %v690_v25, 0.0  ;;  %4467 = vst [vmem:[#allocation47_spill] sm:$0xff] %v3572_v45 }
 0x128   : > { %753 = vst.msk [vmem:[%s3393_s14 + $0xe0] sm:$0xff] %vm479_vm1, %v721_v5  ;;  %v722_v4 = vmax.f32 %v682_v17, 0.0  ;;  %903 = vrot.lane.b32.xlu1 %v2710_v6, %s2893_s17  ;;  %901 = vrot.lane.b32.xlu0 %v2709_v21, %s2893_s17  ;;  %v2713_v8 = vpack.c.bf16 %v721_v5, %v721_v5 }
 0x129   : > { %756 = vst.msk [vmem:[%s3393_s14 + $0xf8] sm:$0xff] %vm479_vm1, %v724_v24  ;;  %v2716_v26 = vpack.c.bf16 %v724_v24, %v724_v24 }
 0x12a   : > { %754 = vst.msk [vmem:[%s3393_s14 + $0xe8] sm:$0xff] %vm479_vm1, %v722_v4  ;;  %v1431_v0 = vpop.permute.xlu1 %1430  ;;  %v3582_v2 = vpop.permute.xlu0 %1338  ;;  %v2714_v6 = vpack.c.bf16 %v722_v4, %v722_v4 }
 0x12b   : > { %4468 = vst [vmem:[#allocation48_spill] sm:$0xff] %v3582_v2  ;;  %v2854_v2 = vld [vmem:[%s2968_s13] sm:$0xf] }
 0x12c   : > { %1698 = vrot.lane.b32.xlu1 %v3017_v13, %s2898_s22  ;;  %913 = vrot.lane.b32.xlu0 %v2715_v14, %s2893_s17  ;;  %v1142_v45 = vmax.bf16 %v2854_v2, %v3176_v51 }
 0x12e   : > { %v3587_v28 = vpop.permute.xlu1 %1434  ;;  %v1433_v1 = vpop.permute.xlu0 %1432  ;;  %v1270_v62 = vmax.bf16 %v3298_v31, %v1142_v45 }
 0x130   : > { %915 = vrot.lane.b32.xlu1 %v2716_v26, %s2893_s17  ;;  %909 = vrot.lane.b32.xlu0 %v2713_v8, %s2893_s17  ;;  %v2853_v26 = vld [vmem:[%s2968_s13 + $0x4] sm:$0xf] }
 0x132   : > { %v1559_v22 = vpop.permute.xlu1 %1558  ;;  %v1437_v25 = vpop.permute.xlu0 %1436 }
 0x134   : > { %911 = vrot.lane.b32.xlu1 %v2714_v6, %s2893_s17  ;;  %1696 = vrot.lane.b32.xlu0 %v3002_v9, %s2898_s22  ;;  %v1143_v6 = vmax.bf16 %v2853_v26, %v3174_v50  ;;  %s3702_s17 = scalar_lea.vmem %s4420_s7, %s2962_s10 }
 0x136   : > { %v3594_v42 = vpop.permute.xlu1 %1562  ;;  %v1561_v5 = vpop.permute.xlu0 %1560 }
 0x138   : > { %1822 = vrot.lane.b32.xlu1 %v3005_v10, %s2899_s23  ;;  %1700 = vrot.lane.b32.xlu0 %v3014_v12, %s2898_s22 }
 0x13a   : > { %v1687_v21 = vpop.permute.xlu1 %1686  ;;  %v3600_v17 = vpop.permute.xlu0 %1564 }
 0x13c   : > { %1826 = vrot.lane.b32.xlu1 %v3017_v13, %s2899_s23  ;;  %1824 = vrot.lane.b32.xlu0 %v3002_v9, %s2899_s23 }
 0x13e   : > { %v1691_v24 = vpop.permute.xlu1 %1690  ;;  %v1689_v14 = vpop.permute.xlu0 %1688 }
 0x140   : > { %1446 = vrot.lane.b32.xlu1 %v3029_v16, %s2896_s20  ;;  %1828 = vrot.lane.b32.xlu0 %v3014_v12, %s2899_s23  ;;  %v1271_v12 = vmax.bf16 %v3296_v30, %v1143_v6  ;;  %v2855_v30 = vld [vmem:[%s2968_s13 + $0x8] sm:$0xf] }
 0x141   : > { %v1144_v31 = vmax.bf16 %v2855_v30, %v3182_v53 }
 0x142   : > { %v1815_v4 = vpop.permute.xlu1 %1814  ;;  %v1693_v8 = vpop.permute.xlu0 %1692 }
 0x143   : > { %v1272_v6 = vmax.bf16 %v3306_v33, %v1144_v31 }
 0x144   : > { %1950 = vrot.lane.b32.xlu1 %v3005_v10, %s2900_s24  ;;  %1448 = vrot.lane.b32.xlu0 %v3026_v15, %s2896_s20  ;;  %v1399_v10 = vmax.bf16 %v3472_v7, %v1271_v12  ;;  %v1398_v15 = vmax.bf16 %v3476_v49, %v1270_v62 }
 0x146   : > { %v1819_v44 = vpop.permute.xlu1 %1818  ;;  %v1817_v63 = vpop.permute.xlu0 %1816  ;;  %v1526_v2 = vmax.bf16 %v1431_v0, %v1398_v15  ;;  %v1527_v26 = vmax.bf16 %v1433_v1, %v1399_v10  ;;  %v3655_v15 = vld [vmem:[%s2968_s13 + $0x24] sm:$0xf] }
 0x148   : > { %1450 = vrot.lane.b32.xlu1 %v3041_v19, %s2896_s20  ;;  %1952 = vrot.lane.b32.xlu0 %v3002_v9, %s2900_s24  ;;  %v2856_v9 = vld [vmem:[%s2968_s13 + $0xc] sm:$0xf]  ;;  %v1654_v7 = vmax.bf16 %v1559_v22, %v1526_v2  ;;  %v1655_v62 = vmax.bf16 %v1561_v5, %v1527_v26  ;;  %v3665_v26 = vld [vmem:[%s2968_s13 + $0x20] sm:$0xf] }
 0x149   : > { %v1145_v45 = vmax.bf16 %v2856_v9, %v3180_v52  ;;  %v1400_v52 = vmax.bf16 %v3488_v29, %v1272_v6  ;;  %v3677_v9 = vld [vmem:[%s2968_s13 + $0x28] sm:$0xf] }
 0x14a   : > { %v3626_v50 = vpop.permute.xlu1 %1438  ;;  %v1821_v51 = vpop.permute.xlu0 %1820  ;;  %v1782_v12 = vmax.bf16 %v1687_v21, %v1654_v7 }
 0x14b   : > { %v1273_v1 = vmax.bf16 %v3304_v32, %v1145_v45  ;;  %v1528_v32 = vmax.bf16 %v3587_v28, %v1400_v52  ;;  %v3724_v52 = vld [vmem:[%s2968_s13 + $0x34] sm:$0xf] }
 0x14c   : > { %1954 = vrot.lane.b32.xlu1 %v3017_v13, %s2900_s24  ;;  %1452 = vrot.lane.b32.xlu0 %v3038_v18, %s2896_s20  ;;  %v1783_v13 = vmax.bf16 %v1689_v14, %v1655_v62  ;;  %v3643_v18 = vld [vmem:[%s2968_s13 + $0x1c] sm:$0xf]  ;;  %v1910_v33 = vmax.bf16 %v1815_v4, %v1782_v12 }
 0x14d   : > { %v1401_v53 = vmax.bf16 %v3486_v43, %v1273_v1  ;;  %v3711_v1 = vld [vmem:[%s2968_s13 + $0x30] sm:$0xf] }
 0x14e   : > { %v1943_v49 = vpop.permute.xlu1 %1942  ;;  %v3637_v0 = vpop.permute.xlu0 %1440  ;;  %v1911_v22 = vmax.bf16 %v1817_v63, %v1783_v13  ;;  %v1656_v63 = vmax.bf16 %v3594_v42, %v1528_v32 }
 0x14f   : > { %v1529_v14 = vmax.bf16 %v1437_v25, %v1401_v53 }
 0x150   : > { %1574 = vrot.lane.b32.xlu1 %v3029_v16, %s2897_s21  ;;  %1956 = vrot.lane.b32.xlu0 %v3643_v18, %s2900_s24  ;;  %v2038_v16 = vmax.bf16 %v1943_v49, %v1910_v33  ;;  %v1784_v25 = vmax.bf16 %v1691_v24, %v1656_v63 }
 0x151   : > { %v1657_v43 = vmax.bf16 %v3600_v17, %v1529_v14  ;;  %v3746_v14 = vld [vmem:[%s2968_s13 + $0x3c] sm:$0xf] }
 0x152   : > { %v3649_v5 = vpop.permute.xlu1 %1442  ;;  %v1945_v21 = vpop.permute.xlu0 %1944  ;;  %v1912_v42 = vmax.bf16 %v1819_v44, %v1784_v25 }
 0x153   : > { %v2039_v10 = vmax.bf16 %v1945_v21, %v1911_v22  ;;  %v1785_v2 = vmax.bf16 %v1693_v8, %v1657_v43  ;;  %v3733_v22 = vld [vmem:[%s2968_s13 + $0x38] sm:$0xf] }
 0x154   : > { %1578 = vrot.lane.b32.xlu1 %v3041_v19, %s2897_s21  ;;  %1576 = vrot.lane.b32.xlu0 %v3655_v15, %s2897_s21  ;;  %v3670_v19 = vld [vmem:[%s2968_s13 + $0x2c] sm:$0xf] }
 0x155   : > { %v2651_v28 = vcombine.low %v2038_v16, %v2039_v10  ;;  %v1913_v17 = vmax.bf16 %v1821_v51, %v1785_v2 }
 0x156   : > { %v1947_v29 = vpop.permute.xlu1 %1946  ;;  %v3661_v4 = vpop.permute.xlu0 %1444 }
 0x157   : > { %2787 = vmatprep.mubr.msk.bf16.mxu1 %vm479_vm1, %v2651_v28  ;;  %v2040_v24 = vmax.bf16 %v1947_v29, %v1912_v42 }
 0x158   : > { %1702 = vrot.lane.b32.xlu1 %v3665_v26, %s2898_s22  ;;  %1580 = vrot.lane.b32.xlu0 %v3670_v19, %s2897_s21 }
 0x15a   : > { %v3674_v30 = vpop.permute.xlu1 %1566  ;;  %v1949_v31 = vpop.permute.xlu0 %1948 }
 0x15b   : > { %v2041_v8 = vmax.bf16 %v1949_v31, %v1913_v17 }
 0x15c   : > { %1706 = vrot.lane.b32.xlu1 %v3677_v9, %s2898_s22  ;;  %1704 = vrot.lane.b32.xlu0 %v3655_v15, %s2898_s22 }
 0x15d   : > { %v2652_v45 = vcombine.low %v2040_v24, %v2041_v8  ;;  %v3795_v8 = vld [vmem:[%s2968_s13 + $0x4c] sm:$0xf] }
 0x15e   : > { %v3683_v7 = vpop.permute.xlu1 %1570  ;;  %v3685_v44 = vpop.permute.xlu0 %1568 }
 0x15f   : > { %2788 = vmatmul.mubr.msk.bf16.vlgmr.msra.gmra.mrb[0].mxu1 %vm479_vm1, %v2652_v45 }
 0x160   : > { %1830 = vrot.lane.b32.xlu1 %v3665_v26, %s2899_s23  ;;  %1708 = vrot.lane.b32.xlu0 %v3670_v19, %s2898_s22 }
 0x162   : > { %v3692_v51 = vpop.permute.xlu1 %1694  ;;  %v3694_v62 = vpop.permute.xlu0 %1572 }
 0x164   : > { %1834 = vrot.lane.b32.xlu1 %v3677_v9, %s2899_s23  ;;  %1832 = vrot.lane.b32.xlu0 %v3655_v15, %s2899_s23 }
 0x166   : > { %v858_v49 = vpop.permute.xlu1 %857  ;;  %v854_v6 = vpop.permute.xlu0 %853 }
 0x167   : > { %952 = vst.msk [vmem:[%s3702_s17 + $0x8] sm:$0xf] %vm949_vm2, %v858_v49  ;;  %950 = vst.msk [vmem:[%s3702_s17] sm:$0xf] %vm949_vm2, %v854_v6 }
 0x168   : > { %1454 = vrot.lane.b32.xlu1 %v3711_v1, %s2896_s20  ;;  %1836 = vrot.lane.b32.xlu0 %v3670_v19, %s2899_s23 }
 0x16a   : > { %v860_v12 = vpop.permute.xlu1 %859  ;;  %v856_v13 = vpop.permute.xlu0 %855 }
 0x16b   : > { %953 = vst.msk [vmem:[%s3702_s17 + $0xc] sm:$0xf] %vm949_vm2, %v860_v12  ;;  %951 = vst.msk [vmem:[%s3702_s17 + $0x4] sm:$0xf] %vm949_vm2, %v856_v13  ;;  %v3814_v13 = vld [vmem:[%s2968_s13 + $0x44] sm:$0xf] }
 0x16c   : > { %1958 = vrot.lane.b32.xlu1 %v3665_v26, %s2900_s24  ;;  %1456 = vrot.lane.b32.xlu0 %v3724_v52, %s2896_s20 }
 0x16e   : > { %v868_v53 = vpop.permute.xlu1 %867  ;;  %v866_v33 = vpop.permute.xlu0 %865 }
 0x16f   : > { %957 = vst.msk [vmem:[%s3702_s17 + $0x1c] sm:$0xf] %vm949_vm2, %v868_v53  ;;  %956 = vst.msk [vmem:[%s3702_s17 + $0x18] sm:$0xf] %vm949_vm2, %v866_v33  ;;  %v3819_v53 = vld [vmem:[%s2968_s13 + $0x40] sm:$0xf] }
 0x170   : > { %1458 = vrot.lane.b32.xlu1 %v3733_v22, %s2896_s20  ;;  %1960 = vrot.lane.b32.xlu0 %v3655_v15, %s2900_s24 }
 0x172   : > { %v864_v32 = vpop.permute.xlu1 %863  ;;  %v862_v21 = vpop.permute.xlu0 %861 }
 0x173   : > { %955 = vst.msk [vmem:[%s3702_s17 + $0x14] sm:$0xf] %vm949_vm2, %v864_v32  ;;  %954 = vst.msk [vmem:[%s3702_s17 + $0x10] sm:$0xf] %vm949_vm2, %v862_v21 }
 0x174   : > { %1962 = vrot.lane.b32.xlu1 %v3677_v9, %s2900_s24  ;;  %1460 = vrot.lane.b32.xlu0 %v3746_v14, %s2896_s20 }
 0x176   : > { %v876_v16 = vpop.permute.xlu1 %875  ;;  %v874_v10 = vpop.permute.xlu0 %873 }
 0x177   : > { %961 = vst.msk [vmem:[%s3702_s17 + $0x2c] sm:$0xf] %vm949_vm2, %v876_v16  ;;  %960 = vst.msk [vmem:[%s3702_s17 + $0x28] sm:$0xf] %vm949_vm2, %v874_v10  ;;  %v3838_v10 = vld [vmem:[%s2968_s13 + $0x48] sm:$0xf] }
 0x178   : > { %1582 = vrot.lane.b32.xlu1 %v3711_v1, %s2897_s21  ;;  %1964 = vrot.lane.b32.xlu0 %v3670_v19, %s2900_s24 }
 0x17a   : > { %v872_v63 = vpop.permute.xlu1 %871  ;;  %v870_v43 = vpop.permute.xlu0 %869 }
 0x17b   : > { %959 = vst.msk [vmem:[%s3702_s17 + $0x24] sm:$0xf] %vm949_vm2, %v872_v63  ;;  %958 = vst.msk [vmem:[%s3702_s17 + $0x20] sm:$0xf] %vm949_vm2, %v870_v43 }
 0x17c   : > { %1586 = vrot.lane.b32.xlu1 %v3733_v22, %s2897_s21  ;;  %1584 = vrot.lane.b32.xlu0 %v3724_v52, %s2897_s21 }
 0x17e   : > { %v884_v29 = vpop.permute.xlu1 %883  ;;  %v882_v28 = vpop.permute.xlu0 %881 }
 0x17f   : > { %965 = vst.msk [vmem:[%s3702_s17 + $0x3c] sm:$0xf] %vm949_vm2, %v884_v29  ;;  %964 = vst.msk [vmem:[%s3702_s17 + $0x38] sm:$0xf] %vm949_vm2, %v882_v28 }
 0x180   : > { %1710 = vrot.lane.b32.xlu1 %v3711_v1, %s2898_s22  ;;  %1588 = vrot.lane.b32.xlu0 %v3746_v14, %s2897_s21 }
 0x182   : > { %v880_v25 = vpop.permute.xlu1 %879  ;;  %v878_v2 = vpop.permute.xlu0 %877 }
 0x183   : > { %963 = vst.msk [vmem:[%s3702_s17 + $0x34] sm:$0xf] %vm949_vm2, %v880_v25  ;;  %962 = vst.msk [vmem:[%s3702_s17 + $0x30] sm:$0xf] %vm949_vm2, %v878_v2 }
 0x184   : > { %1714 = vrot.lane.b32.xlu1 %v3733_v22, %s2898_s22  ;;  %1712 = vrot.lane.b32.xlu0 %v3724_v52, %s2898_s22 }
 0x186   : > { %v892_v42 = vpop.permute.xlu1 %891  ;;  %v890_v17 = vpop.permute.xlu0 %889 }
 0x187   : > { %969 = vst.msk [vmem:[%s3702_s17 + $0x4c] sm:$0xf] %vm949_vm2, %v892_v42  ;;  %968 = vst.msk [vmem:[%s3702_s17 + $0x48] sm:$0xf] %vm949_vm2, %v890_v17 }
 0x188   : > { %1838 = vrot.lane.b32.xlu1 %v3711_v1, %s2899_s23  ;;  %1716 = vrot.lane.b32.xlu0 %v3746_v14, %s2898_s22 }
 0x18a   : > { %v888_v31 = vpop.permute.xlu1 %887  ;;  %v886_v24 = vpop.permute.xlu0 %885 }
 0x18b   : > { %967 = vst.msk [vmem:[%s3702_s17 + $0x44] sm:$0xf] %vm949_vm2, %v888_v31  ;;  %966 = vst.msk [vmem:[%s3702_s17 + $0x40] sm:$0xf] %vm949_vm2, %v886_v24  ;;  %v2870_v31 = vld [vmem:[%s2968_s13 + $0x14] sm:$0xf] }
 0x18c   : > { %1340 = vrot.lane.b32.xlu1 %v3795_v8, %s2895_s19  ;;  %1840 = vrot.lane.b32.xlu0 %v3724_v52, %s2899_s23  ;;  %v1147_v24 = vmax.bf16 %v2870_v31, %v3186_v54 }
 0x18e   : > { %v900_v45 = vpop.permute.xlu1 %899  ;;  %v898_v49 = vpop.permute.xlu0 %897 }
 0x18f   : > { %973 = vst.msk [vmem:[%s3702_s17 + $0x5c] sm:$0xf] %vm949_vm2, %v900_v45  ;;  %972 = vst.msk [vmem:[%s3702_s17 + $0x58] sm:$0xf] %vm949_vm2, %v898_v49  ;;  %v2871_v45 = vld [vmem:[%s2968_s13 + $0x10] sm:$0xf] }
 0x190   : > { %1844 = vrot.lane.b32.xlu1 %v3746_v14, %s2899_s23  ;;  %1842 = vrot.lane.b32.xlu0 %v3733_v22, %s2899_s23  ;;  %v1146_v49 = vmax.bf16 %v2871_v45, %v3188_v55 }
 0x192   : > { %v896_v6 = vpop.permute.xlu1 %895  ;;  %v894_v12 = vpop.permute.xlu0 %893 }
 0x193   : > { %971 = vst.msk [vmem:[%s3702_s17 + $0x54] sm:$0xf] %vm949_vm2, %v896_v6  ;;  %970 = vst.msk [vmem:[%s3702_s17 + $0x50] sm:$0xf] %vm949_vm2, %v894_v12 }
 0x194   : > { %1464 = vrot.lane.b32.xlu1 %v3814_v13, %s2896_s20  ;;  %1462 = vrot.lane.b32.xlu0 %v3819_v53, %s2896_s20 }
 0x196   : > { %v908_v33 = vpop.permute.xlu1 %907  ;;  %v906_v32 = vpop.permute.xlu0 %905 }
 0x197   : > { %977 = vst.msk [vmem:[%s3702_s17 + $0x6c] sm:$0xf] %vm949_vm2, %v908_v33  ;;  %976 = vst.msk [vmem:[%s3702_s17 + $0x68] sm:$0xf] %vm949_vm2, %v906_v32  ;;  %v1275_v33 = vmax.bf16 %v3312_v34, %v1147_v24  ;;  %v1274_v32 = vmax.bf16 %v3314_v35, %v1146_v49  ;;  %v3885_v34 = vld [vmem:[%s2968_s13 + $0x54] sm:$0xf] }
 0x198   : > { %1968 = vrot.lane.b32.xlu1 %v3724_v52, %s2900_s24  ;;  %1966 = vrot.lane.b32.xlu0 %v3711_v1, %s2900_s24  ;;  %v3890_v35 = vld [vmem:[%s2968_s13 + $0x50] sm:$0xf] }
 0x199   : > { %v1402_v54 = vmax.bf16 %v3500_v47, %v1274_v32  ;;  %v1149_v47 = vmax.bf16 %v3643_v18, %v3192_v56 }
 0x19a   : > { %v904_v21 = vpop.permute.xlu1 %903  ;;  %v902_v16 = vpop.permute.xlu0 %901 }
 0x19b   : > { %975 = vst.msk [vmem:[%s3702_s17 + $0x64] sm:$0xf] %vm949_vm2, %v904_v21  ;;  %974 = vst.msk [vmem:[%s3702_s17 + $0x60] sm:$0xf] %vm949_vm2, %v902_v16  ;;  %v1403_v21 = vmax.bf16 %v3496_v48, %v1275_v33  ;;  %v2874_v48 = vld [vmem:[%s2968_s13 + $0x18] sm:$0xf]  ;;  %v1277_v24 = vmax.bf16 %v3320_v36, %v1149_v47 }
 0x19c   : > { %1468 = vrot.lane.b32.xlu1 %v3795_v8, %s2896_s20  ;;  %1466 = vrot.lane.b32.xlu0 %v3838_v10, %s2896_s20 }
 0x19d   : > { %v1405_v56 = vmax.bf16 %v3510_v20, %v1277_v24 }
 0x19e   : > { %v3842_v63 = vpop.permute.xlu1 %1698  ;;  %v914_v43 = vpop.permute.xlu0 %913 }
 0x19f   : > { %980 = vst.msk [vmem:[%s3702_s17 + $0x78] sm:$0xf] %vm949_vm2, %v914_v43  ;;  %v1530_v43 = vmax.bf16 %v3626_v50, %v1402_v54  ;;  %v3921_v54 = vld [vmem:[%s2968_s13 + $0x58] sm:$0xf] }
 0x1a0   : > { %1972 = vrot.lane.b32.xlu1 %v3746_v14, %s2900_s24  ;;  %1970 = vrot.lane.b32.xlu0 %v3733_v22, %s2900_s24 }
 0x1a1   : > { %v1658_v50 = vmax.bf16 %v3674_v30, %v1530_v43 }
 0x1a2   : > { %v916_v29 = vpop.permute.xlu1 %915  ;;  %v910_v28 = vpop.permute.xlu0 %909 }
 0x1a3   : > { %981 = vst.msk [vmem:[%s3702_s17 + $0x7c] sm:$0xf] %vm949_vm2, %v916_v29  ;;  %978 = vst.msk [vmem:[%s3702_s17 + $0x70] sm:$0xf] %vm949_vm2, %v910_v28  ;;  %v1531_v29 = vmax.bf16 %v3637_v0, %v1403_v21  ;;  %v1148_v28 = vmax.bf16 %v2874_v48, %v3194_v57  ;;  %v1786_v49 = vmax.bf16 %v3692_v51, %v1658_v50  ;;  %v3916_v21 = vld [vmem:[%s2968_s13 + $0x5c] sm:$0xf] }
 0x1a4   : > { %1592 = vrot.lane.b32.xlu1 %v3814_v13, %s2897_s21  ;;  %1590 = vrot.lane.b32.xlu0 %v3819_v53, %s2897_s21  ;;  %v1533_v51 = vmax.bf16 %v3661_v4, %v1405_v56 }
 0x1a5   : > { %v1659_v0 = vmax.bf16 %v3685_v44, %v1531_v29  ;;  %v1276_v45 = vmax.bf16 %v3322_v37, %v1148_v28 }
 0x1a6   : > { %v912_v25 = vpop.permute.xlu1 %911  ;;  %v1697_v2 = vpop.permute.xlu0 %1696 }
 0x1a7   : > { %979 = vst.msk [vmem:[%s3702_s17 + $0x74] sm:$0xf] %vm949_vm2, %v912_v25  ;;  %v1787_v33 = vmax.bf16 %v1697_v2, %v1659_v0  ;;  %v1404_v57 = vmax.bf16 %v3512_v23, %v1276_v45  ;;  %v1661_v23 = vmax.bf16 %v3694_v62, %v1533_v51 }
 0x1a8   : > { %1596 = vrot.lane.b32.xlu1 %v3795_v8, %s2897_s21  ;;  %1594 = vrot.lane.b32.xlu0 %v3838_v10, %s2897_s21 }
 0x1a9   : > { %v1532_v37 = vmax.bf16 %v3649_v5, %v1404_v57 }
 0x1aa   : > { %v1823_v42 = vpop.permute.xlu1 %1822  ;;  %v1701_v17 = vpop.permute.xlu0 %1700 }
 0x1ab   : > { %v1914_v18 = vmax.bf16 %v1823_v42, %v1786_v49  ;;  %v1660_v20 = vmax.bf16 %v3683_v7, %v1532_v37  ;;  %v1789_v43 = vmax.bf16 %v1701_v17, %v1661_v23  ;;  %v1151_v49 = vmax.bf16 %v3655_v15, %v3200_v58 }
 0x1ac   : > { %1720 = vrot.lane.b32.xlu1 %v3814_v13, %s2898_s22  ;;  %1718 = vrot.lane.b32.xlu0 %v3819_v53, %s2898_s22 }
 0x1ad   : > { %v1788_v4 = vmax.bf16 %v3842_v63, %v1660_v20 }
 0x1ae   : > { %v1827_v6 = vpop.permute.xlu1 %1826  ;;  %v1825_v12 = vpop.permute.xlu0 %1824 }
 0x1af   : > { %v1915_v30 = vmax.bf16 %v1825_v12, %v1787_v33  ;;  %v1916_v29 = vmax.bf16 %v1827_v6, %v1788_v4  ;;  %v1150_v33 = vmax.bf16 %v3665_v26, %v3202_v59 }
 0x1b0   : > { %1724 = vrot.lane.b32.xlu1 %v3795_v8, %s2898_s22  ;;  %1722 = vrot.lane.b32.xlu0 %v3838_v10, %s2898_s22 }
 0x1b2   : > { %v3880_v16 = vpop.permute.xlu1 %1446  ;;  %v1829_v55 = vpop.permute.xlu0 %1828 }
 0x1b3   : > { %v1917_v47 = vmax.bf16 %v1829_v55, %v1789_v43  ;;  %v3997_v43 = vld [vmem:[%s2968_s13 + $0x64] sm:$0xf] }
 0x1b4   : > { %1344 = vrot.lane.b32.xlu1 %v3885_v34, %s2895_s19  ;;  %1342 = vrot.lane.b32.xlu0 %v3890_v35, %s2895_s19 }
 0x1b6   : > { %v1951_v25 = vpop.permute.xlu1 %1950  ;;  %v3900_v31 = vpop.permute.xlu0 %1448 }
 0x1b7   : > { %v2042_v2 = vmax.bf16 %v1951_v25, %v1914_v18  ;;  %v1279_v18 = vmax.bf16 %v3328_v38, %v1151_v49  ;;  %v1153_v38 = vmax.bf16 %v3670_v19, %v3208_v60 }
 0x1b8   : > { %1848 = vrot.lane.b32.xlu1 %v3814_v13, %s2899_s23  ;;  %1846 = vrot.lane.b32.xlu0 %v3819_v53, %s2899_s23 }
 0x1ba   : > { %v3911_v36 = vpop.permute.xlu1 %1450  ;;  %v1953_v44 = vpop.permute.xlu0 %1952 }
 0x1bb   : > { %v2043_v32 = vmax.bf16 %v1953_v44, %v1915_v30  ;;  %v1278_v30 = vmax.bf16 %v3330_v39, %v1150_v33  ;;  %v1407_v44 = vmax.bf16 %v3520_v46, %v1279_v18  ;;  %v1152_v39 = vmax.bf16 %v3677_v9, %v3210_v61 }
 0x1bc   : > { %1348 = vrot.lane.b32.xlu1 %v3916_v21, %s2895_s19  ;;  %1346 = vrot.lane.b32.xlu0 %v3921_v54, %s2895_s19 }
 0x1bd   : > { %v2653_v42 = vcombine.low %v2042_v2, %v2043_v32  ;;  %v1406_v37 = vmax.bf16 %v3524_v3, %v1278_v30  ;;  %v1535_v26 = vmax.bf16 %v3900_v31, %v1407_v44  ;;  %v1280_v31 = vmax.bf16 %v3338_v41, %v1152_v39  ;;  %v4469_v44 = vld [vmem:[#allocation2_spill] sm:$0xff] }
 0x1be   : > { %v1955_v5 = vpop.permute.xlu1 %1954  ;;  %v3927_v12 = vpop.permute.xlu0 %1452 }
 0x1bf   : > { %2791 = vmatprep.mubr.msk.bf16.mxu1 %vm479_vm1, %v2653_v42  ;;  %v2044_v62 = vmax.bf16 %v1955_v5, %v1916_v29  ;;  %v1534_v59 = vmax.bf16 %v3880_v16, %v1406_v37  ;;  %v1281_v16 = vmax.bf16 %v3336_v40, %v1153_v38  ;;  %v1408_v61 = vmax.bf16 %v3536_v11, %v1280_v31  ;;  %v4002_v29 = vld [vmem:[%s2968_s13 + $0x60] sm:$0xf] }
 0x1c0   : > { %1852 = vrot.lane.b32.xlu1 %v3795_v8, %s2899_s23  ;;  %1850 = vrot.lane.b32.xlu0 %v3838_v10, %s2899_s23  ;;  %v1155_v37 = vmax.bf16 %v3724_v52, %v4469_v44  ;;  %v4471_v38 = vld [vmem:[#allocation22_spill] sm:$0xff]  ;;  %v4474_v52 = vld [vmem:[#allocation43_spill] sm:$0xff] }
 0x1c1   : > { %v1409_v60 = vmax.bf16 %v3534_v27, %v1281_v16  ;;  %v1536_v41 = vmax.bf16 %v3911_v36, %v1408_v61  ;;  %v4473_v16 = vld [vmem:[#allocation42_spill] sm:$0xff] }
 0x1c2   : > { %v1575_v7 = vpop.permute.xlu1 %1574  ;;  %v1957_v48 = vpop.permute.xlu0 %1956  ;;  %v1283_v39 = vmax.bf16 %v4471_v38, %v1155_v37 }
 0x1c3   : > { %v2045_v28 = vmax.bf16 %v1957_v48, %v1917_v47  ;;  %v1662_v3 = vmax.bf16 %v1575_v7, %v1534_v59  ;;  %v1537_v42 = vmax.bf16 %v3927_v12, %v1409_v60 }
 0x1c4   : > { %1472 = vrot.lane.b32.xlu1 %v3885_v34, %s2896_s20  ;;  %1470 = vrot.lane.b32.xlu0 %v3890_v35, %s2896_s20  ;;  %v1411_v31 = vmax.bf16 %v4473_v16, %v1283_v39 }
 0x1c5   : > { %v2654_v63 = vcombine.low %v2044_v62, %v2045_v28 }
 0x1c6   : > { %v3939_v17 = vpop.permute.xlu1 %1578  ;;  %v1577_v50 = vpop.permute.xlu0 %1576 }
 0x1c7   : > { %2792 = vmatmul.mubr.msk.bf16.gmra.mrb[4].mxu1 %vm479_vm1, %v2654_v63  ;;  %v1663_v46 = vmax.bf16 %v1577_v50, %v1535_v26  ;;  %v1664_v27 = vmax.bf16 %v3939_v17, %v1536_v41  ;;  %v4476_v41 = vld [vmem:[#allocation5_spill] sm:$0xff] }
 0x1c8   : > { %1976 = vrot.lane.b32.xlu1 %v3814_v13, %s2900_s24  ;;  %1974 = vrot.lane.b32.xlu0 %v3819_v53, %s2900_s24 }
 0x1ca   : > { %v1703_v6 = vpop.permute.xlu1 %1702  ;;  %v1581_v55 = vpop.permute.xlu0 %1580 }
 0x1cb   : > { %v1790_v32 = vmax.bf16 %v1703_v6, %v1662_v3  ;;  %v1665_v11 = vmax.bf16 %v1581_v55, %v1537_v42  ;;  %v4015_v55 = vld [vmem:[%s2968_s13 + $0x6c] sm:$0xf]  ;;  %v1156_v42 = vmax.bf16 %v3733_v22, %v4476_v41  ;;  %v4480_v22 = vld [vmem:[#allocation45_spill] sm:$0xff] }
 0x1cc   : > { %1476 = vrot.lane.b32.xlu1 %v3916_v21, %s2896_s20  ;;  %1474 = vrot.lane.b32.xlu0 %v3921_v54, %s2896_s20 }
 0x1ce   : > { %v1707_v0 = vpop.permute.xlu1 %1706  ;;  %v1705_v25 = vpop.permute.xlu0 %1704 }
 0x1cf   : > { %v1791_v20 = vmax.bf16 %v1705_v25, %v1663_v46  ;;  %v1792_v7 = vmax.bf16 %v1707_v0, %v1664_v27  ;;  %v4020_v0 = vld [vmem:[%s2968_s13 + $0x68] sm:$0xf] }
 0x1d0   : > { %1980 = vrot.lane.b32.xlu1 %v3795_v8, %s2900_s24  ;;  %1978 = vrot.lane.b32.xlu0 %v3838_v10, %s2900_s24  ;;  %v4472_v46 = vld [vmem:[#allocation23_spill] sm:$0xff] }
 0x1d2   : > { %v1831_v24 = vpop.permute.xlu1 %1830  ;;  %v1709_v45 = vpop.permute.xlu0 %1708 }
 0x1d3   : > { %v1918_v19 = vmax.bf16 %v1831_v24, %v1790_v32  ;;  %v1793_v48 = vmax.bf16 %v1709_v45, %v1665_v11 }
 0x1d4   : > { %1600 = vrot.lane.b32.xlu1 %v3885_v34, %s2897_s21  ;;  %1598 = vrot.lane.b32.xlu0 %v3890_v35, %s2897_s21 }
 0x1d6   : > { %v1835_v56 = vpop.permute.xlu1 %1834  ;;  %v1833_v57 = vpop.permute.xlu0 %1832 }
 0x1d7   : > { %v1919_v9 = vmax.bf16 %v1833_v57, %v1791_v20  ;;  %v1920_v62 = vmax.bf16 %v1835_v56, %v1792_v7 }
 0x1d8   : > { %1604 = vrot.lane.b32.xlu1 %v3916_v21, %s2897_s21  ;;  %1602 = vrot.lane.b32.xlu0 %v3921_v54, %s2897_s21 }
 0x1da   : > { %v3970_v58 = vpop.permute.xlu1 %1454  ;;  %v1837_v15 = vpop.permute.xlu0 %1836 }
 0x1db   : > { %v1921_v28 = vmax.bf16 %v1837_v15, %v1793_v48  ;;  %v4470_v15 = vld [vmem:[#allocation3_spill] sm:$0xff] }
 0x1dc   : > { %1728 = vrot.lane.b32.xlu1 %v3885_v34, %s2898_s22  ;;  %1726 = vrot.lane.b32.xlu0 %v3890_v35, %s2898_s22  ;;  %v1154_v59 = vmax.bf16 %v3711_v1, %v4470_v15 }
 0x1de   : > { %v1959_v51 = vpop.permute.xlu1 %1958  ;;  %v3982_v2 = vpop.permute.xlu0 %1456 }
 0x1df   : > { %v2046_v5 = vmax.bf16 %v1959_v51, %v1918_v19  ;;  %v1282_v51 = vmax.bf16 %v4472_v46, %v1154_v59  ;;  %v1539_v1 = vmax.bf16 %v3982_v2, %v1411_v31  ;;  %v4475_v19 = vld [vmem:[#allocation4_spill] sm:$0xff] }
 0x1e0   : > { %1732 = vrot.lane.b32.xlu1 %v3916_v21, %s2898_s22  ;;  %1730 = vrot.lane.b32.xlu0 %v3921_v54, %s2898_s22  ;;  %v4477_v2 = vld [vmem:[#allocation24_spill] sm:$0xff] }
 0x1e1   : > { %v1410_v32 = vmax.bf16 %v4474_v52, %v1282_v51 }
 0x1e2   : > { %v3992_v23 = vpop.permute.xlu1 %1458  ;;  %v1961_v40 = vpop.permute.xlu0 %1960 }
 0x1e3   : > { %v2047_v4 = vmax.bf16 %v1961_v40, %v1919_v9  ;;  %v1538_v61 = vmax.bf16 %v3970_v58, %v1410_v32  ;;  %v1157_v9 = vmax.bf16 %v3746_v14, %v4475_v19  ;;  %v4479_v14 = vld [vmem:[#allocation44_spill] sm:$0xff]  ;;  %v4117_v32 = vld [vmem:[%s2968_s13 + $0x7c] sm:$0xf] }
 0x1e4   : > { %1352 = vrot.lane.b32.xlu1 %v3997_v43, %s2895_s19  ;;  %1350 = vrot.lane.b32.xlu0 %v4002_v29, %s2895_s19 }
 0x1e5   : > { %v2655_v47 = vcombine.low %v2046_v5, %v2047_v4  ;;  %v1285_v27 = vmax.bf16 %v4477_v2, %v1157_v9 }
 0x1e6   : > { %v1963_v36 = vpop.permute.xlu1 %1962  ;;  %v4007_v12 = vpop.permute.xlu0 %1460 }
 0x1e7   : > { %2795 = vmatprep.mubr.msk.bf16.mxu1 %vm479_vm1, %v2655_v47  ;;  %v2048_v50 = vmax.bf16 %v1963_v36, %v1920_v62  ;;  %v4478_v47 = vld [vmem:[#allocation25_spill] sm:$0xff]  ;;  %v1413_v48 = vmax.bf16 %v4479_v14, %v1285_v27  ;;  %v4482_v27 = vld [vmem:[#allocation7_spill] sm:$0xff] }
 0x1e8   : > { %1856 = vrot.lane.b32.xlu1 %v3885_v34, %s2899_s23  ;;  %1854 = vrot.lane.b32.xlu0 %v3890_v35, %s2899_s23  ;;  %v1284_v36 = vmax.bf16 %v4478_v47, %v1156_v42 }
 0x1ea   : > { %v1583_v63 = vpop.permute.xlu1 %1582  ;;  %v1965_v17 = vpop.permute.xlu0 %1964 }
 0x1eb   : > { %v2049_v6 = vmax.bf16 %v1965_v17, %v1921_v28  ;;  %v1666_v5 = vmax.bf16 %v1583_v63, %v1538_v61  ;;  %v1412_v28 = vmax.bf16 %v4480_v22, %v1284_v36  ;;  %v4483_v36 = vld [vmem:[#allocation26_spill] sm:$0xff] }
 0x1ec   : > { %1356 = vrot.lane.b32.xlu1 %v4015_v55, %s2895_s19  ;;  %1354 = vrot.lane.b32.xlu0 %v4020_v0, %s2895_s19  ;;  %v4485_v22 = vld [vmem:[#allocation46_spill] sm:$0xff] }
 0x1ed   : > { %v2656_v25 = vcombine.low %v2048_v50, %v2049_v6  ;;  %v1541_v50 = vmax.bf16 %v4007_v12, %v1413_v48  ;;  %v4484_v48 = vld [vmem:[#allocation27_spill] sm:$0xff] }
 0x1ee   : > { %v4024_v24 = vpop.permute.xlu1 %1586  ;;  %v1585_v45 = vpop.permute.xlu0 %1584 }
 0x1ef   : > { %2796 = vmatmul.mubr.msk.bf16.gmra.mrb[8].mxu1 %vm479_vm1, %v2656_v25  ;;  %v1667_v40 = vmax.bf16 %v1585_v45, %v1539_v1  ;;  %v1540_v45 = vmax.bf16 %v3992_v23, %v1412_v28  ;;  %v4486_v28 = vld [vmem:[#allocation47_spill] sm:$0xff] }
 0x1f0   : > { %1860 = vrot.lane.b32.xlu1 %v3916_v21, %s2899_s23  ;;  %1858 = vrot.lane.b32.xlu0 %v3921_v54, %s2899_s23 }
 0x1f1   : > { %v1668_v44 = vmax.bf16 %v4024_v24, %v1540_v45 }
 0x1f2   : > { %v1711_v49 = vpop.permute.xlu1 %1710  ;;  %v1589_v33 = vpop.permute.xlu0 %1588 }
 0x1f3   : > { %v1794_v7 = vmax.bf16 %v1711_v49, %v1666_v5  ;;  %v4481_v5 = vld [vmem:[#allocation6_spill] sm:$0xff] }
 0x1f4   : > { %1480 = vrot.lane.b32.xlu1 %v3997_v43, %s2896_s20  ;;  %1478 = vrot.lane.b32.xlu0 %v4002_v29, %s2896_s20  ;;  %v1159_v2 = vmax.bf16 %v3814_v13, %v4481_v5 }
 0x1f6   : > { %v1715_v56 = vpop.permute.xlu1 %1714  ;;  %v1713_v57 = vpop.permute.xlu0 %1712 }
 0x1f7   : > { %v1795_v11 = vmax.bf16 %v1713_v57, %v1667_v40  ;;  %v1669_v57 = vmax.bf16 %v1589_v33, %v1541_v50  ;;  %v1796_v59 = vmax.bf16 %v1715_v56, %v1668_v44  ;;  %v4101_v56 = vld [vmem:[%s2968_s13 + $0x70] sm:$0xf] }
 0x1f8   : > { %1984 = vrot.lane.b32.xlu1 %v3885_v34, %s2900_s24  ;;  %1982 = vrot.lane.b32.xlu0 %v3890_v35, %s2900_s24  ;;  %v4487_v44 = vld [vmem:[#allocation8_spill] sm:$0xff] }
 0x1fa   : > { %v1839_v18 = vpop.permute.xlu1 %1838  ;;  %v1717_v30 = vpop.permute.xlu0 %1716 }
 0x1fb   : > { %v1922_v63 = vmax.bf16 %v1839_v18, %v1794_v7  ;;  %v1797_v12 = vmax.bf16 %v1717_v30, %v1669_v57  ;;  %v4096_v30 = vld [vmem:[%s2968_s13 + $0x74] sm:$0xf]  ;;  %v1287_v7 = vmax.bf16 %v4483_v36, %v1159_v2 }
 0x1fc   : > { %1484 = vrot.lane.b32.xlu1 %v4015_v55, %s2896_s20  ;;  %1482 = vrot.lane.b32.xlu0 %v4020_v0, %s2896_s20 }
 0x1fd   : > { %v1415_v13 = vmax.bf16 %v4485_v22, %v1287_v7 }
 0x1fe   : > { %v4047_v26 = vpop.permute.xlu1 %1340  ;;  %v1841_v3 = vpop.permute.xlu0 %1840 }
 0x1ff   : > { %v1923_v62 = vmax.bf16 %v1841_v3, %v1795_v11  ;;  %v1158_v11 = vmax.bf16 %v3819_v53, %v4482_v27  ;;  %v4168_v53 = vld [vmem:[%s4418_s5] ss:$0 sm:$0xff] }
 0x200   : > { %1988 = vrot.lane.b32.xlu1 %v3916_v21, %s2900_s24  ;;  %1986 = vrot.lane.b32.xlu0 %v3921_v54, %s2900_s24 }
 0x202   : > { %v1845_v20 = vpop.permute.xlu1 %1844  ;;  %v1843_v60 = vpop.permute.xlu0 %1842 }
 0x203   : > { %v1925_v23 = vmax.bf16 %v1845_v20, %v1797_v12  ;;  %v1924_v33 = vmax.bf16 %v1843_v60, %v1796_v59  ;;  %v4122_v20 = vld [vmem:[%s2968_s13 + $0x78] sm:$0xf] }
 0x204   : > { %1608 = vrot.lane.b32.xlu1 %v3997_v43, %s2897_s21  ;;  %1606 = vrot.lane.b32.xlu0 %v4002_v29, %s2897_s21  ;;  %v4488_v59 = vld [vmem:[#allocation9_spill] sm:$0xff] }
 0x206   : > { %v4067_v4 = vpop.permute.xlu1 %1464  ;;  %v4070_v58 = vpop.permute.xlu0 %1462 }
 0x207   : > { %v1543_v50 = vmax.bf16 %v4067_v4, %v1415_v13 }
 0x208   : > { %1612 = vrot.lane.b32.xlu1 %v4015_v55, %s2897_s21  ;;  %1610 = vrot.lane.b32.xlu0 %v4020_v0, %s2897_s21 }
 0x20a   : > { %v1969_v17 = vpop.permute.xlu1 %1968  ;;  %v1967_v25 = vpop.permute.xlu0 %1966 }
 0x20b   : > { %v2051_v6 = vmax.bf16 %v1969_v17, %v1923_v62  ;;  %v2050_v49 = vmax.bf16 %v1967_v25, %v1922_v63  ;;  %v1286_v62 = vmax.bf16 %v4484_v48, %v1158_v11  ;;  %v4490_v11 = vld [vmem:[#allocation29_spill] sm:$0xff] }
 0x20c   : > { %1736 = vrot.lane.b32.xlu1 %v3997_v43, %s2898_s22  ;;  %1734 = vrot.lane.b32.xlu0 %v4002_v29, %s2898_s22 }
 0x20d   : > { %v2657_v37 = vcombine.low %v2050_v49, %v2051_v6  ;;  %v1414_v63 = vmax.bf16 %v4486_v28, %v1286_v62  ;;  %v4491_v62 = vld [vmem:[#allocation48_spill] sm:$0xff] }
 0x20e   : > { %v4086_v18 = vpop.permute.xlu1 %1468  ;;  %v4088_v15 = vpop.permute.xlu0 %1466 }
 0x20f   : > { %2799 = vmatprep.mubr.msk.bf16.mxu1 %vm479_vm1, %v2657_v37  ;;  %v1542_v45 = vmax.bf16 %v4070_v58, %v1414_v63  ;;  %v1161_v37 = vmax.bf16 %v3795_v8, %v4487_v44 }
 0x210   : > { %1740 = vrot.lane.b32.xlu1 %v4015_v55, %s2898_s22  ;;  %1738 = vrot.lane.b32.xlu0 %v4020_v0, %s2898_s22 }
 0x212   : > { %v1973_v38 = vpop.permute.xlu1 %1972  ;;  %v1971_v39 = vpop.permute.xlu0 %1970 }
 0x213   : > { %v2053_v24 = vmax.bf16 %v1973_v38, %v1925_v23  ;;  %v2052_v3 = vmax.bf16 %v1971_v39, %v1924_v33  ;;  %v1160_v23 = vmax.bf16 %v3838_v10, %v4488_v59 }
 0x214   : > { %1360 = vrot.lane.b32.xlu1 %v4096_v30, %s2895_s19  ;;  %1358 = vrot.lane.b32.xlu0 %v4101_v56, %s2895_s19 }
 0x215   : > { %v2658_v46 = vcombine.low %v2052_v3, %v2053_v24  ;;  %v4489_v3 = vld [vmem:[#allocation28_spill] sm:$0xff]  ;;  %v1288_v10 = vmax.bf16 %v4490_v11, %v1160_v23 }
 0x216   : > { %v1593_v51 = vpop.permute.xlu1 %1592  ;;  %v4105_v16 = vpop.permute.xlu0 %1590 }
 0x217   : > { %2800 = vmatmul.mubr.msk.bf16.gmra.mrb[12].mxu1 %vm479_vm1, %v2658_v46  ;;  %v1671_v12 = vmax.bf16 %v1593_v51, %v1543_v50  ;;  %v1670_v33 = vmax.bf16 %v4105_v16, %v1542_v45  ;;  %v1289_v46 = vmax.bf16 %v4489_v3, %v1161_v37  ;;  %v1416_v22 = vmax.bf16 %v4491_v62, %v1288_v10 }
 0x218   : > { %1864 = vrot.lane.b32.xlu1 %v3997_v43, %s2899_s23  ;;  %1862 = vrot.lane.b32.xlu0 %v4002_v29, %s2899_s23 }
 0x219   : > { %v1417_v7 = vmax.bf16 %v4047_v26, %v1289_v46  ;;  %v1544_v26 = vmax.bf16 %v4088_v15, %v1416_v22 }
 0x21a   : > { %v4112_v31 = vpop.permute.xlu1 %1596  ;;  %v4114_v52 = vpop.permute.xlu0 %1594 }
 0x21b   : > { %v1545_v28 = vmax.bf16 %v4086_v18, %v1417_v7 }
 0x21c   : > { %1364 = vrot.lane.b32.xlu1 %v4117_v32, %s2895_s19  ;;  %1362 = vrot.lane.b32.xlu0 %v4122_v20, %s2895_s19 }
 0x21e   : > { %v1721_v1 = vpop.permute.xlu1 %1720  ;;  %v1719_v60 = vpop.permute.xlu0 %1718 }
 0x21f   : > { %v1799_v51 = vmax.bf16 %v1721_v1, %v1671_v12  ;;  %v1798_v16 = vmax.bf16 %v1719_v60, %v1670_v33 }
 0x220   : > { %1868 = vrot.lane.b32.xlu1 %v4015_v55, %s2899_s23  ;;  %1866 = vrot.lane.b32.xlu0 %v4020_v0, %s2899_s23 }
 0x222   : > { %v4130_v61 = vpop.permute.xlu1 %1724  ;;  %v4132_v19 = vpop.permute.xlu0 %1722 }
 0x224   : > { %1488 = vrot.lane.b32.xlu1 %v4096_v30, %s2896_s20  ;;  %1486 = vrot.lane.b32.xlu0 %v4101_v56, %s2896_s20 }
 0x226   : > { %v4138_v9 = vpop.permute.xlu1 %1344  ;;  %v4140_v40 = vpop.permute.xlu0 %1342 }
 0x228   : > { %1992 = vrot.lane.b32.xlu1 %v3997_v43, %s2900_s24  ;;  %1990 = vrot.lane.b32.xlu0 %v4002_v29, %s2900_s24 }
 0x22a   : > { %v1849_v41 = vpop.permute.xlu1 %1848  ;;  %v1847_v42 = vpop.permute.xlu0 %1846 }
 0x22b   : > { %v1927_v48 = vmax.bf16 %v1849_v41, %v1799_v51  ;;  %v1926_v13 = vmax.bf16 %v1847_v42, %v1798_v16  ;;  %v1672_v42 = vmax.bf16 %v4114_v52, %v1544_v26  ;;  %v4492_v51 = vld [vmem:[#allocation10_spill] sm:$0xff]  ;;  %v4497_v26 = vld [vmem:[#allocation13_spill] sm:$0xff] }
 0x22c   : > { %1492 = vrot.lane.b32.xlu1 %v4117_v32, %s2896_s20  ;;  %1490 = vrot.lane.b32.xlu0 %v4122_v20, %s2896_s20  ;;  %s4183_s20 = scalar_lea.vmem %s4421_s8, %s2580_s30  ;;  %v4494_v16 = vld [vmem:[#allocation30_spill] sm:$0xff] }
 0x22d   : > { %v1800_v44 = vmax.bf16 %v4132_v19, %v1672_v42 }
 0x22e   : > { %v4154_v47 = vpop.permute.xlu1 %1348  ;;  %v4157_v14 = vpop.permute.xlu0 %1346 }
 0x230   : > { %1996 = vrot.lane.b32.xlu1 %v4015_v55, %s2900_s24  ;;  %1994 = vrot.lane.b32.xlu0 %v4020_v0, %s2900_s24 }
 0x232   : > { %v1853_v17 = vpop.permute.xlu1 %1852  ;;  %v2789_v6 = vpop.f32.mrb[0].mxu1 }
 0x233   : > { %v1851_v25 = vpop.permute.xlu0 %1850  ;;  %v2252_v49 = vadd.f32 %v2789_v6, %v4168_v53  ;;  %v2243_v57 = vpop.f32.mrb[1].mxu1  ;;  %v1673_v6 = vmax.bf16 %v4112_v31, %v1545_v28 }
 0x234   : > { %1616 = vrot.lane.b32.xlu1 %v4096_v30, %s2897_s21  ;;  %v2244_v4 = vadd.f32 %v4168_v53, %v2243_v57  ;;  %v2790_v58 = vpop.f32.mrb[2].mxu1  ;;  %1614 = vrot.lane.b32.xlu0 %v4101_v56, %s2897_s21  ;;  %v1928_v31 = vmax.bf16 %v1851_v25, %v1800_v44 }
 0x235   : > { %v2372_v8 = vmax.f32 %v2252_v49, 0.0  ;;  %v2255_v38 = vadd.f32 %v2790_v58, %v4168_v53  ;;  %v2246_v24 = vpop.f32.mrb[3].mxu1  ;;  %v1801_v18 = vmax.bf16 %v4130_v61, %v1673_v6 }
 0x236   : > { %v4192_v39 = vpop.permute.xlu1 %1472  ;;  %v2370_v5 = vmax.f32 %v2244_v4, 0.0  ;;  %v2247_v2 = vadd.f32 %v4168_v53, %v2246_v24 }
 0x237   : > { %v4196_v27 = vpop.permute.xlu0 %1470  ;;  %2404 = vst.msk [vmem:[%s4183_s20 + $0x10] sm:$0xff] %vm479_vm1, %v2372_v8  ;;  %v2373_v36 = vmax.f32 %v2255_v38, 0.0  ;;  %v1929_v15 = vmax.bf16 %v1853_v17, %v1801_v18 }
 0x238   : > { %1620 = vrot.lane.b32.xlu1 %v4117_v32, %s2897_s21  ;;  %2402 = vst.msk [vmem:[%s4183_s20] sm:$0xff] %vm479_vm1, %v2370_v5  ;;  %v2371_v1 = vmax.f32 %v2247_v2, 0.0  ;;  %1618 = vrot.lane.b32.xlu0 %v4122_v20, %s2897_s21  ;;  %v1163_v5 = vmax.bf16 %v3885_v34, %v4492_v51  ;;  %v4493_v2 = vld [vmem:[#allocation11_spill] sm:$0xff] }
 0x239   : > { %2405 = vst.msk [vmem:[%s4183_s20 + $0x18] sm:$0xff] %vm479_vm1, %v2373_v36  ;;  %v1162_v11 = vmax.bf16 %v3890_v35, %v4493_v2 }
 0x23a   : > { %v1977_v60 = vpop.permute.xlu1 %1976  ;;  %2403 = vst.msk [vmem:[%s4183_s20 + $0x8] sm:$0xff] %vm479_vm1, %v2371_v1  ;;  %v1291_v36 = vmax.bf16 %v4494_v16, %v1163_v5 }
 0x23b   : > { %v2055_v63 = vmax.bf16 %v1977_v60, %v1927_v48  ;;  %v1975_v50 = vpop.permute.xlu0 %1974  ;;  %v4495_v48 = vld [vmem:[#allocation31_spill] sm:$0xff] }
 0x23c   : > { %v2054_v41 = vmax.bf16 %v1975_v50, %v1926_v13  ;;  %1744 = vrot.lane.b32.xlu1 %v4096_v30, %s2898_s22  ;;  %1742 = vrot.lane.b32.xlu0 %v4101_v56, %s2898_s22  ;;  %v1290_v1 = vmax.bf16 %v4495_v48, %v1162_v11  ;;  %v1419_v62 = vmax.bf16 %v4138_v9, %v1291_v36 }
 0x23e   : > { %v2659_v45 = vcombine.low %v2054_v41, %v2055_v63  ;;  %v1477_v49 = vpop.permute.xlu1 %1476  ;;  %v1418_v22 = vmax.bf16 %v4140_v40, %v1290_v1  ;;  %v1547_v60 = vmax.bf16 %v4192_v39, %v1419_v62  ;;  %v4496_v63 = vld [vmem:[#allocation12_spill] sm:$0xff]  ;;  %v1164_v41 = vmax.bf16 %v3921_v54, %v4497_v26  ;;  %v4499_v40 = vld [vmem:[#allocation33_spill] sm:$0xff] }
 0x23f   : > { %v4222_v57 = vpop.permute.xlu0 %1474  ;;  %v1165_v35 = vmax.bf16 %v3916_v21, %v4496_v63 }
 0x240   : > { %2803 = vmatprep.mubr.msk.bf16.mxu1 %vm479_vm1, %v2659_v45  ;;  %1748 = vrot.lane.b32.xlu1 %v4117_v32, %s2898_s22  ;;  %v1546_v34 = vmax.bf16 %v4196_v27, %v1418_v22  ;;  %v4498_v45 = vld [vmem:[#allocation32_spill] sm:$0xff] }
 0x241   : > { %1746 = vrot.lane.b32.xlu0 %v4122_v20, %s2898_s22  ;;  %v1293_v18 = vmax.bf16 %v4498_v45, %v1165_v35  ;;  %v4501_v35 = vld [vmem:[#allocation15_spill] sm:$0xff] }
 0x242   : > { %v1981_v37 = vpop.permute.xlu1 %1980 }
 0x243   : > { %v2057_v52 = vmax.bf16 %v1981_v37, %v1929_v15  ;;  %v1979_v12 = vpop.permute.xlu0 %1978  ;;  %v1292_v15 = vmax.bf16 %v4499_v40, %v1164_v41  ;;  %v1421_v39 = vmax.bf16 %v4154_v47, %v1293_v18  ;;  %v4502_v41 = vld [vmem:[#allocation34_spill] sm:$0xff]  ;;  %v4503_v18 = vld [vmem:[#allocation35_spill] sm:$0xff] }
 0x244   : > { %v2056_v4 = vmax.bf16 %v1979_v12, %v1928_v31  ;;  %1872 = vrot.lane.b32.xlu1 %v4096_v30, %s2899_s23 }
 0x245   : > { %1870 = vrot.lane.b32.xlu0 %v4101_v56, %s2899_s23  ;;  %v1420_v27 = vmax.bf16 %v4157_v14, %v1292_v15  ;;  %v1549_v12 = vmax.bf16 %v1477_v49, %v1421_v39 }
 0x246   : > { %v2660_v61 = vcombine.low %v2056_v4, %v2057_v52  ;;  %v1601_v19 = vpop.permute.xlu1 %1600 }
 0x247   : > { %v1599_v58 = vpop.permute.xlu0 %1598  ;;  %v1675_v50 = vmax.bf16 %v1601_v19, %v1547_v60  ;;  %v1548_v54 = vmax.bf16 %v4222_v57, %v1420_v27 }
 0x248   : > { %2804 = vmatmul.mubr.msk.bf16.gmra.mrb[16].mxu1 %vm479_vm1, %v2660_v61  ;;  %1876 = vrot.lane.b32.xlu1 %v4117_v32, %s2899_s23  ;;  %v1674_v6 = vmax.bf16 %v1599_v58, %v1546_v34  ;;  %v4500_v34 = vld [vmem:[#allocation14_spill] sm:$0xff] }
 0x249   : > { %1874 = vrot.lane.b32.xlu0 %v4122_v20, %s2899_s23  ;;  %v1167_v63 = vmax.bf16 %v3997_v43, %v4500_v34  ;;  %v4504_v43 = vld [vmem:[#allocation16_spill] sm:$0xff] }
 0x24a   : > { %v1605_v17 = vpop.permute.xlu1 %1604 }
 0x24b   : > { %v1603_v25 = vpop.permute.xlu0 %1602  ;;  %v1677_v58 = vmax.bf16 %v1605_v17, %v1549_v12 }
 0x24c   : > { %2000 = vrot.lane.b32.xlu1 %v4096_v30, %s2900_s24  ;;  %v1676_v51 = vmax.bf16 %v1603_v25, %v1548_v54  ;;  %v4506_v54 = vld [vmem:[#allocation36_spill] sm:$0xff] }
 0x24d   : > { %1998 = vrot.lane.b32.xlu0 %v4101_v56, %s2900_s24 }
 0x24e   : > { %v1729_v59 = vpop.permute.xlu1 %1728 }
 0x24f   : > { %v1727_v23 = vpop.permute.xlu0 %1726  ;;  %v1803_v9 = vmax.bf16 %v1729_v59, %v1675_v50  ;;  %v1166_v50 = vmax.bf16 %v4002_v29, %v4501_v35 }
 0x250   : > { %2004 = vrot.lane.b32.xlu1 %v4117_v32, %s2900_s24  ;;  %v1802_v31 = vmax.bf16 %v1727_v23, %v1674_v6  ;;  %v1295_v6 = vmax.bf16 %v4502_v41, %v1167_v63 }
 0x251   : > { %2002 = vrot.lane.b32.xlu0 %v4122_v20, %s2900_s24 }
 0x252   : > { %v1733_v33 = vpop.permute.xlu1 %1732 }
 0x253   : > { %v1731_v8 = vpop.permute.xlu0 %1730  ;;  %v1805_v2 = vmax.bf16 %v1733_v33, %v1677_v58 }
 0x254   : > { %v1804_v23 = vmax.bf16 %v1731_v8, %v1676_v51 }
 0x256   : > { %v4247_v38 = vpop.permute.xlu1 %1352 }
 0x257   : > { %v4249_v24 = vpop.permute.xlu0 %1350  ;;  %v1423_v40 = vmax.bf16 %v4247_v38, %v1295_v6 }
 0x25a   : > { %v1857_v3 = vpop.permute.xlu1 %1856 }
 0x25b   : > { %v1855_v46 = vpop.permute.xlu0 %1854  ;;  %v1931_v37 = vmax.bf16 %v1857_v3, %v1803_v9  ;;  %v1294_v9 = vmax.bf16 %v4503_v18, %v1166_v50 }
 0x25c   : > { %v1930_v52 = vmax.bf16 %v1855_v46, %v1802_v31 }
 0x25d   : > { %v1422_v15 = vmax.bf16 %v4249_v24, %v1294_v9  ;;  %v4507_v24 = vld [vmem:[#allocation37_spill] sm:$0xff] }
 0x25e   : > { %v4255_v10 = vpop.permute.xlu1 %1356 }
 0x25f   : > { %v4258_v7 = vpop.permute.xlu0 %1354 }
 0x262   : > { %v1861_v13 = vpop.permute.xlu1 %1860 }
 0x263   : > { %v1859_v28 = vpop.permute.xlu0 %1858  ;;  %v1933_v47 = vmax.bf16 %v1861_v13, %v1805_v2 }
 0x264   : > { %v1932_v3 = vmax.bf16 %v1859_v28, %v1804_v23 }
 0x266   : > { %v1481_v42 = vpop.permute.xlu1 %1480 }
 0x267   : > { %v1479_v44 = vpop.permute.xlu0 %1478  ;;  %v1551_v39 = vmax.bf16 %v1481_v42, %v1423_v40 }
 0x268   : > { %v1550_v27 = vmax.bf16 %v1479_v44, %v1422_v15 }
 0x26a   : > { %v1985_v21 = vpop.permute.xlu1 %1984 }
 0x26b   : > { %v2059_v4 = vmax.bf16 %v1985_v21, %v1931_v37  ;;  %v1983_v61 = vpop.permute.xlu0 %1982  ;;  %v4505_v21 = vld [vmem:[#allocation17_spill] sm:$0xff] }
 0x26c   : > { %v2058_v19 = vmax.bf16 %v1983_v61, %v1930_v52  ;;  %v1169_v52 = vmax.bf16 %v4015_v55, %v4504_v43  ;;  %v1168_v12 = vmax.bf16 %v4020_v0, %v4505_v21  ;;  %v4509_v21 = vld [vmem:[#allocation19_spill] sm:$0xff] }
 0x26e   : > { %v2661_v59 = vcombine.low %v2058_v19, %v2059_v4  ;;  %v1485_v5 = vpop.permute.xlu1 %1484  ;;  %v1297_v19 = vmax.bf16 %v4506_v54, %v1169_v52  ;;  %v1296_v51 = vmax.bf16 %v4507_v24, %v1168_v12  ;;  %v1170_v12 = vmax.bf16 %v4101_v56, %v4509_v21  ;;  %v4510_v54 = vld [vmem:[#allocation38_spill] sm:$0xff]  ;;  %v4511_v24 = vld [vmem:[#allocation39_spill] sm:$0xff] }
 0x26f   : > { %v1483_v11 = vpop.permute.xlu0 %1482 }
 0x270   : > { %2807 = vmatprep.mubr.msk.bf16.mxu1 %vm479_vm1, %v2661_v59  ;;  %v1425_v44 = vmax.bf16 %v4255_v10, %v1297_v19  ;;  %v1424_v55 = vmax.bf16 %v4258_v7, %v1296_v51  ;;  %v1298_v51 = vmax.bf16 %v4511_v24, %v1170_v12 }
 0x272   : > { %v1989_v14 = vpop.permute.xlu1 %1988 }
 0x273   : > { %v2061_v46 = vmax.bf16 %v1989_v14, %v1933_v47  ;;  %v1987_v16 = vpop.permute.xlu0 %1986  ;;  %v1553_v47 = vmax.bf16 %v1485_v5, %v1425_v44 }
 0x274   : > { %v2060_v49 = vmax.bf16 %v1987_v16, %v1932_v3 }
 0x276   : > { %v2662_v36 = vcombine.low %v2060_v49, %v2061_v46  ;;  %v1609_v48 = vpop.permute.xlu1 %1608  ;;  %v1552_v46 = vmax.bf16 %v1483_v11, %v1424_v55  ;;  %v4513_v55 = vld [vmem:[#allocation21_spill] sm:$0xff] }
 0x277   : > { %v1607_v1 = vpop.permute.xlu0 %1606  ;;  %v1679_v29 = vmax.bf16 %v1609_v48, %v1551_v39 }
 0x278   : > { %2808 = vmatmul.mubr.msk.bf16.gmra.mrb[20].mxu1 %vm479_vm1, %v2662_v36  ;;  %v1678_v4 = vmax.bf16 %v1607_v1, %v1550_v27 }
 0x27a   : > { %v1613_v57 = vpop.permute.xlu1 %1612 }
 0x27b   : > { %v1611_v17 = vpop.permute.xlu0 %1610  ;;  %v1681_v48 = vmax.bf16 %v1613_v57, %v1553_v47  ;;  %v4514_v47 = vld [vmem:[#allocation40_spill] sm:$0xff] }
 0x27c   : > { %v1680_v10 = vmax.bf16 %v1611_v17, %v1552_v46 }
 0x27e   : > { %v1737_v25 = vpop.permute.xlu1 %1736 }
 0x27f   : > { %v1735_v62 = vpop.permute.xlu0 %1734  ;;  %v1807_v58 = vmax.bf16 %v1737_v25, %v1679_v29  ;;  %v4508_v29 = vld [vmem:[#allocation18_spill] sm:$0xff] }
 0x280   : > { %v1806_v42 = vmax.bf16 %v1735_v62, %v1678_v4 }
 0x282   : > { %v1741_v33 = vpop.permute.xlu1 %1740 }
 0x283   : > { %v1739_v22 = vpop.permute.xlu0 %1738  ;;  %v1809_v11 = vmax.bf16 %v1741_v33, %v1681_v48 }
 0x284   : > { %v1808_v50 = vmax.bf16 %v1739_v22, %v1680_v10 }
 0x286   : > { %v4276_v8 = vpop.permute.xlu1 %1360 }
 0x287   : > { %v4278_v60 = vpop.permute.xlu0 %1358 }
 0x28a   : > { %v1865_v13 = vpop.permute.xlu1 %1864 }
 0x28b   : > { %v1863_v28 = vpop.permute.xlu0 %1862  ;;  %v1935_v59 = vmax.bf16 %v1865_v13, %v1807_v58 }
 0x28c   : > { %v1934_v2 = vmax.bf16 %v1863_v28, %v1806_v42  ;;  %v4512_v42 = vld [vmem:[#allocation20_spill] sm:$0xff] }
 0x28d   : > { %v1173_v44 = vmax.bf16 %v4117_v32, %v4512_v42 }
 0x28e   : > { %v4284_v26 = vpop.permute.xlu1 %1364 }
 0x28f   : > { %v4287_v45 = vpop.permute.xlu0 %1362 }
 0x292   : > { %v1869_v31 = vpop.permute.xlu1 %1868 }
 0x293   : > { %v1867_v37 = vpop.permute.xlu0 %1866  ;;  %v1937_v17 = vmax.bf16 %v1869_v31, %v1809_v11 }
 0x294   : > { %v1936_v6 = vmax.bf16 %v1867_v37, %v1808_v50  ;;  %v1171_v37 = vmax.bf16 %v4096_v30, %v4508_v29 }
 0x296   : > { %v4296_v61 = vpop.permute.xlu1 %1488  ;;  %v1299_v19 = vmax.bf16 %v4510_v54, %v1171_v37 }
 0x297   : > { %v4299_v38 = vpop.permute.xlu0 %1486 }
 0x29a   : > { %v1993_v23 = vpop.permute.xlu1 %1992  ;;  %v2793_v3 = vpop.f32.mrb[4].mxu1 }
 0x29b   : > { %v2063_v0 = vmax.bf16 %v1993_v23, %v1935_v59  ;;  %v1991_v14 = vpop.permute.xlu0 %1990  ;;  %v2268_v16 = vadd.f32 %v2793_v3, %v4168_v53  ;;  %v2259_v36 = vpop.f32.mrb[5].mxu1  ;;  %v1427_v59 = vmax.bf16 %v4276_v8, %v1299_v19  ;;  %v1426_v23 = vmax.bf16 %v4278_v60, %v1298_v51 }
 0x29c   : > { %v2062_v49 = vmax.bf16 %v1991_v14, %v1934_v2  ;;  %v2260_v1 = vadd.f32 %v4168_v53, %v2259_v36  ;;  %v2794_v25 = vpop.f32.mrb[6].mxu1  ;;  %v1172_v2 = vmax.bf16 %v4122_v20, %v4513_v55  ;;  %v4515_v14 = vld [vmem:[#allocation41_spill] sm:$0xff] }
 0x29d   : > { %v2376_v62 = vmax.f32 %v2268_v16, 0.0  ;;  %v2271_v5 = vadd.f32 %v2794_v25, %v4168_v53  ;;  %v2262_v13 = vpop.f32.mrb[7].mxu1  ;;  %v1555_v56 = vmax.bf16 %v4296_v61, %v1427_v59  ;;  %v1554_v16 = vmax.bf16 %v4299_v38, %v1426_v23 }
 0x29e   : > { %v2663_v7 = vcombine.low %v2062_v49, %v2063_v0  ;;  %v1493_v28 = vpop.permute.xlu1 %1492  ;;  %v2374_v34 = vmax.f32 %v2260_v1, 0.0  ;;  %v2263_v63 = vadd.f32 %v4168_v53, %v2262_v13  ;;  %v1301_v0 = vmax.bf16 %v4514_v47, %v1173_v44 }
 0x29f   : > { %v1491_v35 = vpop.permute.xlu0 %1490  ;;  %2408 = vst.msk [vmem:[%s4183_s20 + $0x30] sm:$0xff] %vm479_vm1, %v2376_v62  ;;  %v2377_v57 = vmax.f32 %v2271_v5, 0.0  ;;  %v1300_v46 = vmax.bf16 %v4515_v14, %v1172_v2 }
 0x2a0   : > { %2811 = vmatprep.mubr.msk.bf16.mxu1 %vm479_vm1, %v2663_v7  ;;  %2406 = vst.msk [vmem:[%s4183_s20 + $0x20] sm:$0xff] %vm479_vm1, %v2374_v34  ;;  %v2375_v41 = vmax.f32 %v2263_v63, 0.0  ;;  %v1429_v49 = vmax.bf16 %v4284_v26, %v1301_v0 }
 0x2a1   : > { %2409 = vst.msk [vmem:[%s4183_s20 + $0x38] sm:$0xff] %vm479_vm1, %v2377_v57  ;;  %v1428_v8 = vmax.bf16 %v4287_v45, %v1300_v46 }
 0x2a2   : > { %v1997_v18 = vpop.permute.xlu1 %1996  ;;  %2407 = vst.msk [vmem:[%s4183_s20 + $0x28] sm:$0xff] %vm479_vm1, %v2375_v41  ;;  %v1557_v20 = vmax.bf16 %v1493_v28, %v1429_v49 }
 0x2a3   : > { %v2065_v33 = vmax.bf16 %v1997_v18, %v1937_v17  ;;  %v1995_v9 = vpop.permute.xlu0 %1994  ;;  %v1556_v25 = vmax.bf16 %v1491_v35, %v1428_v8 }
 0x2a4   : > { %v2064_v40 = vmax.bf16 %v1995_v9, %v1936_v6 }
 0x2a6   : > { %v2664_v15 = vcombine.low %v2064_v40, %v2065_v33  ;;  %v1617_v22 = vpop.permute.xlu1 %1616 }
 0x2a7   : > { %v1615_v39 = vpop.permute.xlu0 %1614  ;;  %v1683_v32 = vmax.bf16 %v1617_v22, %v1555_v56 }
 0x2a8   : > { %2812 = vmatmul.mubr.msk.bf16.gmra.mrb[24].mxu1 %vm479_vm1, %v2664_v15  ;;  %v1682_v36 = vmax.bf16 %v1615_v39, %v1554_v16 }
 0x2aa   : > { %v1621_v27 = vpop.permute.xlu1 %1620 }
 0x2ab   : > { %v1619_v43 = vpop.permute.xlu0 %1618  ;;  %v1685_v62 = vmax.bf16 %v1621_v27, %v1557_v20 }
 0x2ac   : > { %v1684_v61 = vmax.bf16 %v1619_v43, %v1556_v25 }
 0x2ae   : > { %v1745_v31 = vpop.permute.xlu1 %1744 }
 0x2af   : > { %v1743_v52 = vpop.permute.xlu0 %1742  ;;  %v1811_v1 = vmax.bf16 %v1745_v31, %v1683_v32 }
 0x2b0   : > { %v1810_v10 = vmax.bf16 %v1743_v52, %v1682_v36 }
 0x2b2   : > { %v1749_v4 = vpop.permute.xlu1 %1748 }
 0x2b3   : > { %v1747_v58 = vpop.permute.xlu0 %1746  ;;  %v1813_v11 = vmax.bf16 %v1749_v4, %v1685_v62 }
 0x2b4   : > { %v1812_v63 = vmax.bf16 %v1747_v58, %v1684_v61 }
 0x2b6   : > { %v1873_v30 = vpop.permute.xlu1 %1872 }
 0x2b7   : > { %v1871_v3 = vpop.permute.xlu0 %1870  ;;  %v1939_v7 = vmax.bf16 %v1873_v30, %v1811_v1 }
 0x2b8   : > { %v1938_v5 = vmax.bf16 %v1871_v3, %v1810_v10 }
 0x2ba   : > { %v1877_v48 = vpop.permute.xlu1 %1876 }
 0x2bb   : > { %v1875_v60 = vpop.permute.xlu0 %1874  ;;  %v1941_v50 = vmax.bf16 %v1877_v48, %v1813_v11 }
 0x2bc   : > { %v1940_v57 = vmax.bf16 %v1875_v60, %v1812_v63 }
 0x2be   : > { %v2001_v13 = vpop.permute.xlu1 %2000 }
 0x2bf   : > { %v2067_v34 = vmax.bf16 %v2001_v13, %v1939_v7  ;;  %v1999_v38 = vpop.permute.xlu0 %1998 }
 0x2c0   : > { %v2066_v26 = vmax.bf16 %v1999_v38, %v1938_v5 }
 0x2c2   : > { %v2665_v45 = vcombine.low %v2066_v26, %v2067_v34  ;;  %v2005_v17 = vpop.permute.xlu1 %2004  ;;  %v2797_v41 = vpop.f32.mrb[8].mxu1 }
 0x2c3   : > { %v2069_v28 = vmax.bf16 %v2005_v17, %v1941_v50  ;;  %v2003_v6 = vpop.permute.xlu0 %2002  ;;  %v2284_v35 = vadd.f32 %v2797_v41, %v4168_v53  ;;  %v2275_v33 = vpop.f32.mrb[9].mxu1 }
 0x2c4   : > { %v2068_v18 = vmax.bf16 %v2003_v6, %v1940_v57  ;;  %2815 = vmatprep.mubr.msk.bf16.mxu1 %vm479_vm1, %v2665_v45  ;;  %v2276_v9 = vadd.f32 %v4168_v53, %v2275_v33  ;;  %v2798_v40 = vpop.f32.mrb[10].mxu1 }
 0x2c5   : > { %v2380_v15 = vmax.f32 %v2284_v35, 0.0  ;;  %v2287_v39 = vadd.f32 %v2798_v40, %v4168_v53  ;;  %v2278_v27 = vpop.f32.mrb[11].mxu1 }
 0x2c6   : > { %v2666_v22 = vcombine.low %v2068_v18, %v2069_v28  ;;  %v2378_v43 = vmax.f32 %v2276_v9, 0.0  ;;  %v2279_v31 = vadd.f32 %v4168_v53, %v2278_v27 }
 0x2c7   : > { %2412 = vst.msk [vmem:[%s4183_s20 + $0x50] sm:$0xff] %vm479_vm1, %v2380_v15  ;;  %v2381_v52 = vmax.f32 %v2287_v39, 0.0 }
 0x2c8   : > { %2816 = vmatmul.mubr.msk.bf16.gmra.mrb[28].mxu1 %vm479_vm1, %v2666_v22  ;;  %2410 = vst.msk [vmem:[%s4183_s20 + $0x40] sm:$0xff] %vm479_vm1, %v2378_v43  ;;  %v2379_v29 = vmax.f32 %v2279_v31, 0.0 }
 0x2c9   : > { %2413 = vst.msk [vmem:[%s4183_s20 + $0x58] sm:$0xff] %vm479_vm1, %v2381_v52 }
 0x2ca   : > { %2411 = vst.msk [vmem:[%s4183_s20 + $0x48] sm:$0xff] %vm479_vm1, %v2379_v29 }
 0x2ea   : > { %v2801_v37 = vpop.f32.mrb[12].mxu1 }
 0x2eb   : > { %v2300_v21 = vadd.f32 %v2801_v37, %v4168_v53  ;;  %v2291_v12 = vpop.f32.mrb[13].mxu1 }
 0x2ec   : > { %v2292_v4 = vadd.f32 %v4168_v53, %v2291_v12  ;;  %v2802_v54 = vpop.f32.mrb[14].mxu1 }
 0x2ed   : > { %v2384_v19 = vmax.f32 %v2300_v21, 0.0  ;;  %v2303_v58 = vadd.f32 %v2802_v54, %v4168_v53  ;;  %v2294_v24 = vpop.f32.mrb[15].mxu1 }
 0x2ee   : > { %v2382_v51 = vmax.f32 %v2292_v4, 0.0  ;;  %v2295_v42 = vadd.f32 %v4168_v53, %v2294_v24 }
 0x2ef   : > { %2416 = vst.msk [vmem:[%s4183_s20 + $0x70] sm:$0xff] %vm479_vm1, %v2384_v19  ;;  %v2385_v44 = vmax.f32 %v2303_v58, 0.0 }
 0x2f0   : > { %2414 = vst.msk [vmem:[%s4183_s20 + $0x60] sm:$0xff] %vm479_vm1, %v2382_v51  ;;  %v2383_v59 = vmax.f32 %v2295_v42, 0.0 }
 0x2f1   : > { %2417 = vst.msk [vmem:[%s4183_s20 + $0x78] sm:$0xff] %vm479_vm1, %v2385_v44 }
 0x2f2   : > { %2415 = vst.msk [vmem:[%s4183_s20 + $0x68] sm:$0xff] %vm479_vm1, %v2383_v59 }
 0x31b   : > { %v2805_v55 = vpop.f32.mrb[16].mxu1 }
 0x31c   : > { %v2316_v2 = vadd.f32 %v2805_v55, %v4168_v53  ;;  %v2307_v23 = vpop.f32.mrb[17].mxu1 }
 0x31d   : > { %v2308_v30 = vadd.f32 %v4168_v53, %v2307_v23  ;;  %v2806_v47 = vpop.f32.mrb[18].mxu1 }
 0x31e   : > { %v2388_v0 = vmax.f32 %v2316_v2, 0.0  ;;  %v2319_v56 = vadd.f32 %v2806_v47, %v4168_v53  ;;  %v2310_v3 = vpop.f32.mrb[19].mxu1 }
 0x31f   : > { %v2386_v14 = vmax.f32 %v2308_v30, 0.0  ;;  %v2311_v46 = vadd.f32 %v4168_v53, %v2310_v3 }
 0x320   : > { %2420 = vst.msk [vmem:[%s4183_s20 + $0x90] sm:$0xff] %vm479_vm1, %v2388_v0  ;;  %v2389_v16 = vmax.f32 %v2319_v56, 0.0 }
 0x321   : > { %2418 = vst.msk [vmem:[%s4183_s20 + $0x80] sm:$0xff] %vm479_vm1, %v2386_v14  ;;  %v2387_v49 = vmax.f32 %v2311_v46, 0.0 }
 0x322   : > { %2421 = vst.msk [vmem:[%s4183_s20 + $0x98] sm:$0xff] %vm479_vm1, %v2389_v16 }
 0x323   : > { %2419 = vst.msk [vmem:[%s4183_s20 + $0x88] sm:$0xff] %vm479_vm1, %v2387_v49 }
 0x34b   : > { %v2809_v32 = vpop.f32.mrb[20].mxu1 }
 0x34c   : > { %v2332_v8 = vadd.f32 %v2809_v32, %v4168_v53  ;;  %v2323_v36 = vpop.f32.mrb[21].mxu1 }
 0x34d   : > { %v2324_v48 = vadd.f32 %v4168_v53, %v2323_v36  ;;  %v2810_v20 = vpop.f32.mrb[22].mxu1 }
 0x34e   : > { %v2392_v1 = vmax.f32 %v2332_v8, 0.0  ;;  %v2335_v60 = vadd.f32 %v2810_v20, %v4168_v53  ;;  %v2326_v25 = vpop.f32.mrb[23].mxu1 }
 0x34f   : > { %v2390_v10 = vmax.f32 %v2324_v48, 0.0  ;;  %v2327_v62 = vadd.f32 %v4168_v53, %v2326_v25 }
 0x350   : > { %2424 = vst.msk [vmem:[%s4183_s20 + $0xb0] sm:$0xff] %vm479_vm1, %v2392_v1  ;;  %v2393_v7 = vmax.f32 %v2335_v60, 0.0 }
 0x351   : > { %2422 = vst.msk [vmem:[%s4183_s20 + $0xa0] sm:$0xff] %vm479_vm1, %v2390_v10  ;;  %v2391_v61 = vmax.f32 %v2327_v62, 0.0 }
 0x352   : > { %2425 = vst.msk [vmem:[%s4183_s20 + $0xb8] sm:$0xff] %vm479_vm1, %v2393_v7 }
 0x353   : > { %2423 = vst.msk [vmem:[%s4183_s20 + $0xa8] sm:$0xff] %vm479_vm1, %v2391_v61 }
 0x37b   : > { %v2813_v5 = vpop.f32.mrb[24].mxu1 }
 0x37c   : > { %v2348_v13 = vadd.f32 %v2813_v5, %v4168_v53  ;;  %v2339_v11 = vpop.f32.mrb[25].mxu1 }
 0x37d   : > { %v2340_v34 = vadd.f32 %v4168_v53, %v2339_v11  ;;  %v2814_v38 = vpop.f32.mrb[26].mxu1 }
 0x37e   : > { %v2396_v63 = vmax.f32 %v2348_v13, 0.0  ;;  %v2351_v26 = vadd.f32 %v2814_v38, %v4168_v53  ;;  %v2342_v50 = vpop.f32.mrb[27].mxu1 }
 0x37f   : > { %v2394_v57 = vmax.f32 %v2340_v34, 0.0  ;;  %v2343_v45 = vadd.f32 %v4168_v53, %v2342_v50 }
 0x380   : > { %2428 = vst.msk [vmem:[%s4183_s20 + $0xd0] sm:$0xff] %vm479_vm1, %v2396_v63  ;;  %v2397_v17 = vmax.f32 %v2351_v26, 0.0 }
 0x381   : > { %2426 = vst.msk [vmem:[%s4183_s20 + $0xc0] sm:$0xff] %vm479_vm1, %v2394_v57  ;;  %v2395_v28 = vmax.f32 %v2343_v45, 0.0 }
 0x382   : > { %2429 = vst.msk [vmem:[%s4183_s20 + $0xd8] sm:$0xff] %vm479_vm1, %v2397_v17 }
 0x383   : > { %2427 = vst.msk [vmem:[%s4183_s20 + $0xc8] sm:$0xff] %vm479_vm1, %v2395_v28 }
 0x39b   : > { %v2817_v41 = vpop.f32.mrb[28].mxu1 }
 0x39c   : > { %v2364_v6 = vadd.f32 %v2817_v41, %v4168_v53  ;;  %v2355_v35 = vpop.f32.mrb[29].mxu1 }
 0x39d   : > { %v2356_v18 = vadd.f32 %v4168_v53, %v2355_v35  ;;  %v2818_v33 = vpop.f32.mrb[30].mxu1 }
 0x39e   : > { %v2400_v9 = vmax.f32 %v2364_v6, 0.0  ;;  %v2367_v40 = vadd.f32 %v2818_v33, %v4168_v53  ;;  %v2358_v15 = vpop.f32.mrb[31].mxu1 }
 0x39f   : > { %v2398_v22 = vmax.f32 %v2356_v18, 0.0  ;;  %v2359_v39 = vadd.f32 %v4168_v53, %v2358_v15 }
 0x3a0   : > { %2432 = vst.msk [vmem:[%s4183_s20 + $0xf0] sm:$0xff] %vm479_vm1, %v2400_v9  ;;  %v2401_v27 = vmax.f32 %v2367_v40, 0.0 }
 0x3a1   : > { %2430 = vst.msk [vmem:[%s4183_s20 + $0xe0] sm:$0xff] %vm479_vm1, %v2398_v22  ;;  %v2399_v43 = vmax.f32 %v2359_v39, 0.0 }
 0x3a2   : > { %2433 = vst.msk [vmem:[%s4183_s20 + $0xf8] sm:$0xff] %vm479_vm1, %v2401_v27 }
 0x3a3   : > { %2431 = vst.msk [vmem:[%s4183_s20 + $0xe8] sm:$0xff] %vm479_vm1, %v2399_v43 }
 0x3a4 PF: > { %s19_s27 = sadd.s32 1, %s2891_s27  }
 0x3a5   : > { %p16_p4 = scmp.ge.s32.totalorder %s19_s27, 4  }
 0x3a7   :  { %18 = sbr.rel (!%p16_p4) target bundleno = 1 (0x1), region = 101 }

// kernel: inception_forward.3
= control target key start
LH: loop header
LB: loop body
LE: loop exit
PB: predicated region body
PF: predicated region fallthrough
CT: control target
= control target key end

     0   :  { %s1615_s21 = smov 0   ;;  %s2028_s0 = inlined_call_operand.vmem [shape: bf16[512,36], index: 0, kind: input, shape index: {}]   ;;  %s2029_s1 = inlined_call_operand.vmem [shape: bf16[512,50], index: 1, kind: input, shape index: {}]   ;;  %s2030_s2 = inlined_call_operand.vmem [shape: bf16[36,8], index: 2, kind: input, shape index: {}]   ;;  %s2031_s3 = inlined_call_operand.vmem [shape: f32[1,8], index: 3, kind: input, shape index: {}]   ;;  %s2032_s4 = inlined_call_operand.vmem [shape: bf16[50,4], index: 4, kind: input, shape index: {}]   ;;  %s2033_s5 = inlined_call_operand.vmem [shape: f32[1,4], index: 5, kind: input, shape index: {}]   ;;  %s2034_s6 = inlined_call_operand.vmem [shape: f32[512,12], index: 6, kind: output, shape index: {}]  }
   0x1 LB: > { %s1318_s22 = sadd.s32 4294967295, %s1577_s21   ;;  %p1322_p0 = scmp.ge.s32.totalorder %s1577_s21, 1  ;;  %s1577_s21 = sphi %s1615_s21, %s16_s21  }
   0x2   : > { %p224_p1 = scmp.lt.s32.totalorder %s1577_s21, 3 }
   0x4   : > { %p225_p2 = pnand %p1322_p0, %p224_p1 }
   0x5   : > { %v1532_v0 = vld [vmem:[%s2032_s4] sm:$0xff] (!%p225_p2)   ;;  %v1533_v1 = vld [vmem:[%s2032_s4 + $0x8] sm:$0xff] (!%p225_p2)   ;;  %s1323_s27 = sshll.u32 (!%p225_p2), %s1318_s22, 5  ;;  %v1534_v2 = vld [vmem:[%s2032_s4 + $0x10] sm:$0xff] (!%p225_p2)   ;;  %vm810_vm0 = vcmask (!%p225_p2), 408576   ;;  %vm859_vm1 = vcmask (!%p225_p2), 1040384  }
   0x6   : > { %228 = sbr.rel (%p225_p2) target bundleno = 418 (0x1a2), region = 44  ;;  %1481 = vmatprep.subr.bf16.mxu1 (!%p225_p2), %v1532_v0  ;;  %p260_p3 = scmp.lt.s32.totalorder (!%p225_p2), %s1323_s27, 63  ;;  %v1552_v3 = vld [vmem:[%s2030_s2] sm:$0xff] (!%p225_p2)   ;;  %v1553_v4 = vld [vmem:[%s2030_s2 + $0x8] sm:$0xff] (!%p225_p2)   ;;  %vm466_vm2 = vcmask (!%p225_p2), 1041408   ;;  %vm417_vm3 = vcmask (!%p225_p2), 293888  }
   0x7   : > { %1482 = vmatpush3.bf16.msra.mxu1 (!%p225_p2), %v1532_v0  ;;  %v1535_v5 = vld [vmem:[%s2032_s4 + $0x18] ss:$0 sps:$4 sm:$0x11] (!%p225_p2)   ;;  %1443 = vmatprep.subr.bf16.mxu0 (!%p225_p2), %v1552_v3  ;;  %v1554_v6 = vld [vmem:[%s2030_s2 + $0x10] ss:$0 sps:$4 sm:$0x33] (!%p225_p2)  }
   0x8   : > { %1483 = vmatprep.subr.bf16.mxu1 (!%p225_p2), %v1533_v1  ;;  %1444 = vmatpush3.bf16.msra.mxu0 (!%p225_p2), %v1552_v3  ;;  %v861_v8 = vsel (!%p225_p2), %vm859_vm1, %v1535_v5, 0  ;;  %v468_v9 = vsel (!%p225_p2), %vm466_vm2, %v1554_v6, 0  ;;  %v1724_v41 = vld [vmem:[%s2033_s5] ss:$0 sm:$0xff] (!%p225_p2)  ;;  %s1579_s24 = smov (!%p225_p2), 8   ;;  %vm1184_vm4 = vcmask (!%p225_p2), 64512  }
   0x9   : > { %1445 = vmatprep.subr.bf16.mxu0 (!%p225_p2), %v1553_v4  ;;  %vm1217_vm5 = vcmask (!%p225_p2), 97280  }
   0xb   : > { %1484 = vmatpush3.bf16.msra.mxu1 (!%p225_p2), %v1533_v1 }
   0xc   : > { %1485 = vmatprep.subr.bf16.mxu1 (!%p225_p2), %v1534_v2  ;;  %1446 = vmatpush3.bf16.msra.mxu0 (!%p225_p2), %v1553_v4 }
   0xd   : > { %s2036_s27 = smov (!%p260_p3, %s1323_s27), 63  ;;  %1521 = vmatprep.subr.msk.bf16.mxu0 %vm466_vm2, %v1554_v6 }
   0xe   : > { %s1324_s12 = sshll.u32 %s2036_s27, 2  ;;  %s1328_s28 = sshll.u32 %s2036_s27, 3 }
   0xf   : > { %s1647_s15 = scalar_lea.vmem %s2029_s1, %s1324_s12  ;;  %1486 = vmatpush3.bf16.msra.mxu1 %v1534_v2  ;;  %s1661_s20 = scalar_lea.vmem %s2028_s0, %s1324_s12 }
  0x10   : > { %v1536_v7 = vld [vmem:[%s1647_s15] sm:$0xff]   ;;  %1522 = vmatprep.subr.msk.bf16.mxu1 %vm859_vm1, %v1535_v5  ;;  %v1537_v10 = vld [vmem:[%s1647_s15 + $0x8] sm:$0xff]   ;;  %v1538_v11 = vld [vmem:[%s1647_s15 + $0x10] sm:$0xff]   ;;  %1448 = vmatpush3.bf16.msra.mxu0 %v468_v9  ;;  %s1871_s7 = scalar_lea.vmem %s2034_s6, %s1328_s28 }
  0x11   : > { %1489 = vmatprep.mubr.msk.bf16.mxu1 %vm810_vm0, %v1536_v7  ;;  %v1539_v12 = vld [vmem:[%s1647_s15 + $0x18] sm:$0xff]   ;;  %v1540_v13 = vld [vmem:[%s1647_s15 + $0x20] sm:$0xff]   ;;  %v1556_v15 = vld [vmem:[%s1661_s20 + $0x8] sm:$0xff]  }
  0x12   : > { %v1555_v14 = vld [vmem:[%s1661_s20] sm:$0xff]   ;;  %v1557_v16 = vld [vmem:[%s1661_s20 + $0x10] sm:$0xff]   ;;  %v1541_v17 = vld [vmem:[%s1647_s15 + $0x28] sm:$0xff]  }
  0x13   : > { %1488 = vmatpush3.bf16.msra.mxu1 %v861_v8  ;;  %1449 = vmatprep.mubr.msk.bf16.mxu0 %vm417_vm3, %v1555_v14  ;;  %v1542_v18 = vld [vmem:[%s1647_s15 + $0x30] sm:$0xff]   ;;  %v1558_v19 = vld [vmem:[%s1661_s20 + $0x18] sm:$0xff]   ;;  %v1559_v20 = vld [vmem:[%s1661_s20 + $0x20] sm:$0xff]  }
  0x14   : > { %1450 = vmatmul.mubr.msk.bf16.vlgmr.msra.gmra.mrb[0].mxu0 %vm417_vm3, %v1556_v15  ;;  %v1543_v21 = vld [vmem:[%s1647_s15 + $0x38] sm:$0xff]   ;;  %v1544_v22 = vld [vmem:[%s1647_s15 + $0x40] sm:$0xff]   ;;  %v1560_v23 = vld [vmem:[%s1661_s20 + $0x28] sm:$0xff]  }
  0x15   : > { %1453 = vmatprep.mubr.msk.bf16.mxu0 %vm417_vm3, %v1557_v16  ;;  %v1561_v24 = vld [vmem:[%s1661_s20 + $0x30] sm:$0xff]   ;;  %v1545_v25 = vld [vmem:[%s1647_s15 + $0x48] sm:$0xff]   ;;  %v1562_v27 = vld [vmem:[%s1661_s20 + $0x38] sm:$0xff]  }
  0x16   : > { %1490 = vmatmul.mubr.msk.bf16.vlgmr.msra.gmra.mrb[0].mxu1 %vm810_vm0, %v1537_v10  ;;  %v1546_v26 = vld [vmem:[%s1647_s15 + $0x50] sm:$0xff]   ;;  %v1563_v28 = vld [vmem:[%s1661_s20 + $0x40] sm:$0xff]   ;;  %v1547_v29 = vld [vmem:[%s1647_s15 + $0x58] sm:$0xff]  }
  0x17   : > { %1493 = vmatprep.mubr.msk.bf16.mxu1 %vm810_vm0, %v1538_v11  ;;  %v1548_v30 = vld [vmem:[%s1647_s15 + $0x60] sm:$0xff]   ;;  %v1564_v31 = vld [vmem:[%s1661_s20 + $0x48] sm:$0xff]   ;;  %v1565_v32 = vld [vmem:[%s1661_s20 + $0x50] sm:$0xff]  }
  0x18   : > { %v1549_v33 = vld [vmem:[%s1647_s15 + $0x68] sm:$0xff]   ;;  %v1550_v34 = vld [vmem:[%s1647_s15 + $0x70] sm:$0xff]   ;;  %v1566_v35 = vld [vmem:[%s1661_s20 + $0x58] sm:$0xff]  }
  0x19   : > { %v1567_v36 = vld [vmem:[%s1661_s20 + $0x60] sm:$0xff]   ;;  %v1551_v37 = vld [vmem:[%s1647_s15 + $0x78] sm:$0xff]   ;;  %v1568_v38 = vld [vmem:[%s1661_s20 + $0x68] sm:$0xff]  }
  0x1a   : > { %v1569_v39 = vld [vmem:[%s1661_s20 + $0x70] sm:$0xff]   ;;  %v1570_v40 = vld [vmem:[%s1661_s20 + $0x78] sm:$0xff]  }
  0x1c   : > { %1454 = vmatmul.mubr.msk.bf16.gmra.mrb[4].mxu0 %vm417_vm3, %v1558_v19 }
  0x1d   : > { %1457 = vmatprep.mubr.msk.bf16.mxu0 %vm417_vm3, %v1559_v20 }
  0x1e   : > { %1494 = vmatmul.mubr.msk.bf16.gmra.mrb[4].mxu1 %vm810_vm0, %v1539_v12 }
  0x1f   : > { %1497 = vmatprep.mubr.msk.bf16.mxu1 %vm810_vm0, %v1540_v13 }
  0x24   : > { %1458 = vmatmul.mubr.msk.bf16.gmra.mrb[8].mxu0 %vm417_vm3, %v1560_v23 }
  0x25   : > { %1461 = vmatprep.mubr.msk.bf16.mxu0 %vm417_vm3, %v1561_v24 }
  0x26   : > { %1498 = vmatmul.mubr.msk.bf16.gmra.mrb[8].mxu1 %vm810_vm0, %v1541_v17 }
  0x27   : > { %1501 = vmatprep.mubr.msk.bf16.mxu1 %vm810_vm0, %v1542_v18 }
  0x2c   : > { %1462 = vmatmul.mubr.msk.bf16.gmra.mrb[12].mxu0 %vm417_vm3, %v1562_v27 }
  0x2d   : > { %1465 = vmatprep.mubr.msk.bf16.mxu0 %vm417_vm3, %v1563_v28 }
  0x2e   : > { %1502 = vmatmul.mubr.msk.bf16.gmra.mrb[12].mxu1 %vm810_vm0, %v1543_v21 }
  0x2f   : > { %1505 = vmatprep.mubr.msk.bf16.mxu1 %vm810_vm0, %v1544_v22 }
  0x34   : > { %1466 = vmatmul.mubr.msk.bf16.gmra.mrb[16].mxu0 %vm417_vm3, %v1564_v31 }
  0x35   : > { %1469 = vmatprep.mubr.msk.bf16.mxu0 %vm417_vm3, %v1565_v32 }
  0x36   : > { %1506 = vmatmul.mubr.msk.bf16.gmra.mrb[16].mxu1 %vm810_vm0, %v1545_v25 }
  0x37   : > { %1509 = vmatprep.mubr.msk.bf16.mxu1 %vm810_vm0, %v1546_v26 }
  0x3c   : > { %1470 = vmatmul.mubr.msk.bf16.gmra.mrb[20].mxu0 %vm417_vm3, %v1566_v35 }
  0x3d   : > { %1473 = vmatprep.mubr.msk.bf16.mxu0 %vm417_vm3, %v1567_v36 }
  0x3e   : > { %1510 = vmatmul.mubr.msk.bf16.gmra.mrb[20].mxu1 %vm810_vm0, %v1547_v29 }
  0x3f   : > { %1513 = vmatprep.mubr.msk.bf16.mxu1 %vm810_vm0, %v1548_v30 }
  0x44   : > { %1474 = vmatmul.mubr.msk.bf16.gmra.mrb[24].mxu0 %vm417_vm3, %v1568_v38 }
  0x45   : > { %1477 = vmatprep.mubr.msk.bf16.mxu0 %vm417_vm3, %v1569_v39 }
  0x46   : > { %1514 = vmatmul.mubr.msk.bf16.gmra.mrb[24].mxu1 %vm810_vm0, %v1549_v33 }
  0x47   : > { %1517 = vmatprep.mubr.msk.bf16.mxu1 %vm810_vm0, %v1550_v34 }
  0x4c   : > { %1478 = vmatmul.mubr.msk.bf16.gmra.mrb[28].mxu0 %vm417_vm3, %v1570_v40 }
  0x4e   : > { %1518 = vmatmul.mubr.msk.bf16.gmra.mrb[28].mxu1 %vm810_vm0, %v1551_v37 }
  0xe7   : > { %v1734_v57 = vpop.f32.mrb[0].mxu0 }
  0xe8   : > { %v1737_v59 = vpop.f32.mrb[1].mxu0 }
  0xe9   : > { %v1491_v42 = vpop.f32.mrb[0].mxu1  ;;  %v1740_v63 = vpop.f32.mrb[2].mxu0 }
  0xea   : > { %v906_v43 = vadd.f32 %v1491_v42, %v1724_v41  ;;  %v897_v44 = vpop.f32.mrb[1].mxu1  ;;  %v1743_v1 = vpop.f32.mrb[3].mxu0 }
  0xeb   : > { %v898_v45 = vadd.f32 %v1724_v41, %v897_v44  ;;  %v1492_v46 = vpop.f32.mrb[2].mxu1 }
  0xec   : > { %v1026_v47 = vmax.f32 %v906_v43, 0.0  ;;  %v909_v48 = vadd.f32 %v1492_v46, %v1724_v41  ;;  %v900_v49 = vpop.f32.mrb[3].mxu1 }
  0xed   : > { %v1024_v50 = vmax.f32 %v898_v45, 0.0  ;;  %v901_v51 = vadd.f32 %v1724_v41, %v900_v49 }
  0xee   : > { %1092 = vrot.lane.b32.xlu1 %v1026_v47, %s1579_s24  ;;  %v1027_v52 = vmax.f32 %v909_v48, 0.0 }
  0xef   : > { %1088 = vrot.lane.b32.xlu0 %v1024_v50, %s1579_s24  ;;  %v1025_v53 = vmax.f32 %v901_v51, 0.0  ;;  %v1749_v9 = vpop.f32.mrb[4].mxu0 }
  0xf0   : > { %v1752_v11 = vpop.f32.mrb[5].mxu0 }
  0xf1   : > { %v1495_v54 = vpop.f32.mrb[4].mxu1  ;;  %v1756_v15 = vpop.f32.mrb[6].mxu0 }
  0xf2   : > { %v922_v55 = vadd.f32 %v1495_v54, %v1724_v41  ;;  %1094 = vrot.lane.b32.xlu1 %v1027_v52, %s1579_s24  ;;  %v913_v56 = vpop.f32.mrb[5].mxu1  ;;  %v1759_v17 = vpop.f32.mrb[7].mxu0 }
  0xf3   : > { %v1496_v58 = vpop.f32.mrb[6].mxu1  ;;  %1090 = vrot.lane.b32.xlu0 %v1025_v53, %s1579_s24  ;;  %v914_v0 = vadd.f32 %v1724_v41, %v913_v56 }
  0xf4   : > { %v1030_v60 = vmax.f32 %v922_v55, 0.0  ;;  %v925_v61 = vadd.f32 %v1496_v58, %v1724_v41  ;;  %v916_v62 = vpop.f32.mrb[7].mxu1 }
  0xf5   : > { %v917_v3 = vadd.f32 %v1724_v41, %v916_v62  ;;  %v1028_v4 = vmax.f32 %v914_v0, 0.0 }
  0xf6   : > { %v1031_v2 = vmax.f32 %v925_v61, 0.0 }
  0xf7   : > { %1100 = vrot.lane.b32.xlu0 %v1030_v60, %s1579_s24  ;;  %v1029_v6 = vmax.f32 %v917_v3, 0.0  ;;  %v1765_v25 = vpop.f32.mrb[8].mxu0 }
  0xf8   : > { %1102 = vrot.lane.b32.xlu1 %v1031_v2, %s1579_s24  ;;  %v1768_v27 = vpop.f32.mrb[9].mxu0 }
  0xf9   : > { %v1499_v5 = vpop.f32.mrb[8].mxu1  ;;  %v1772_v31 = vpop.f32.mrb[10].mxu0 }
  0xfa   : > { %v938_v7 = vadd.f32 %v1499_v5, %v1724_v41  ;;  %v929_v8 = vpop.f32.mrb[9].mxu1  ;;  %v1775_v33 = vpop.f32.mrb[11].mxu0 }
  0xfb   : > { %v1500_v10 = vpop.f32.mrb[10].mxu1  ;;  %1096 = vrot.lane.b32.xlu0 %v1028_v4, %s1579_s24  ;;  %v930_v16 = vadd.f32 %v1724_v41, %v929_v8 }
  0xfc   : > { %v1034_v12 = vmax.f32 %v938_v7, 0.0  ;;  %v941_v13 = vadd.f32 %v1500_v10, %v1724_v41  ;;  %v932_v14 = vpop.f32.mrb[11].mxu1  ;;  %1098 = vrot.lane.b32.xlu1 %v1029_v6, %s1579_s24 }
  0xfd   : > { %v933_v19 = vadd.f32 %v1724_v41, %v932_v14  ;;  %v1032_v20 = vmax.f32 %v930_v16, 0.0 }
  0xfe   : > { %v1035_v18 = vmax.f32 %v941_v13, 0.0 }
  0xff   : > { %1108 = vrot.lane.b32.xlu0 %v1034_v12, %s1579_s24  ;;  %v1033_v22 = vmax.f32 %v933_v19, 0.0  ;;  %v1781_v42 = vpop.f32.mrb[12].mxu0 }
 0x100   : > { %1110 = vrot.lane.b32.xlu1 %v1035_v18, %s1579_s24  ;;  %v1784_v44 = vpop.f32.mrb[13].mxu0 }
 0x101   : > { %v1503_v21 = vpop.f32.mrb[12].mxu1  ;;  %v1788_v48 = vpop.f32.mrb[14].mxu0 }
 0x102   : > { %v954_v23 = vadd.f32 %v1503_v21, %v1724_v41  ;;  %v945_v24 = vpop.f32.mrb[13].mxu1  ;;  %v1791_v50 = vpop.f32.mrb[15].mxu0 }
 0x103   : > { %v1504_v26 = vpop.f32.mrb[14].mxu1  ;;  %1104 = vrot.lane.b32.xlu0 %v1032_v20, %s1579_s24  ;;  %v946_v32 = vadd.f32 %v1724_v41, %v945_v24 }
 0x104   : > { %v1038_v28 = vmax.f32 %v954_v23, 0.0  ;;  %v957_v29 = vadd.f32 %v1504_v26, %v1724_v41  ;;  %v948_v30 = vpop.f32.mrb[15].mxu1  ;;  %1106 = vrot.lane.b32.xlu1 %v1033_v22, %s1579_s24 }
 0x105   : > { %v949_v35 = vadd.f32 %v1724_v41, %v948_v30  ;;  %v1036_v36 = vmax.f32 %v946_v32, 0.0 }
 0x106   : > { %v1039_v34 = vmax.f32 %v957_v29, 0.0 }
 0x107   : > { %1116 = vrot.lane.b32.xlu0 %v1038_v28, %s1579_s24  ;;  %v1037_v38 = vmax.f32 %v949_v35, 0.0  ;;  %v1797_v60 = vpop.f32.mrb[16].mxu0 }
 0x108   : > { %1118 = vrot.lane.b32.xlu1 %v1039_v34, %s1579_s24  ;;  %v1800_v62 = vpop.f32.mrb[17].mxu0 }
 0x109   : > { %v1507_v37 = vpop.f32.mrb[16].mxu1  ;;  %v1804_v4 = vpop.f32.mrb[18].mxu0 }
 0x10a   : > { %v970_v39 = vadd.f32 %v1507_v37, %v1724_v41  ;;  %v961_v40 = vpop.f32.mrb[17].mxu1  ;;  %v1807_v6 = vpop.f32.mrb[19].mxu0 }
 0x10b   : > { %v1508_v43 = vpop.f32.mrb[18].mxu1  ;;  %1112 = vrot.lane.b32.xlu0 %v1036_v36, %s1579_s24  ;;  %v962_v49 = vadd.f32 %v1724_v41, %v961_v40 }
 0x10c   : > { %v1042_v45 = vmax.f32 %v970_v39, 0.0  ;;  %v973_v46 = vadd.f32 %v1508_v43, %v1724_v41  ;;  %v964_v47 = vpop.f32.mrb[19].mxu1  ;;  %1114 = vrot.lane.b32.xlu1 %v1037_v38, %s1579_s24 }
 0x10d   : > { %v965_v52 = vadd.f32 %v1724_v41, %v964_v47  ;;  %v1040_v53 = vmax.f32 %v962_v49, 0.0 }
 0x10e   : > { %v1043_v51 = vmax.f32 %v973_v46, 0.0 }
 0x10f   : > { %1124 = vrot.lane.b32.xlu0 %v1042_v45, %s1579_s24  ;;  %v1041_v55 = vmax.f32 %v965_v52, 0.0  ;;  %v1813_v18 = vpop.f32.mrb[20].mxu0 }
 0x110   : > { %1126 = vrot.lane.b32.xlu1 %v1043_v51, %s1579_s24  ;;  %v1816_v20 = vpop.f32.mrb[21].mxu0 }
 0x111   : > { %v1511_v54 = vpop.f32.mrb[20].mxu1  ;;  %v1820_v24 = vpop.f32.mrb[22].mxu0 }
 0x112   : > { %v986_v56 = vadd.f32 %v1511_v54, %v1724_v41  ;;  %v977_v58 = vpop.f32.mrb[21].mxu1  ;;  %v1823_v28 = vpop.f32.mrb[23].mxu0 }
 0x113   : > { %v1512_v61 = vpop.f32.mrb[22].mxu1  ;;  %1120 = vrot.lane.b32.xlu0 %v1040_v53, %s1579_s24  ;;  %v978_v5 = vadd.f32 %v1724_v41, %v977_v58 }
 0x114   : > { %v1046_v0 = vmax.f32 %v986_v56, 0.0  ;;  %v989_v2 = vadd.f32 %v1512_v61, %v1724_v41  ;;  %v980_v3 = vpop.f32.mrb[23].mxu1  ;;  %1122 = vrot.lane.b32.xlu1 %v1041_v55, %s1579_s24 }
 0x115   : > { %v981_v8 = vadd.f32 %v1724_v41, %v980_v3  ;;  %v1044_v10 = vmax.f32 %v978_v5, 0.0 }
 0x116   : > { %v1047_v7 = vmax.f32 %v989_v2, 0.0 }
 0x117   : > { %1132 = vrot.lane.b32.xlu0 %v1046_v0, %s1579_s24  ;;  %v1045_v13 = vmax.f32 %v981_v8, 0.0  ;;  %v1828_v37 = vpop.f32.mrb[24].mxu0 }
 0x118   : > { %1134 = vrot.lane.b32.xlu1 %v1047_v7, %s1579_s24  ;;  %v1832_v40 = vpop.f32.mrb[25].mxu0 }
 0x119   : > { %v1515_v12 = vpop.f32.mrb[24].mxu1  ;;  %v1835_v45 = vpop.f32.mrb[26].mxu0 }
 0x11a   : > { %v1002_v14 = vadd.f32 %v1515_v12, %v1724_v41  ;;  %v993_v16 = vpop.f32.mrb[25].mxu1  ;;  %v1839_v51 = vpop.f32.mrb[27].mxu0 }
 0x11b   : > { %v1516_v19 = vpop.f32.mrb[26].mxu1  ;;  %1128 = vrot.lane.b32.xlu0 %v1044_v10, %s1579_s24  ;;  %v994_v26 = vadd.f32 %v1724_v41, %v993_v16 }
 0x11c   : > { %v1050_v21 = vmax.f32 %v1002_v14, 0.0  ;;  %v1005_v22 = vadd.f32 %v1516_v19, %v1724_v41  ;;  %v996_v23 = vpop.f32.mrb[27].mxu1  ;;  %1130 = vrot.lane.b32.xlu1 %v1045_v13, %s1579_s24 }
 0x11d   : > { %v997_v30 = vadd.f32 %v1724_v41, %v996_v23  ;;  %v1048_v32 = vmax.f32 %v994_v26, 0.0 }
 0x11e   : > { %v1051_v29 = vmax.f32 %v1005_v22, 0.0 }
 0x11f   : > { %1140 = vrot.lane.b32.xlu0 %v1050_v21, %s1579_s24  ;;  %v1049_v35 = vmax.f32 %v997_v30, 0.0  ;;  %v1844_v55 = vpop.f32.mrb[28].mxu0 }
 0x120   : > { %1142 = vrot.lane.b32.xlu1 %v1051_v29, %s1579_s24  ;;  %v1847_v58 = vpop.f32.mrb[29].mxu0 }
 0x121   : > { %v1519_v34 = vpop.f32.mrb[28].mxu1  ;;  %v1849_v61 = vpop.f32.mrb[30].mxu0 }
 0x122   : > { %v1009_v36 = vpop.f32.mrb[29].mxu1  ;;  %v1018_v46 = vadd.f32 %v1519_v34, %v1724_v41  ;;  %v1852_v0 = vpop.f32.mrb[31].mxu0 }
 0x123   : > { %v1010_v38 = vadd.f32 %v1724_v41, %v1009_v36  ;;  %v1520_v39 = vpop.f32.mrb[30].mxu1  ;;  %1136 = vrot.lane.b32.xlu0 %v1048_v32, %s1579_s24 }
 0x124   : > { %v1012_v43 = vpop.f32.mrb[31].mxu1  ;;  %1138 = vrot.lane.b32.xlu1 %v1049_v35, %s1579_s24  ;;  %v1021_v52 = vadd.f32 %v1520_v39, %v1724_v41  ;;  %v1054_v54 = vmax.f32 %v1018_v46, 0.0 }
 0x125   : > { %v1052_v47 = vmax.f32 %v1010_v38, 0.0  ;;  %v1013_v49 = vadd.f32 %v1724_v41, %v1012_v43  ;;  %v1857_v41 = vld [vmem:[%s2031_s3] ss:$0 sm:$0xff] }
 0x126   : > { %v1055_v56 = vmax.f32 %v1021_v52, 0.0  ;;  %v513_v2 = vadd.f32 %v1734_v57, %v1857_v41  ;;  %v505_v3 = vadd.f32 %v1857_v41, %v1737_v59  ;;  %v516_v7 = vadd.f32 %v1740_v63, %v1857_v41 }
 0x127   : > { %v1053_v53 = vmax.f32 %v1013_v49, 0.0  ;;  %1144 = vrot.lane.b32.xlu0 %v1052_v47, %s1579_s24  ;;  %v508_v10 = vadd.f32 %v1857_v41, %v1743_v1  ;;  %v529_v14 = vadd.f32 %v1749_v9, %v1857_v41  ;;  %v532_v16 = vadd.f32 %v1756_v15, %v1857_v41 }
 0x128   : > { %v633_v5 = vmax.f32 %v513_v2, 0.0  ;;  %v631_v8 = vmax.f32 %v505_v3, 0.0  ;;  %v634_v59 = vmax.f32 %v516_v7, 0.0  ;;  %v521_v29 = vadd.f32 %v1857_v41, %v1752_v11 }
 0x129   : > { %1146 = vrot.lane.b32.xlu1 %v1053_v53, %s1579_s24  ;;  %v632_v13 = vmax.f32 %v508_v10, 0.0  ;;  %v637_v23 = vmax.f32 %v529_v14, 0.0  ;;  %v638_v9 = vmax.f32 %v532_v16, 0.0  ;;  %v524_v15 = vadd.f32 %v1857_v41, %v1759_v17 }
 0x12a   : > { %v635_v32 = vmax.f32 %v521_v29, 0.0  ;;  %v545_v36 = vadd.f32 %v1765_v25, %v1857_v41  ;;  %v548_v38 = vadd.f32 %v1772_v31, %v1857_v41  ;;  %v537_v47 = vadd.f32 %v1857_v41, %v1768_v27 }
 0x12b   : > { %1148 = vrot.lane.b32.xlu0 %v1054_v54, %s1579_s24  ;;  %v636_v17 = vmax.f32 %v524_v15, 0.0  ;;  %v540_v31 = vadd.f32 %v1857_v41, %v1775_v33  ;;  %v561_v27 = vadd.f32 %v1781_v42, %v1857_v41 }
 0x12c   : > { %v641_v43 = vmax.f32 %v545_v36, 0.0  ;;  %v642_v52 = vmax.f32 %v548_v38, 0.0  ;;  %v639_v54 = vmax.f32 %v537_v47, 0.0  ;;  %v596_v36 = vadd.f32 %v1820_v24, %v1857_v41 }
 0x12d   : > { %1150 = vrot.lane.b32.xlu1 %v1055_v56, %s1579_s24  ;;  %v640_v33 = vmax.f32 %v540_v31, 0.0  ;;  %v588_v24 = vadd.f32 %v1857_v41, %v1823_v28 }
 0x12f   : > { %v652_v28 = vmax.f32 %v588_v24, 0.0 }
 0x160   : > { %v1093_v57 = vpop.permute.xlu1 %1092 }
 0x161   : > { %v1187_v12 = vsel %vm1184_vm4, %v633_v5, %v1093_v57  ;;  %v1089_v63 = vpop.permute.xlu0 %1088  ;;  %v564_v5 = vadd.f32 %v1788_v48, %v1857_v41  ;;  %v553_v57 = vadd.f32 %v1857_v41, %v1784_v44  ;;  %v556_v48 = vadd.f32 %v1857_v41, %v1791_v50 }
 0x162   : > { %1220 = vst.msk [vmem:[%s1871_s7 + $0x10] sm:$0xff] %vm1217_vm5, %v1187_v12  ;;  %v1185_v1 = vsel %vm1184_vm4, %v631_v8, %v1089_v63  ;;  %v645_v8 = vmax.f32 %v561_v27, 0.0  ;;  %v577_v44 = vadd.f32 %v1797_v60, %v1857_v41  ;;  %v601_v27 = vadd.f32 %v1857_v41, %v1832_v40 }
 0x163   : > { %1218 = vst.msk [vmem:[%s1871_s7] sm:$0xff] %vm1217_vm5, %v1185_v1  ;;  %v646_v12 = vmax.f32 %v564_v5, 0.0  ;;  %v644_v50 = vmax.f32 %v556_v48, 0.0  ;;  %v617_v40 = vadd.f32 %v1857_v41, %v1847_v58 }
 0x164   : > { %v1095_v19 = vpop.permute.xlu1 %1094 }
 0x165   : > { %v1188_v21 = vsel %vm1184_vm4, %v634_v59, %v1095_v19  ;;  %v1091_v22 = vpop.permute.xlu0 %1090  ;;  %v580_v19 = vadd.f32 %v1804_v4, %v1857_v41  ;;  %v572_v4 = vadd.f32 %v1857_v41, %v1807_v6 }
 0x166   : > { %1221 = vst.msk [vmem:[%s1871_s7 + $0x18] sm:$0xff] %vm1217_vm5, %v1188_v21  ;;  %v1186_v26 = vsel %vm1184_vm4, %v632_v13, %v1091_v22  ;;  %v643_v13 = vmax.f32 %v553_v57, 0.0  ;;  %v649_v22 = vmax.f32 %v577_v44, 0.0  ;;  %v628_v44 = vadd.f32 %v1849_v61, %v1857_v41 }
 0x167   : > { %1219 = vst.msk [vmem:[%s1871_s7 + $0x8] sm:$0xff] %vm1217_vm5, %v1186_v26  ;;  %v569_v26 = vadd.f32 %v1857_v41, %v1800_v62  ;;  %v593_v62 = vadd.f32 %v1813_v18, %v1857_v41  ;;  %v648_v6 = vmax.f32 %v572_v4, 0.0 }
 0x169   : > { %v1101_v30 = vpop.permute.xlu0 %1100  ;;  %v653_v38 = vmax.f32 %v593_v62, 0.0 }
 0x16a   : > { %v1191_v34 = vsel %vm1184_vm4, %v637_v23, %v1101_v30  ;;  %v1103_v35 = vpop.permute.xlu1 %1102  ;;  %v647_v30 = vmax.f32 %v569_v26, 0.0 }
 0x16b   : > { %1224 = vst.msk [vmem:[%s1871_s7 + $0x30] sm:$0xff] %vm1217_vm5, %v1191_v34  ;;  %v1192_v11 = vsel %vm1184_vm4, %v638_v9, %v1103_v35  ;;  %v650_v9 = vmax.f32 %v580_v19, 0.0 }
 0x16c   : > { %1225 = vst.msk [vmem:[%s1871_s7 + $0x38] sm:$0xff] %vm1217_vm5, %v1192_v11 }
 0x16d   : > { %v1097_v39 = vpop.permute.xlu0 %1096 }
 0x16e   : > { %v1189_v46 = vsel %vm1184_vm4, %v635_v32, %v1097_v39  ;;  %v1099_v25 = vpop.permute.xlu1 %1098  ;;  %v585_v39 = vadd.f32 %v1857_v41, %v1816_v20  ;;  %v609_v20 = vadd.f32 %v1828_v37, %v1857_v41 }
 0x16f   : > { %1222 = vst.msk [vmem:[%s1871_s7 + $0x20] sm:$0xff] %vm1217_vm5, %v1189_v46  ;;  %v1190_v49 = vsel %vm1184_vm4, %v636_v17, %v1099_v25  ;;  %v654_v46 = vmax.f32 %v596_v36, 0.0 }
 0x170   : > { %1223 = vst.msk [vmem:[%s1871_s7 + $0x28] sm:$0xff] %vm1217_vm5, %v1190_v49  ;;  %v651_v25 = vmax.f32 %v585_v39, 0.0 }
 0x171   : > { %v1109_v53 = vpop.permute.xlu0 %1108 }
 0x172   : > { %v1195_v56 = vsel %vm1184_vm4, %v641_v43, %v1109_v53  ;;  %v1111_v2 = vpop.permute.xlu1 %1110  ;;  %v612_v53 = vadd.f32 %v1835_v45, %v1857_v41  ;;  %v604_v45 = vadd.f32 %v1857_v41, %v1839_v51  ;;  %v620_v51 = vadd.f32 %v1857_v41, %v1852_v0 }
 0x173   : > { %1228 = vst.msk [vmem:[%s1871_s7 + $0x50] sm:$0xff] %vm1217_vm5, %v1195_v56  ;;  %v1196_v3 = vsel %vm1184_vm4, %v642_v52, %v1111_v2  ;;  %v657_v56 = vmax.f32 %v609_v20, 0.0 }
 0x174   : > { %1229 = vst.msk [vmem:[%s1871_s7 + $0x58] sm:$0xff] %vm1217_vm5, %v1196_v3  ;;  %v658_v5 = vmax.f32 %v612_v53, 0.0 }
 0x175   : > { %v1105_v7 = vpop.permute.xlu0 %1104 }
 0x176   : > { %v1193_v10 = vsel %vm1184_vm4, %v639_v54, %v1105_v7  ;;  %v1107_v42 = vpop.permute.xlu1 %1106  ;;  %v655_v7 = vmax.f32 %v601_v27, 0.0 }
 0x177   : > { %1226 = vst.msk [vmem:[%s1871_s7 + $0x40] sm:$0xff] %vm1217_vm5, %v1193_v10  ;;  %v1194_v59 = vsel %vm1184_vm4, %v640_v33, %v1107_v42  ;;  %v656_v42 = vmax.f32 %v604_v45, 0.0 }
 0x178   : > { %1227 = vst.msk [vmem:[%s1871_s7 + $0x48] sm:$0xff] %vm1217_vm5, %v1194_v59 }
 0x179   : > { %v1117_v63 = vpop.permute.xlu0 %1116 }
 0x17a   : > { %v1199_v1 = vsel %vm1184_vm4, %v645_v8, %v1117_v63  ;;  %v1119_v14 = vpop.permute.xlu1 %1118  ;;  %v659_v63 = vmax.f32 %v617_v40, 0.0 }
 0x17b   : > { %1232 = vst.msk [vmem:[%s1871_s7 + $0x70] sm:$0xff] %vm1217_vm5, %v1199_v1  ;;  %v1200_v16 = vsel %vm1184_vm4, %v646_v12, %v1119_v14  ;;  %v625_v12 = vadd.f32 %v1844_v55, %v1857_v41  ;;  %v660_v1 = vmax.f32 %v620_v51, 0.0 }
 0x17c   : > { %1233 = vst.msk [vmem:[%s1871_s7 + $0x78] sm:$0xff] %vm1217_vm5, %v1200_v16 }
 0x17d   : > { %v1113_v21 = vpop.permute.xlu0 %1112  ;;  %v661_v14 = vmax.f32 %v625_v12, 0.0 }
 0x17e   : > { %v1197_v23 = vsel %vm1184_vm4, %v643_v13, %v1113_v21  ;;  %v1115_v60 = vpop.permute.xlu1 %1114  ;;  %v662_v21 = vmax.f32 %v628_v44, 0.0 }
 0x17f   : > { %1230 = vst.msk [vmem:[%s1871_s7 + $0x60] sm:$0xff] %vm1217_vm5, %v1197_v23  ;;  %v1198_v29 = vsel %vm1184_vm4, %v644_v50, %v1115_v60 }
 0x180   : > { %1231 = vst.msk [vmem:[%s1871_s7 + $0x68] sm:$0xff] %vm1217_vm5, %v1198_v29 }
 0x181   : > { %v1125_v15 = vpop.permute.xlu0 %1124 }
 0x182   : > { %v1203_v32 = vsel %vm1184_vm4, %v649_v22, %v1125_v15  ;;  %v1127_v34 = vpop.permute.xlu1 %1126 }
 0x183   : > { %1236 = vst.msk [vmem:[%s1871_s7 + $0x90] sm:$0xff] %vm1217_vm5, %v1203_v32  ;;  %v1204_v35 = vsel %vm1184_vm4, %v650_v9, %v1127_v34 }
 0x184   : > { %1237 = vst.msk [vmem:[%s1871_s7 + $0x98] sm:$0xff] %vm1217_vm5, %v1204_v35 }
 0x185   : > { %v1121_v11 = vpop.permute.xlu0 %1120 }
 0x186   : > { %v1201_v17 = vsel %vm1184_vm4, %v647_v30, %v1121_v11  ;;  %v1123_v18 = vpop.permute.xlu1 %1122 }
 0x187   : > { %1234 = vst.msk [vmem:[%s1871_s7 + $0x80] sm:$0xff] %vm1217_vm5, %v1201_v17  ;;  %v1202_v43 = vsel %vm1184_vm4, %v648_v6, %v1123_v18 }
 0x188   : > { %1235 = vst.msk [vmem:[%s1871_s7 + $0x88] sm:$0xff] %vm1217_vm5, %v1202_v43 }
 0x189   : > { %v1133_v47 = vpop.permute.xlu0 %1132 }
 0x18a   : > { %v1207_v49 = vsel %vm1184_vm4, %v653_v38, %v1133_v47  ;;  %v1135_v52 = vpop.permute.xlu1 %1134 }
 0x18b   : > { %1240 = vst.msk [vmem:[%s1871_s7 + $0xb0] sm:$0xff] %vm1217_vm5, %v1207_v49  ;;  %v1208_v31 = vsel %vm1184_vm4, %v654_v46, %v1135_v52 }
 0x18c   : > { %1241 = vst.msk [vmem:[%s1871_s7 + $0xb8] sm:$0xff] %vm1217_vm5, %v1208_v31 }
 0x18d   : > { %v1129_v54 = vpop.permute.xlu0 %1128 }
 0x18e   : > { %v1205_v2 = vsel %vm1184_vm4, %v651_v25, %v1129_v54  ;;  %v1131_v37 = vpop.permute.xlu1 %1130 }
 0x18f   : > { %1238 = vst.msk [vmem:[%s1871_s7 + $0xa0] sm:$0xff] %vm1217_vm5, %v1205_v2  ;;  %v1206_v3 = vsel %vm1184_vm4, %v652_v28, %v1131_v37 }
 0x190   : > { %1239 = vst.msk [vmem:[%s1871_s7 + $0xa8] sm:$0xff] %vm1217_vm5, %v1206_v3 }
 0x191   : > { %v1141_v33 = vpop.permute.xlu0 %1140 }
 0x192   : > { %v1211_v8 = vsel %vm1184_vm4, %v657_v56, %v1141_v33  ;;  %v1143_v10 = vpop.permute.xlu1 %1142 }
 0x193   : > { %1244 = vst.msk [vmem:[%s1871_s7 + $0xd0] sm:$0xff] %vm1217_vm5, %v1211_v8  ;;  %v1212_v57 = vsel %vm1184_vm4, %v658_v5, %v1143_v10 }
 0x194   : > { %1245 = vst.msk [vmem:[%s1871_s7 + $0xd8] sm:$0xff] %vm1217_vm5, %v1212_v57 }
 0x195   : > { %v1137_v59 = vpop.permute.xlu0 %1136 }
 0x196   : > { %v1209_v48 = vsel %vm1184_vm4, %v655_v7, %v1137_v59  ;;  %v1139_v58 = vpop.permute.xlu1 %1138 }
 0x197   : > { %1242 = vst.msk [vmem:[%s1871_s7 + $0xc0] sm:$0xff] %vm1217_vm5, %v1209_v48  ;;  %v1210_v13 = vsel %vm1184_vm4, %v656_v42, %v1139_v58 }
 0x198   : > { %1243 = vst.msk [vmem:[%s1871_s7 + $0xc8] sm:$0xff] %vm1217_vm5, %v1210_v13 }
 0x199   : > { %v1145_v0 = vpop.permute.xlu0 %1144 }
 0x19a   : > { %v1213_v55 = vsel %vm1184_vm4, %v659_v63, %v1145_v0 }
 0x19b   : > { %1246 = vst.msk [vmem:[%s1871_s7 + $0xe0] sm:$0xff] %vm1217_vm5, %v1213_v55  ;;  %v1147_v16 = vpop.permute.xlu1 %1146 }
 0x19c   : > { %v1214_v19 = vsel %vm1184_vm4, %v660_v1, %v1147_v16 }
 0x19d   : > { %1247 = vst.msk [vmem:[%s1871_s7 + $0xe8] sm:$0xff] %vm1217_vm5, %v1214_v19  ;;  %v1149_v50 = vpop.permute.xlu0 %1148 }
 0x19e   : > { %v1215_v22 = vsel %vm1184_vm4, %v661_v14, %v1149_v50 }
 0x19f   : > { %1248 = vst.msk [vmem:[%s1871_s7 + $0xf0] sm:$0xff] %vm1217_vm5, %v1215_v22  ;;  %v1151_v23 = vpop.permute.xlu1 %1150 }
 0x1a0   : > { %v1216_v26 = vsel %vm1184_vm4, %v662_v21, %v1151_v23 }
 0x1a1   : > { %1249 = vst.msk [vmem:[%s1871_s7 + $0xf8] sm:$0xff] %vm1217_vm5, %v1216_v26 }
 0x1a2 PF: > { %s16_s21 = sadd.s32 1, %s1577_s21  }
 0x1a3   : > { %p13_p4 = scmp.ge.s32.totalorder %s16_s21, 4  }
 0x1a5   :  { %15 = sbr.rel (!%p13_p4) target bundleno = 1 (0x1), region = 77 }

</bundles_post_ra>
